<compile_context>
chip_gen: v6e
topology: v6e:2x2x1
jax: 0.10.0
libtpu: 0.0.40
codegen_flags: <defaults>
</compile_context>

<pallas_src>
import functools

import jax
import jax.numpy as jnp
from jax import lax
from jax.experimental import pallas as pl
from jax.experimental.pallas import tpu as pltpu


def _round_up(x, m):
    return (x + m - 1) // m * m


def _double_conv_kernel(x_ref, w1_ref, b1_ref, w2_ref, b2_ref, w3_ref, b3_ref,
                        o_ref, slab3_ref, *,
                        H, W, Wp, Cp, K, P, TH, NBT, LEAD3, CH):
    """One (batch, row-tile) pair per grid step; band layout row = y*Wp + x_pad.

    x_ref    : (WROWS, K*Cin) bf16  kx-folded zero-padded input window of this
                                    row tile (incl. halo rows).
    w1_ref   : (K, K*Cin, Cp) bf16  per-ky conv1 matrices (kx folded in).
    w2_ref   : (Cp, Cp)       bf16  1x1 conv.
    w3_ref   : (K*K, Cp, Cp)  bf16  per-tap conv3 matrices.
    b*_ref   : (1, Cp)        f32   zero in padded channels.
    o_ref    : (NBT, Cp)      f32   output band of this tile (border columns /
                                    padded rows are garbage, stripped in the
                                    wrapper; stores are lane-dense).
    slab3_ref: (S3, Cp)       bf16  staged h2 (with K-1 halo rows) feeding
                                    conv3. Guard rows only ever feed garbage
                                    output columns, so they are never zeroed.
    """
    t = pl.program_id(1)
    y0 = t * TH - P                       # global image row of halo-band row 0
    halo = P * Wp
    # Row-validity bounds expressed on flat band rows (avoids vector int div).
    row_lo = (0 - y0) * Wp
    row_hi = (H - y0) * Wp

    # ---------------- phase 1: conv1 -> ReLU, conv2(1x1) -> ReLU, residual;
    # stage h2 into slab3 (and h1+h2 into o_ref for the non-halo rows).
    def stage(c0, n, to_out):
        acc = None
        for ky in range(K):               # kx is folded into the contraction
            xs = x_ref[pl.ds(c0 + ky * Wp, n), :]
            d = jnp.dot(xs, w1_ref[ky], preferred_element_type=jnp.float32)
            acc = d if acc is None else acc + d
        h1 = jnp.maximum(acc + b1_ref[...], 0.0)
        a2 = jnp.dot(h1.astype(jnp.bfloat16), w2_ref[...],
                     preferred_element_type=jnp.float32) + b2_ref[...]
        h2 = jnp.maximum(a2, 0.0) + h1    # identity_1 (eval-mode dropout = id)
        # Zero rows/columns that lie outside the real image: they are conv3's
        # zero padding (and, for border tiles, the out-of-image halo rows).
        r = lax.broadcasted_iota(jnp.int32, (n, 1), 0) + c0
        col = r % Wp
        valid = ((col >= P) & (col < P + W) & (r >= row_lo) & (r < row_hi))
        slab3_ref[pl.ds(LEAD3 + c0, n), :] = jnp.where(
            valid, h2, 0.0).astype(jnp.bfloat16)
        if to_out:
            # identity_full + identity_1, written once per chunk.
            o_ref[pl.ds(c0 - halo, n), :] = h1 + h2

    if halo > 0:
        stage(0, halo, False)                       # top halo rows (recompute)
    c0 = halo
    while c0 < halo + NBT:                          # this tile's output rows
        n = min(CH, halo + NBT - c0)
        stage(c0, n, True)
        c0 += n
    if halo > 0:
        stage(halo + NBT, halo, False)              # bottom halo rows

    # ---------------- phase 2: conv3 -> ReLU, fused final residual sum.
    c0 = 0
    while c0 < NBT:
        n = min(CH, NBT - c0)
        acc = None
        for ky in range(K):
            for kx in range(K):
                s = slab3_ref[pl.ds(LEAD3 - P + c0 + ky * Wp + kx, n), :]
                d = jnp.dot(s, w3_ref[ky * K + kx],
                            preferred_element_type=jnp.float32)
                acc = d if acc is None else acc + d
        h3 = jnp.maximum(acc + b3_ref[...], 0.0)
        o_ref[pl.ds(c0, n), :] = o_ref[pl.ds(c0, n), :] + h3
        c0 += n


def double_conv(x_nchw, w1, b1, w2, b2, w3, b3):
    """x_nchw: (B, Cin, H, W).  Weights in PyTorch layout (Cout, Cin, K, K)."""
    B, Cin, H, W = x_nchw.shape
    Cout, _, K, _ = w1.shape
    assert K % 2 == 1, "padding=K//2 only matches PyTorch shapes for odd K"
    P = K // 2
    assert P <= 8

    # Lane-dense channel count; band width (8-aligned when W is large enough
    # that alignment beats the extra garbage columns).
    Cp = _round_up(Cout, 128)
    Wp = W + 2 * P if W < 32 else _round_up(W + 2 * P, 8)

    # Row tiling: each grid step handles TH output rows plus a K-1 halo of
    # recomputed h1/h2 rows, so conv3 never needs its neighbours' data.
    TH = min(H, max(8, min(64, H // 2)))
    T = -(-H // TH)
    H_pad = T * TH
    WIN = TH + 4 * P                      # X3 rows needed per tile
    WROWS = WIN * Wp
    NBT = TH * Wp                         # output band rows per tile
    NBH = (TH + 2 * P) * Wp               # staged h2 band rows (with halo)
    LEAD3 = _round_up(max(P, 1), 8)       # small guard in front of slab3
    S3 = _round_up(LEAD3 + NBH + P, 8)
    CH = 256                              # row chunk for functional tap sums
    KC = K * Cin

    # ---- input preprocessing (one fused HBM pass under jit):
    # NCHW -> NHWC -> zero pad -> fold kx taps onto lanes -> cut overlapping
    # halo'd row windows per tile -> flatten -> single cast to bf16.
    xt = jnp.transpose(x_nchw, (0, 2, 3, 1)).astype(jnp.float32)
    xp = jnp.pad(xt, ((0, 0), (2 * P, H_pad - H + 2 * P),
                      (2 * P, Wp - W), (0, 0)))
    x3 = jnp.concatenate([xp[:, :, kx:kx + Wp, :] for kx in range(K)], axis=-1)
    xwin = jnp.stack([x3[:, t * TH:t * TH + WIN] for t in range(T)], axis=1)
    xwin = xwin.reshape(B, T, WROWS, KC).astype(jnp.bfloat16)

    # ---- weights: matmul form, output channels zero-padded to Cp, bf16.
    pc = Cp - Cout
    w1f = jnp.transpose(w1, (2, 3, 1, 0)).reshape(K, KC, Cout)
    w1f = jnp.pad(w1f, ((0, 0), (0, 0), (0, pc))).astype(jnp.bfloat16)
    w2f = jnp.pad(jnp.transpose(w2[:, :, 0, 0], (1, 0)),
                  ((0, pc), (0, pc))).astype(jnp.bfloat16)
    w3f = jnp.transpose(w3, (2, 3, 1, 0)).reshape(K * K, Cout, Cout)
    w3f = jnp.pad(w3f, ((0, 0), (0, pc), (0, pc))).astype(jnp.bfloat16)
    b1f = jnp.pad(b1, (0, pc)).reshape(1, Cp).astype(jnp.float32)
    b2f = jnp.pad(b2, (0, pc)).reshape(1, Cp).astype(jnp.float32)
    b3f = jnp.pad(b3, (0, pc)).reshape(1, Cp).astype(jnp.float32)

    kernel = functools.partial(_double_conv_kernel, H=H, W=W, Wp=Wp, Cp=Cp,
                               K=K, P=P, TH=TH, NBT=NBT, LEAD3=LEAD3, CH=CH)

    flops = 2 * B * H * W * (K * K * Cin * Cout + Cout * Cout
                             + K * K * Cout * Cout)
    bytes_accessed = (xwin.size * 2 + B * T * NBT * Cp * 4
                      + (w1f.size + w2f.size + w3f.size) * 2
                      + (b1f.size + b2f.size + b3f.size) * 4)

    # Generous per-step VMEM bound: double-buffered blocks + scratch + margin.
    vmem_bytes = (2 * WROWS * KC * 2 + 2 * NBT * Cp * 4
                  + 2 * (w1f.size + w2f.size + w3f.size) * 2
                  + 2 * (b1f.size + b2f.size + b3f.size) * 4
                  + S3 * Cp * 2)
    vmem_limit = int(min(max(2 * vmem_bytes, 16 << 20), 96 << 20))

    out_band = pl.pallas_call(
        kernel,
        out_shape=jax.ShapeDtypeStruct((B, T, NBT, Cp), jnp.float32),
        grid_spec=pltpu.PrefetchScalarGridSpec(
            num_scalar_prefetch=0,
            grid=(B, T),
            in_specs=[
                pl.BlockSpec((None, None, WROWS, KC),
                             lambda b, t: (b, t, 0, 0)),
                pl.BlockSpec((K, KC, Cp), lambda b, t: (0, 0, 0)),
                pl.BlockSpec((1, Cp), lambda b, t: (0, 0)),
                pl.BlockSpec((Cp, Cp), lambda b, t: (0, 0)),
                pl.BlockSpec((1, Cp), lambda b, t: (0, 0)),
                pl.BlockSpec((K * K, Cp, Cp), lambda b, t: (0, 0, 0)),
                pl.BlockSpec((1, Cp), lambda b, t: (0, 0)),
            ],
            out_specs=pl.BlockSpec((None, None, NBT, Cp),
                                   lambda b, t: (b, t, 0, 0)),
            scratch_shapes=[
                pltpu.VMEM((S3, Cp), jnp.bfloat16),   # staged h2 (+halo), bf16
            ],
        ),
        compiler_params=pltpu.CompilerParams(
            dimension_semantics=("parallel", "parallel"),
            vmem_limit_bytes=vmem_limit),
        cost_estimate=pl.CostEstimate(flops=flops, transcendentals=0,
                                      bytes_accessed=bytes_accessed),
    )(xwin, w1f, b1f, w2f, b2f, w3f, b3f)

    # (B,T,TH*Wp,Cp) -> (B,H_pad,Wp,Cp); strip pad rows, border columns and
    # padded channels, then back to NCHW.
    out = out_band.reshape(B, H_pad, Wp, Cp)[:, :H, P:P + W, :Cout]
    return jnp.transpose(out, (0, 3, 1, 2))


def _reference(x_nchw, w1, b1, w2, b2, w3, b3):
    """Pure-JAX reference (NCHW convs), dropout in eval mode."""
    dn = ("NCHW", "OIHW", "NCHW")

    def conv(x, w, b, pad):
        y = lax.conv_general_dilated(x, w, window_strides=(1, 1),
                                     padding=[(pad, pad), (pad, pad)],
                                     dimension_numbers=dn)
        return y + b.reshape(1, -1, 1, 1)

    K = w1.shape[-1]
    p = K // 2
    h1 = jnp.maximum(conv(x_nchw, w1, b1, p), 0.0)
    h2 = jnp.maximum(conv(h1, w2, b2, 0), 0.0) + h1
    h3 = jnp.maximum(conv(h2, w3, b3, p), 0.0)
    return h3 + h1 + h2


if __name__ == "__main__":
    B, Cin, Cout, H, W, K = 2, 4, 8, 16, 16, 3

    key = jax.random.PRNGKey(0)
    ks = jax.random.split(key, 7)
    x = jax.random.normal(ks[0], (B, Cin, H, W), jnp.float32)
    # PyTorch-layout weights (Cout, Cin, kH, kW), deterministic synthetic init.
    w1 = jax.random.normal(ks[1], (Cout, Cin, K, K), jnp.float32) * 0.1
    b1 = jax.random.normal(ks[2], (Cout,), jnp.float32) * 0.1
    w2 = jax.random.normal(ks[3], (Cout, Cout, 1, 1), jnp.float32) * 0.1
    b2 = jax.random.normal(ks[4], (Cout,), jnp.float32) * 0.1
    w3 = jax.random.normal(ks[5], (Cout, Cout, K, K), jnp.float32) * 0.1
    b3 = jax.random.normal(ks[6], (Cout,), jnp.float32) * 0.1

    out = jax.jit(double_conv)(x, w1, b1, w2, b2, w3, b3)
    out = jax.block_until_ready(out)

    ref = _reference(x, w1, b1, w2, b2, w3, b3)
    assert out.shape == (B, Cout, H, W), out.shape
    # bf16 MXU operands / bf16 staged h2 -> looser tolerance than pure f32.
    max_err = float(jnp.max(jnp.abs(out - ref)))
    assert jnp.allclose(out, ref, atol=5e-2, rtol=5e-2), max_err

    print("KERNEL_OK")
</pallas_src>

<mosaic_0001>
module attributes {stable_mosaic.version = 11 : i64} {
  func.func @_double_conv_kernel(%arg0: i32, %arg1: i32, %arg2: memref<1x1x216x12xbf16, #tpu.memory_space<vmem>>, %arg3: memref<3x12x128xbf16, #tpu.memory_space<vmem>>, %arg4: memref<1x128xf32, #tpu.memory_space<vmem>>, %arg5: memref<128x128xbf16, #tpu.memory_space<vmem>>, %arg6: memref<1x128xf32, #tpu.memory_space<vmem>>, %arg7: memref<9x128x128xbf16, #tpu.memory_space<vmem>>, %arg8: memref<1x128xf32, #tpu.memory_space<vmem>>, %arg9: memref<1x1x144x128xf32, #tpu.memory_space<vmem>>, %arg10: memref<192x128xbf16, #tpu.memory_space<vmem>>) attributes {dimension_semantics = [#tpu.dimension_semantics<parallel>, #tpu.dimension_semantics<parallel>], iteration_bounds = array<i64: 2, 2>, scalar_prefetch = 0 : i64, scratch_operands = 1 : i64, tpu.core_type = #tpu.core_type<tc>, window_params = [{transform_indices = @transform_0, window_bounds = array<i64: 1, 1, 216, 12>}, {pipeline_mode = #tpu.pipeline_mode<synchronous>, transform_indices = @transform_1, window_bounds = array<i64: 3, 12, 128>}, {pipeline_mode = #tpu.pipeline_mode<synchronous>, transform_indices = @transform_2, window_bounds = array<i64: 1, 128>}, {pipeline_mode = #tpu.pipeline_mode<synchronous>, transform_indices = @transform_3, window_bounds = array<i64: 128, 128>}, {pipeline_mode = #tpu.pipeline_mode<synchronous>, transform_indices = @transform_4, window_bounds = array<i64: 1, 128>}, {pipeline_mode = #tpu.pipeline_mode<synchronous>, transform_indices = @transform_5, window_bounds = array<i64: 9, 128, 128>}, {pipeline_mode = #tpu.pipeline_mode<synchronous>, transform_indices = @transform_6, window_bounds = array<i64: 1, 128>}, {transform_indices = @transform_7, window_bounds = array<i64: 1, 1, 144, 128>}]} {
    %c8_i32 = arith.constant 8 : i32
    %0 = arith.muli %arg1, %c8_i32 : i32
    %c1_i32 = arith.constant 1 : i32
    %1 = arith.subi %0, %c1_i32 : i32
    %c0_i32 = arith.constant 0 : i32
    %2 = arith.subi %c0_i32, %1 : i32
    %c18_i32 = arith.constant 18 : i32
    %3 = arith.muli %2, %c18_i32 : i32
    %c16_i32 = arith.constant 16 : i32
    %4 = arith.subi %c16_i32, %1 : i32
    %c18_i32_0 = arith.constant 18 : i32
    %5 = arith.muli %4, %c18_i32_0 : i32
    %c0 = arith.constant 0 : index
    %c0_1 = arith.constant 0 : index
    %c0_2 = arith.constant 0 : index
    %c0_3 = arith.constant 0 : index
    %6 = vector.load %arg2[%c0, %c0_1, %c0_2, %c0_3] : memref<1x1x216x12xbf16, #tpu.memory_space<vmem>>, vector<1x1x18x12xbf16>
    %7 = vector.shape_cast %6 : vector<1x1x18x12xbf16> to vector<18x12xbf16>
    %c0_4 = arith.constant 0 : index
    %c0_5 = arith.constant 0 : index
    %c0_6 = arith.constant 0 : index
    %8 = vector.load %arg3[%c0_4, %c0_5, %c0_6] : memref<3x12x128xbf16, #tpu.memory_space<vmem>>, vector<1x12x128xbf16>
    %9 = vector.shape_cast %8 : vector<1x12x128xbf16> to vector<12x128xbf16>
    %cst = arith.constant dense<0.000000e+00> : vector<18x128xf32>
    %10 = tpu.matmul %7, %9, %cst {dimension_numbers = #tpu.dot_dimension_numbers<[1], [0], [0], [1], [0, 0, 1, 1], [], []>} : vector<18x12xbf16>, vector<12x128xbf16>, vector<18x128xf32> -> vector<18x128xf32>
    %c0_7 = arith.constant 0 : index
    %c0_8 = arith.constant 0 : index
    %c18 = arith.constant 18 : index
    %c0_9 = arith.constant 0 : index
    %11 = vector.load %arg2[%c0_7, %c0_8, %c18, %c0_9] : memref<1x1x216x12xbf16, #tpu.memory_space<vmem>>, vector<1x1x18x12xbf16>
    %12 = vector.shape_cast %11 : vector<1x1x18x12xbf16> to vector<18x12xbf16>
    %c1 = arith.constant 1 : index
    %c0_10 = arith.constant 0 : index
    %c0_11 = arith.constant 0 : index
    %13 = vector.load %arg3[%c1, %c0_10, %c0_11] : memref<3x12x128xbf16, #tpu.memory_space<vmem>>, vector<1x12x128xbf16>
    %14 = vector.shape_cast %13 : vector<1x12x128xbf16> to vector<12x128xbf16>
    %cst_12 = arith.constant dense<0.000000e+00> : vector<18x128xf32>
    %15 = tpu.matmul %12, %14, %cst_12 {dimension_numbers = #tpu.dot_dimension_numbers<[1], [0], [0], [1], [0, 0, 1, 1], [], []>} : vector<18x12xbf16>, vector<12x128xbf16>, vector<18x128xf32> -> vector<18x128xf32>
    %16 = arith.addf %10, %15 : vector<18x128xf32>
    %c0_13 = arith.constant 0 : index
    %c0_14 = arith.constant 0 : index
    %c36 = arith.constant 36 : index
    %c0_15 = arith.constant 0 : index
    %17 = vector.load %arg2[%c0_13, %c0_14, %c36, %c0_15] : memref<1x1x216x12xbf16, #tpu.memory_space<vmem>>, vector<1x1x18x12xbf16>
    %18 = vector.shape_cast %17 : vector<1x1x18x12xbf16> to vector<18x12xbf16>
    %c2 = arith.constant 2 : index
    %c0_16 = arith.constant 0 : index
    %c0_17 = arith.constant 0 : index
    %19 = vector.load %arg3[%c2, %c0_16, %c0_17] : memref<3x12x128xbf16, #tpu.memory_space<vmem>>, vector<1x12x128xbf16>
    %20 = vector.shape_cast %19 : vector<1x12x128xbf16> to vector<12x128xbf16>
    %cst_18 = arith.constant dense<0.000000e+00> : vector<18x128xf32>
    %21 = tpu.matmul %18, %20, %cst_18 {dimension_numbers = #tpu.dot_dimension_numbers<[1], [0], [0], [1], [0, 0, 1, 1], [], []>} : vector<18x12xbf16>, vector<12x128xbf16>, vector<18x128xf32> -> vector<18x128xf32>
    %22 = arith.addf %16, %21 : vector<18x128xf32>
    %c0_19 = arith.constant 0 : index
    %c0_20 = arith.constant 0 : index
    %23 = vector.load %arg4[%c0_19, %c0_20] : memref<1x128xf32, #tpu.memory_space<vmem>>, vector<1x128xf32>
    %24 = vector.broadcast %23 : vector<1x128xf32> to vector<18x128xf32>
    %25 = arith.addf %22, %24 : vector<18x128xf32>
    %cst_21 = arith.constant 0.000000e+00 : f32
    %26 = vector.broadcast %cst_21 : f32 to vector<18x128xf32>
    %27 = arith.maximumf %25, %26 : vector<18x128xf32>
    %28 = arith.truncf %27 : vector<18x128xf32> to vector<18x128xbf16>
    %c0_22 = arith.constant 0 : index
    %c0_23 = arith.constant 0 : index
    %29 = vector.load %arg5[%c0_22, %c0_23] : memref<128x128xbf16, #tpu.memory_space<vmem>>, vector<128x128xbf16>
    %cst_24 = arith.constant dense<0.000000e+00> : vector<18x128xf32>
    %30 = tpu.matmul %28, %29, %cst_24 {dimension_numbers = #tpu.dot_dimension_numbers<[1], [0], [0], [1], [0, 0, 1, 1], [], []>} : vector<18x128xbf16>, vector<128x128xbf16>, vector<18x128xf32> -> vector<18x128xf32>
    %c0_25 = arith.constant 0 : index
    %c0_26 = arith.constant 0 : index
    %31 = vector.load %arg6[%c0_25, %c0_26] : memref<1x128xf32, #tpu.memory_space<vmem>>, vector<1x128xf32>
    %32 = vector.broadcast %31 : vector<1x128xf32> to vector<18x128xf32>
    %33 = arith.addf %30, %32 : vector<18x128xf32>
    %cst_27 = arith.constant 0.000000e+00 : f32
    %34 = vector.broadcast %cst_27 : f32 to vector<18x128xf32>
    %35 = arith.maximumf %33, %34 : vector<18x128xf32>
    %36 = arith.addf %35, %27 : vector<18x128xf32>
    %37 = tpu.iota {dimensions = array<i32: 0>} : vector<18x1xi32>
    %c0_i32_28 = arith.constant 0 : i32
    %38 = vector.broadcast %c0_i32_28 : i32 to vector<18x1xi32>
    %39 = arith.addi %37, %38 : vector<18x1xi32>
    %c18_i32_29 = arith.constant 18 : i32
    %c0_i32_30 = arith.constant 0 : i32
    %40 = arith.cmpi eq, %c18_i32_29, %c0_i32_30 : i32
    %c1_i32_31 = arith.constant 1 : i32
    %41 = arith.select %40, %c1_i32_31, %c18_i32_29 : i32
    %42 = vector.broadcast %41 : i32 to vector<18x1xi32>
    %43 = arith.remsi %39, %42 : vector<18x1xi32>
    %c0_i32_32 = arith.constant 0 : i32
    %44 = vector.broadcast %c0_i32_32 : i32 to vector<18x1xi32>
    %45 = arith.cmpi ne, %43, %44 : vector<18x1xi32>
    %c0_i32_33 = arith.constant 0 : i32
    %46 = vector.broadcast %c0_i32_33 : i32 to vector<18x1xi32>
    %47 = arith.cmpi slt, %43, %46 : vector<18x1xi32>
    %c0_i32_34 = arith.constant 0 : i32
    %48 = arith.cmpi slt, %41, %c0_i32_34 : i32
    %49 = vector.broadcast %48 : i1 to vector<18x1xi1>
    %50 = vector.broadcast %49 : vector<18x1xi1> to vector<18x1xi1>
    %51 = arith.xori %47, %50 : vector<18x1xi1>
    %52 = arith.andi %51, %45 : vector<18x1xi1>
    %53 = vector.broadcast %41 : i32 to vector<18x1xi32>
    %54 = arith.addi %43, %53 : vector<18x1xi32>
    %55 = arith.select %52, %54, %43 : vector<18x1xi1>, vector<18x1xi32>
    %c1_i32_35 = arith.constant 1 : i32
    %56 = vector.broadcast %c1_i32_35 : i32 to vector<18x1xi32>
    %57 = arith.cmpi sge, %55, %56 : vector<18x1xi32>
    %c17_i32 = arith.constant 17 : i32
    %58 = vector.broadcast %c17_i32 : i32 to vector<18x1xi32>
    %59 = arith.cmpi slt, %55, %58 : vector<18x1xi32>
    %60 = arith.andi %57, %59 : vector<18x1xi1>
    %61 = vector.broadcast %3 : i32 to vector<18x1xi32>
    %62 = arith.cmpi sge, %39, %61 : vector<18x1xi32>
    %63 = arith.andi %60, %62 : vector<18x1xi1>
    %64 = vector.broadcast %5 : i32 to vector<18x1xi32>
    %65 = arith.cmpi slt, %39, %64 : vector<18x1xi32>
    %66 = arith.andi %63, %65 : vector<18x1xi1>
    %cst_36 = arith.constant 0.000000e+00 : f32
    %67 = vector.shape_cast %66 : vector<18x1xi1> to vector<18x1xi1>
    %68 = vector.broadcast %67 : vector<18x1xi1> to vector<18x128xi1>
    %69 = vector.broadcast %cst_36 : f32 to vector<18x128xf32>
    %70 = arith.select %68, %36, %69 : vector<18x128xi1>, vector<18x128xf32>
    %71 = arith.truncf %70 : vector<18x128xf32> to vector<18x128xbf16>
    %c8 = arith.constant 8 : index
    %c0_37 = arith.constant 0 : index
    %72 = vector.load %arg10[%c8, %c0_37] : memref<192x128xbf16, #tpu.memory_space<vmem>>, vector<18x128xbf16>
    tpu.vector_store %arg10[%c8, %c0_37], %71 {strides = array<i32>} : memref<192x128xbf16, #tpu.memory_space<vmem>>, vector<18x128xbf16>,
    %c0_38 = arith.constant 0 : index
    %c0_39 = arith.constant 0 : index
    %c18_40 = arith.constant 18 : index
    %c0_41 = arith.constant 0 : index
    %73 = vector.load %arg2[%c0_38, %c0_39, %c18_40, %c0_41] : memref<1x1x216x12xbf16, #tpu.memory_space<vmem>>, vector<1x1x144x12xbf16>
    %74 = vector.shape_cast %73 : vector<1x1x144x12xbf16> to vector<144x12xbf16>
    %c0_42 = arith.constant 0 : index
    %c0_43 = arith.constant 0 : index
    %c0_44 = arith.constant 0 : index
    %75 = vector.load %arg3[%c0_42, %c0_43, %c0_44] : memref<3x12x128xbf16, #tpu.memory_space<vmem>>, vector<1x12x128xbf16>
    %76 = vector.shape_cast %75 : vector<1x12x128xbf16> to vector<12x128xbf16>
    %cst_45 = arith.constant dense<0.000000e+00> : vector<144x128xf32>
    %77 = tpu.matmul %74, %76, %cst_45 {dimension_numbers = #tpu.dot_dimension_numbers<[1], [0], [0], [1], [0, 0, 1, 1], [], []>} : vector<144x12xbf16>, vector<12x128xbf16>, vector<144x128xf32> -> vector<144x128xf32>
    %c0_46 = arith.constant 0 : index
    %c0_47 = arith.constant 0 : index
    %c36_48 = arith.constant 36 : index
    %c0_49 = arith.constant 0 : index
    %78 = vector.load %arg2[%c0_46, %c0_47, %c36_48, %c0_49] : memref<1x1x216x12xbf16, #tpu.memory_space<vmem>>, vector<1x1x144x12xbf16>
    %79 = vector.shape_cast %78 : vector<1x1x144x12xbf16> to vector<144x12xbf16>
    %c1_50 = arith.constant 1 : index
    %c0_51 = arith.constant 0 : index
    %c0_52 = arith.constant 0 : index
    %80 = vector.load %arg3[%c1_50, %c0_51, %c0_52] : memref<3x12x128xbf16, #tpu.memory_space<vmem>>, vector<1x12x128xbf16>
    %81 = vector.shape_cast %80 : vector<1x12x128xbf16> to vector<12x128xbf16>
    %cst_53 = arith.constant dense<0.000000e+00> : vector<144x128xf32>
    %82 = tpu.matmul %79, %81, %cst_53 {dimension_numbers = #tpu.dot_dimension_numbers<[1], [0], [0], [1], [0, 0, 1, 1], [], []>} : vector<144x12xbf16>, vector<12x128xbf16>, vector<144x128xf32> -> vector<144x128xf32>
    %83 = arith.addf %77, %82 : vector<144x128xf32>
    %c0_54 = arith.constant 0 : index
    %c0_55 = arith.constant 0 : index
    %c54 = arith.constant 54 : index
    %c0_56 = arith.constant 0 : index
    %84 = vector.load %arg2[%c0_54, %c0_55, %c54, %c0_56] : memref<1x1x216x12xbf16, #tpu.memory_space<vmem>>, vector<1x1x144x12xbf16>
    %85 = vector.shape_cast %84 : vector<1x1x144x12xbf16> to vector<144x12xbf16>
    %c2_57 = arith.constant 2 : index
    %c0_58 = arith.constant 0 : index
    %c0_59 = arith.constant 0 : index
    %86 = vector.load %arg3[%c2_57, %c0_58, %c0_59] : memref<3x12x128xbf16, #tpu.memory_space<vmem>>, vector<1x12x128xbf16>
    %87 = vector.shape_cast %86 : vector<1x12x128xbf16> to vector<12x128xbf16>
    %cst_60 = arith.constant dense<0.000000e+00> : vector<144x128xf32>
    %88 = tpu.matmul %85, %87, %cst_60 {dimension_numbers = #tpu.dot_dimension_numbers<[1], [0], [0], [1], [0, 0, 1, 1], [], []>} : vector<144x12xbf16>, vector<12x128xbf16>, vector<144x128xf32> -> vector<144x128xf32>
    %89 = arith.addf %83, %88 : vector<144x128xf32>
    %c0_61 = arith.constant 0 : index
    %c0_62 = arith.constant 0 : index
    %90 = vector.load %arg4[%c0_61, %c0_62] : memref<1x128xf32, #tpu.memory_space<vmem>>, vector<1x128xf32>
    %91 = vector.broadcast %90 : vector<1x128xf32> to vector<144x128xf32>
    %92 = arith.addf %89, %91 : vector<144x128xf32>
    %cst_63 = arith.constant 0.000000e+00 : f32
    %93 = vector.broadcast %cst_63 : f32 to vector<144x128xf32>
    %94 = arith.maximumf %92, %93 : vector<144x128xf32>
    %95 = arith.truncf %94 : vector<144x128xf32> to vector<144x128xbf16>
    %c0_64 = arith.constant 0 : index
    %c0_65 = arith.constant 0 : index
    %96 = vector.load %arg5[%c0_64, %c0_65] : memref<128x128xbf16, #tpu.memory_space<vmem>>, vector<128x128xbf16>
    %cst_66 = arith.constant dense<0.000000e+00> : vector<144x128xf32>
    %97 = tpu.matmul %95, %96, %cst_66 {dimension_numbers = #tpu.dot_dimension_numbers<[1], [0], [0], [1], [0, 0, 1, 1], [], []>} : vector<144x128xbf16>, vector<128x128xbf16>, vector<144x128xf32> -> vector<144x128xf32>
    %c0_67 = arith.constant 0 : index
    %c0_68 = arith.constant 0 : index
    %98 = vector.load %arg6[%c0_67, %c0_68] : memref<1x128xf32, #tpu.memory_space<vmem>>, vector<1x128xf32>
    %99 = vector.broadcast %98 : vector<1x128xf32> to vector<144x128xf32>
    %100 = arith.addf %97, %99 : vector<144x128xf32>
    %cst_69 = arith.constant 0.000000e+00 : f32
    %101 = vector.broadcast %cst_69 : f32 to vector<144x128xf32>
    %102 = arith.maximumf %100, %101 : vector<144x128xf32>
    %103 = arith.addf %102, %94 : vector<144x128xf32>
    %104 = tpu.iota {dimensions = array<i32: 0>} : vector<144x1xi32>
    %c18_i32_70 = arith.constant 18 : i32
    %105 = vector.broadcast %c18_i32_70 : i32 to vector<144x1xi32>
    %106 = arith.addi %104, %105 : vector<144x1xi32>
    %c18_i32_71 = arith.constant 18 : i32
    %c0_i32_72 = arith.constant 0 : i32
    %107 = arith.cmpi eq, %c18_i32_71, %c0_i32_72 : i32
    %c1_i32_73 = arith.constant 1 : i32
    %108 = arith.select %107, %c1_i32_73, %c18_i32_71 : i32
    %109 = vector.broadcast %108 : i32 to vector<144x1xi32>
    %110 = arith.remsi %106, %109 : vector<144x1xi32>
    %c0_i32_74 = arith.constant 0 : i32
    %111 = vector.broadcast %c0_i32_74 : i32 to vector<144x1xi32>
    %112 = arith.cmpi ne, %110, %111 : vector<144x1xi32>
    %c0_i32_75 = arith.constant 0 : i32
    %113 = vector.broadcast %c0_i32_75 : i32 to vector<144x1xi32>
    %114 = arith.cmpi slt, %110, %113 : vector<144x1xi32>
    %c0_i32_76 = arith.constant 0 : i32
    %115 = arith.cmpi slt, %108, %c0_i32_76 : i32
    %116 = vector.broadcast %115 : i1 to vector<144x1xi1>
    %117 = vector.broadcast %116 : vector<144x1xi1> to vector<144x1xi1>
    %118 = arith.xori %114, %117 : vector<144x1xi1>
    %119 = arith.andi %118, %112 : vector<144x1xi1>
    %120 = vector.broadcast %108 : i32 to vector<144x1xi32>
    %121 = arith.addi %110, %120 : vector<144x1xi32>
    %122 = arith.select %119, %121, %110 : vector<144x1xi1>, vector<144x1xi32>
    %c1_i32_77 = arith.constant 1 : i32
    %123 = vector.broadcast %c1_i32_77 : i32 to vector<144x1xi32>
    %124 = arith.cmpi sge, %122, %123 : vector<144x1xi32>
    %c17_i32_78 = arith.constant 17 : i32
    %125 = vector.broadcast %c17_i32_78 : i32 to vector<144x1xi32>
    %126 = arith.cmpi slt, %122, %125 : vector<144x1xi32>
    %127 = arith.andi %124, %126 : vector<144x1xi1>
    %128 = vector.broadcast %3 : i32 to vector<144x1xi32>
    %129 = arith.cmpi sge, %106, %128 : vector<144x1xi32>
    %130 = arith.andi %127, %129 : vector<144x1xi1>
    %131 = vector.broadcast %5 : i32 to vector<144x1xi32>
    %132 = arith.cmpi slt, %106, %131 : vector<144x1xi32>
    %133 = arith.andi %130, %132 : vector<144x1xi1>
    %cst_79 = arith.constant 0.000000e+00 : f32
    %134 = vector.shape_cast %133 : vector<144x1xi1> to vector<144x1xi1>
    %135 = vector.broadcast %134 : vector<144x1xi1> to vector<144x128xi1>
    %136 = vector.broadcast %cst_79 : f32 to vector<144x128xf32>
    %137 = arith.select %135, %103, %136 : vector<144x128xi1>, vector<144x128xf32>
    %138 = arith.truncf %137 : vector<144x128xf32> to vector<144x128xbf16>
    %c26 = arith.constant 26 : index
    %c0_80 = arith.constant 0 : index
    %139 = vector.load %arg10[%c26, %c0_80] : memref<192x128xbf16, #tpu.memory_space<vmem>>, vector<144x128xbf16>
    tpu.vector_store %arg10[%c26, %c0_80], %138 {strides = array<i32>} : memref<192x128xbf16, #tpu.memory_space<vmem>>, vector<144x128xbf16>,
    %140 = arith.addf %94, %103 : vector<144x128xf32>
    %c0_81 = arith.constant 0 : index
    %c0_82 = arith.constant 0 : index
    %c0_83 = arith.constant 0 : index
    %c0_84 = arith.constant 0 : index
    %141 = vector.load %arg9[%c0_81, %c0_82, %c0_83, %c0_84] : memref<1x1x144x128xf32, #tpu.memory_space<vmem>>, vector<1x1x144x128xf32>
    %142 = vector.shape_cast %141 : vector<1x1x144x128xf32> to vector<144x128xf32>
    %143 = vector.shape_cast %140 : vector<144x128xf32> to vector<1x1x144x128xf32>
    tpu.vector_store %arg9[%c0_81, %c0_82, %c0_83, %c0_84], %143 {strides = array<i32>} : memref<1x1x144x128xf32, #tpu.memory_space<vmem>>, vector<1x1x144x128xf32>,
    %c0_85 = arith.constant 0 : index
    %c0_86 = arith.constant 0 : index
    %c162 = arith.constant 162 : index
    %c0_87 = arith.constant 0 : index
    %144 = vector.load %arg2[%c0_85, %c0_86, %c162, %c0_87] : memref<1x1x216x12xbf16, #tpu.memory_space<vmem>>, vector<1x1x18x12xbf16>
    %145 = vector.shape_cast %144 : vector<1x1x18x12xbf16> to vector<18x12xbf16>
    %c0_88 = arith.constant 0 : index
    %c0_89 = arith.constant 0 : index
    %c0_90 = arith.constant 0 : index
    %146 = vector.load %arg3[%c0_88, %c0_89, %c0_90] : memref<3x12x128xbf16, #tpu.memory_space<vmem>>, vector<1x12x128xbf16>
    %147 = vector.shape_cast %146 : vector<1x12x128xbf16> to vector<12x128xbf16>
    %cst_91 = arith.constant dense<0.000000e+00> : vector<18x128xf32>
    %148 = tpu.matmul %145, %147, %cst_91 {dimension_numbers = #tpu.dot_dimension_numbers<[1], [0], [0], [1], [0, 0, 1, 1], [], []>} : vector<18x12xbf16>, vector<12x128xbf16>, vector<18x128xf32> -> vector<18x128xf32>
    %c0_92 = arith.constant 0 : index
    %c0_93 = arith.constant 0 : index
    %c180 = arith.constant 180 : index
    %c0_94 = arith.constant 0 : index
    %149 = vector.load %arg2[%c0_92, %c0_93, %c180, %c0_94] : memref<1x1x216x12xbf16, #tpu.memory_space<vmem>>, vector<1x1x18x12xbf16>
    %150 = vector.shape_cast %149 : vector<1x1x18x12xbf16> to vector<18x12xbf16>
    %c1_95 = arith.constant 1 : index
    %c0_96 = arith.constant 0 : index
    %c0_97 = arith.constant 0 : index
    %151 = vector.load %arg3[%c1_95, %c0_96, %c0_97] : memref<3x12x128xbf16, #tpu.memory_space<vmem>>, vector<1x12x128xbf16>
    %152 = vector.shape_cast %151 : vector<1x12x128xbf16> to vector<12x128xbf16>
    %cst_98 = arith.constant dense<0.000000e+00> : vector<18x128xf32>
    %153 = tpu.matmul %150, %152, %cst_98 {dimension_numbers = #tpu.dot_dimension_numbers<[1], [0], [0], [1], [0, 0, 1, 1], [], []>} : vector<18x12xbf16>, vector<12x128xbf16>, vector<18x128xf32> -> vector<18x128xf32>
    %154 = arith.addf %148, %153 : vector<18x128xf32>
    %c0_99 = arith.constant 0 : index
    %c0_100 = arith.constant 0 : index
    %c198 = arith.constant 198 : index
    %c0_101 = arith.constant 0 : index
    %155 = vector.load %arg2[%c0_99, %c0_100, %c198, %c0_101] : memref<1x1x216x12xbf16, #tpu.memory_space<vmem>>, vector<1x1x18x12xbf16>
    %156 = vector.shape_cast %155 : vector<1x1x18x12xbf16> to vector<18x12xbf16>
    %c2_102 = arith.constant 2 : index
    %c0_103 = arith.constant 0 : index
    %c0_104 = arith.constant 0 : index
    %157 = vector.load %arg3[%c2_102, %c0_103, %c0_104] : memref<3x12x128xbf16, #tpu.memory_space<vmem>>, vector<1x12x128xbf16>
    %158 = vector.shape_cast %157 : vector<1x12x128xbf16> to vector<12x128xbf16>
    %cst_105 = arith.constant dense<0.000000e+00> : vector<18x128xf32>
    %159 = tpu.matmul %156, %158, %cst_105 {dimension_numbers = #tpu.dot_dimension_numbers<[1], [0], [0], [1], [0, 0, 1, 1], [], []>} : vector<18x12xbf16>, vector<12x128xbf16>, vector<18x128xf32> -> vector<18x128xf32>
    %160 = arith.addf %154, %159 : vector<18x128xf32>
    %c0_106 = arith.constant 0 : index
    %c0_107 = arith.constant 0 : index
    %161 = vector.load %arg4[%c0_106, %c0_107] : memref<1x128xf32, #tpu.memory_space<vmem>>, vector<1x128xf32>
    %162 = vector.broadcast %161 : vector<1x128xf32> to vector<18x128xf32>
    %163 = arith.addf %160, %162 : vector<18x128xf32>
    %cst_108 = arith.constant 0.000000e+00 : f32
    %164 = vector.broadcast %cst_108 : f32 to vector<18x128xf32>
    %165 = arith.maximumf %163, %164 : vector<18x128xf32>
    %166 = arith.truncf %165 : vector<18x128xf32> to vector<18x128xbf16>
    %c0_109 = arith.constant 0 : index
    %c0_110 = arith.constant 0 : index
    %167 = vector.load %arg5[%c0_109, %c0_110] : memref<128x128xbf16, #tpu.memory_space<vmem>>, vector<128x128xbf16>
    %cst_111 = arith.constant dense<0.000000e+00> : vector<18x128xf32>
    %168 = tpu.matmul %166, %167, %cst_111 {dimension_numbers = #tpu.dot_dimension_numbers<[1], [0], [0], [1], [0, 0, 1, 1], [], []>} : vector<18x128xbf16>, vector<128x128xbf16>, vector<18x128xf32> -> vector<18x128xf32>
    %c0_112 = arith.constant 0 : index
    %c0_113 = arith.constant 0 : index
    %169 = vector.load %arg6[%c0_112, %c0_113] : memref<1x128xf32, #tpu.memory_space<vmem>>, vector<1x128xf32>
    %170 = vector.broadcast %169 : vector<1x128xf32> to vector<18x128xf32>
    %171 = arith.addf %168, %170 : vector<18x128xf32>
    %cst_114 = arith.constant 0.000000e+00 : f32
    %172 = vector.broadcast %cst_114 : f32 to vector<18x128xf32>
    %173 = arith.maximumf %171, %172 : vector<18x128xf32>
    %174 = arith.addf %173, %165 : vector<18x128xf32>
    %175 = tpu.iota {dimensions = array<i32: 0>} : vector<18x1xi32>
    %c162_i32 = arith.constant 162 : i32
    %176 = vector.broadcast %c162_i32 : i32 to vector<18x1xi32>
    %177 = arith.addi %175, %176 : vector<18x1xi32>
    %c18_i32_115 = arith.constant 18 : i32
    %c0_i32_116 = arith.constant 0 : i32
    %178 = arith.cmpi eq, %c18_i32_115, %c0_i32_116 : i32
    %c1_i32_117 = arith.constant 1 : i32
    %179 = arith.select %178, %c1_i32_117, %c18_i32_115 : i32
    %180 = vector.broadcast %179 : i32 to vector<18x1xi32>
    %181 = arith.remsi %177, %180 : vector<18x1xi32>
    %c0_i32_118 = arith.constant 0 : i32
    %182 = vector.broadcast %c0_i32_118 : i32 to vector<18x1xi32>
    %183 = arith.cmpi ne, %181, %182 : vector<18x1xi32>
    %c0_i32_119 = arith.constant 0 : i32
    %184 = vector.broadcast %c0_i32_119 : i32 to vector<18x1xi32>
    %185 = arith.cmpi slt, %181, %184 : vector<18x1xi32>
    %c0_i32_120 = arith.constant 0 : i32
    %186 = arith.cmpi slt, %179, %c0_i32_120 : i32
    %187 = vector.broadcast %186 : i1 to vector<18x1xi1>
    %188 = vector.broadcast %187 : vector<18x1xi1> to vector<18x1xi1>
    %189 = arith.xori %185, %188 : vector<18x1xi1>
    %190 = arith.andi %189, %183 : vector<18x1xi1>
    %191 = vector.broadcast %179 : i32 to vector<18x1xi32>
    %192 = arith.addi %181, %191 : vector<18x1xi32>
    %193 = arith.select %190, %192, %181 : vector<18x1xi1>, vector<18x1xi32>
    %c1_i32_121 = arith.constant 1 : i32
    %194 = vector.broadcast %c1_i32_121 : i32 to vector<18x1xi32>
    %195 = arith.cmpi sge, %193, %194 : vector<18x1xi32>
    %c17_i32_122 = arith.constant 17 : i32
    %196 = vector.broadcast %c17_i32_122 : i32 to vector<18x1xi32>
    %197 = arith.cmpi slt, %193, %196 : vector<18x1xi32>
    %198 = arith.andi %195, %197 : vector<18x1xi1>
    %199 = vector.broadcast %3 : i32 to vector<18x1xi32>
    %200 = arith.cmpi sge, %177, %199 : vector<18x1xi32>
    %201 = arith.andi %198, %200 : vector<18x1xi1>
    %202 = vector.broadcast %5 : i32 to vector<18x1xi32>
    %203 = arith.cmpi slt, %177, %202 : vector<18x1xi32>
    %204 = arith.andi %201, %203 : vector<18x1xi1>
    %cst_123 = arith.constant 0.000000e+00 : f32
    %205 = vector.shape_cast %204 : vector<18x1xi1> to vector<18x1xi1>
    %206 = vector.broadcast %205 : vector<18x1xi1> to vector<18x128xi1>
    %207 = vector.broadcast %cst_123 : f32 to vector<18x128xf32>
    %208 = arith.select %206, %174, %207 : vector<18x128xi1>, vector<18x128xf32>
    %209 = arith.truncf %208 : vector<18x128xf32> to vector<18x128xbf16>
    %c170 = arith.constant 170 : index
    %c0_124 = arith.constant 0 : index
    %210 = vector.load %arg10[%c170, %c0_124] : memref<192x128xbf16, #tpu.memory_space<vmem>>, vector<18x128xbf16>
    tpu.vector_store %arg10[%c170, %c0_124], %209 {strides = array<i32>} : memref<192x128xbf16, #tpu.memory_space<vmem>>, vector<18x128xbf16>,
    %c7 = arith.constant 7 : index
    %c0_125 = arith.constant 0 : index
    %211 = vector.load %arg10[%c7, %c0_125] : memref<192x128xbf16, #tpu.memory_space<vmem>>, vector<144x128xbf16>
    %c0_126 = arith.constant 0 : index
    %c0_127 = arith.constant 0 : index
    %c0_128 = arith.constant 0 : index
    %212 = vector.load %arg7[%c0_126, %c0_127, %c0_128] : memref<9x128x128xbf16, #tpu.memory_space<vmem>>, vector<1x128x128xbf16>
    %213 = vector.shape_cast %212 : vector<1x128x128xbf16> to vector<128x128xbf16>
    %cst_129 = arith.constant dense<0.000000e+00> : vector<144x128xf32>
    %214 = tpu.matmul %211, %213, %cst_129 {dimension_numbers = #tpu.dot_dimension_numbers<[1], [0], [0], [1], [0, 0, 1, 1], [], []>} : vector<144x128xbf16>, vector<128x128xbf16>, vector<144x128xf32> -> vector<144x128xf32>
    %c8_130 = arith.constant 8 : index
    %c0_131 = arith.constant 0 : index
    %215 = vector.load %arg10[%c8_130, %c0_131] : memref<192x128xbf16, #tpu.memory_space<vmem>>, vector<144x128xbf16>
    %c1_132 = arith.constant 1 : index
    %c0_133 = arith.constant 0 : index
    %c0_134 = arith.constant 0 : index
    %216 = vector.load %arg7[%c1_132, %c0_133, %c0_134] : memref<9x128x128xbf16, #tpu.memory_space<vmem>>, vector<1x128x128xbf16>
    %217 = vector.shape_cast %216 : vector<1x128x128xbf16> to vector<128x128xbf16>
    %cst_135 = arith.constant dense<0.000000e+00> : vector<144x128xf32>
    %218 = tpu.matmul %215, %217, %cst_135 {dimension_numbers = #tpu.dot_dimension_numbers<[1], [0], [0], [1], [0, 0, 1, 1], [], []>} : vector<144x128xbf16>, vector<128x128xbf16>, vector<144x128xf32> -> vector<144x128xf32>
    %219 = arith.addf %214, %218 : vector<144x128xf32>
    %c9 = arith.constant 9 : index
    %c0_136 = arith.constant 0 : index
    %220 = vector.load %arg10[%c9, %c0_136] : memref<192x128xbf16, #tpu.memory_space<vmem>>, vector<144x128xbf16>
    %c2_137 = arith.constant 2 : index
    %c0_138 = arith.constant 0 : index
    %c0_139 = arith.constant 0 : index
    %221 = vector.load %arg7[%c2_137, %c0_138, %c0_139] : memref<9x128x128xbf16, #tpu.memory_space<vmem>>, vector<1x128x128xbf16>
    %222 = vector.shape_cast %221 : vector<1x128x128xbf16> to vector<128x128xbf16>
    %cst_140 = arith.constant dense<0.000000e+00> : vector<144x128xf32>
    %223 = tpu.matmul %220, %222, %cst_140 {dimension_numbers = #tpu.dot_dimension_numbers<[1], [0], [0], [1], [0, 0, 1, 1], [], []>} : vector<144x128xbf16>, vector<128x128xbf16>, vector<144x128xf32> -> vector<144x128xf32>
    %224 = arith.addf %219, %223 : vector<144x128xf32>
    %c25 = arith.constant 25 : index
    %c0_141 = arith.constant 0 : index
    %225 = vector.load %arg10[%c25, %c0_141] : memref<192x128xbf16, #tpu.memory_space<vmem>>, vector<144x128xbf16>
    %c3 = arith.constant 3 : index
    %c0_142 = arith.constant 0 : index
    %c0_143 = arith.constant 0 : index
    %226 = vector.load %arg7[%c3, %c0_142, %c0_143] : memref<9x128x128xbf16, #tpu.memory_space<vmem>>, vector<1x128x128xbf16>
    %227 = vector.shape_cast %226 : vector<1x128x128xbf16> to vector<128x128xbf16>
    %cst_144 = arith.constant dense<0.000000e+00> : vector<144x128xf32>
    %228 = tpu.matmul %225, %227, %cst_144 {dimension_numbers = #tpu.dot_dimension_numbers<[1], [0], [0], [1], [0, 0, 1, 1], [], []>} : vector<144x128xbf16>, vector<128x128xbf16>, vector<144x128xf32> -> vector<144x128xf32>
    %229 = arith.addf %224, %228 : vector<144x128xf32>
    %c26_145 = arith.constant 26 : index
    %c0_146 = arith.constant 0 : index
    %230 = vector.load %arg10[%c26_145, %c0_146] : memref<192x128xbf16, #tpu.memory_space<vmem>>, vector<144x128xbf16>
    %c4 = arith.constant 4 : index
    %c0_147 = arith.constant 0 : index
    %c0_148 = arith.constant 0 : index
    %231 = vector.load %arg7[%c4, %c0_147, %c0_148] : memref<9x128x128xbf16, #tpu.memory_space<vmem>>, vector<1x128x128xbf16>
    %232 = vector.shape_cast %231 : vector<1x128x128xbf16> to vector<128x128xbf16>
    %cst_149 = arith.constant dense<0.000000e+00> : vector<144x128xf32>
    %233 = tpu.matmul %230, %232, %cst_149 {dimension_numbers = #tpu.dot_dimension_numbers<[1], [0], [0], [1], [0, 0, 1, 1], [], []>} : vector<144x128xbf16>, vector<128x128xbf16>, vector<144x128xf32> -> vector<144x128xf32>
    %234 = arith.addf %229, %233 : vector<144x128xf32>
    %c27 = arith.constant 27 : index
    %c0_150 = arith.constant 0 : index
    %235 = vector.load %arg10[%c27, %c0_150] : memref<192x128xbf16, #tpu.memory_space<vmem>>, vector<144x128xbf16>
    %c5 = arith.constant 5 : index
    %c0_151 = arith.constant 0 : index
    %c0_152 = arith.constant 0 : index
    %236 = vector.load %arg7[%c5, %c0_151, %c0_152] : memref<9x128x128xbf16, #tpu.memory_space<vmem>>, vector<1x128x128xbf16>
    %237 = vector.shape_cast %236 : vector<1x128x128xbf16> to vector<128x128xbf16>
    %cst_153 = arith.constant dense<0.000000e+00> : vector<144x128xf32>
    %238 = tpu.matmul %235, %237, %cst_153 {dimension_numbers = #tpu.dot_dimension_numbers<[1], [0], [0], [1], [0, 0, 1, 1], [], []>} : vector<144x128xbf16>, vector<128x128xbf16>, vector<144x128xf32> -> vector<144x128xf32>
    %239 = arith.addf %234, %238 : vector<144x128xf32>
    %c43 = arith.constant 43 : index
    %c0_154 = arith.constant 0 : index
    %240 = vector.load %arg10[%c43, %c0_154] : memref<192x128xbf16, #tpu.memory_space<vmem>>, vector<144x128xbf16>
    %c6 = arith.constant 6 : index
    %c0_155 = arith.constant 0 : index
    %c0_156 = arith.constant 0 : index
    %241 = vector.load %arg7[%c6, %c0_155, %c0_156] : memref<9x128x128xbf16, #tpu.memory_space<vmem>>, vector<1x128x128xbf16>
    %242 = vector.shape_cast %241 : vector<1x128x128xbf16> to vector<128x128xbf16>
    %cst_157 = arith.constant dense<0.000000e+00> : vector<144x128xf32>
    %243 = tpu.matmul %240, %242, %cst_157 {dimension_numbers = #tpu.dot_dimension_numbers<[1], [0], [0], [1], [0, 0, 1, 1], [], []>} : vector<144x128xbf16>, vector<128x128xbf16>, vector<144x128xf32> -> vector<144x128xf32>
    %244 = arith.addf %239, %243 : vector<144x128xf32>
    %c44 = arith.constant 44 : index
    %c0_158 = arith.constant 0 : index
    %245 = vector.load %arg10[%c44, %c0_158] : memref<192x128xbf16, #tpu.memory_space<vmem>>, vector<144x128xbf16>
    %c7_159 = arith.constant 7 : index
    %c0_160 = arith.constant 0 : index
    %c0_161 = arith.constant 0 : index
    %246 = vector.load %arg7[%c7_159, %c0_160, %c0_161] : memref<9x128x128xbf16, #tpu.memory_space<vmem>>, vector<1x128x128xbf16>
    %247 = vector.shape_cast %246 : vector<1x128x128xbf16> to vector<128x128xbf16>
    %cst_162 = arith.constant dense<0.000000e+00> : vector<144x128xf32>
    %248 = tpu.matmul %245, %247, %cst_162 {dimension_numbers = #tpu.dot_dimension_numbers<[1], [0], [0], [1], [0, 0, 1, 1], [], []>} : vector<144x128xbf16>, vector<128x128xbf16>, vector<144x128xf32> -> vector<144x128xf32>
    %249 = arith.addf %244, %248 : vector<144x128xf32>
    %c45 = arith.constant 45 : index
    %c0_163 = arith.constant 0 : index
    %250 = vector.load %arg10[%c45, %c0_163] : memref<192x128xbf16, #tpu.memory_space<vmem>>, vector<144x128xbf16>
    %c8_164 = arith.constant 8 : index
    %c0_165 = arith.constant 0 : index
    %c0_166 = arith.constant 0 : index
    %251 = vector.load %arg7[%c8_164, %c0_165, %c0_166] : memref<9x128x128xbf16, #tpu.memory_space<vmem>>, vector<1x128x128xbf16>
    %252 = vector.shape_cast %251 : vector<1x128x128xbf16> to vector<128x128xbf16>
    %cst_167 = arith.constant dense<0.000000e+00> : vector<144x128xf32>
    %253 = tpu.matmul %250, %252, %cst_167 {dimension_numbers = #tpu.dot_dimension_numbers<[1], [0], [0], [1], [0, 0, 1, 1], [], []>} : vector<144x128xbf16>, vector<128x128xbf16>, vector<144x128xf32> -> vector<144x128xf32>
    %254 = arith.addf %249, %253 : vector<144x128xf32>
    %c0_168 = arith.constant 0 : index
    %c0_169 = arith.constant 0 : index
    %255 = vector.load %arg8[%c0_168, %c0_169] : memref<1x128xf32, #tpu.memory_space<vmem>>, vector<1x128xf32>
    %256 = vector.broadcast %255 : vector<1x128xf32> to vector<144x128xf32>
    %257 = arith.addf %254, %256 : vector<144x128xf32>
    %cst_170 = arith.constant 0.000000e+00 : f32
    %258 = vector.broadcast %cst_170 : f32 to vector<144x128xf32>
    %259 = arith.maximumf %257, %258 : vector<144x128xf32>
    %c0_171 = arith.constant 0 : index
    %c0_172 = arith.constant 0 : index
    %c0_173 = arith.constant 0 : index
    %c0_174 = arith.constant 0 : index
    %260 = vector.load %arg9[%c0_171, %c0_172, %c0_173, %c0_174] : memref<1x1x144x128xf32, #tpu.memory_space<vmem>>, vector<1x1x144x128xf32>
    %261 = vector.shape_cast %260 : vector<1x1x144x128xf32> to vector<144x128xf32>
    %262 = arith.addf %261, %259 : vector<144x128xf32>
    %c0_175 = arith.constant 0 : index
    %c0_176 = arith.constant 0 : index
    %c0_177 = arith.constant 0 : index
    %c0_178 = arith.constant 0 : index
    %263 = vector.load %arg9[%c0_175, %c0_176, %c0_177, %c0_178] : memref<1x1x144x128xf32, #tpu.memory_space<vmem>>, vector<1x1x144x128xf32>
    %264 = vector.shape_cast %263 : vector<1x1x144x128xf32> to vector<144x128xf32>
    %265 = vector.shape_cast %262 : vector<144x128xf32> to vector<1x1x144x128xf32>
    tpu.vector_store %arg9[%c0_175, %c0_176, %c0_177, %c0_178], %265 {strides = array<i32>} : memref<1x1x144x128xf32, #tpu.memory_space<vmem>>, vector<1x1x144x128xf32>,
    return
  }
  func.func @transform_0(%arg0: i32, %arg1: i32) -> (i32, i32, i32, i32) {
    %c0_i32 = arith.constant 0 : i32
    %c0_i32_0 = arith.constant 0 : i32
    %c0_i32_1 = arith.constant 0 : i32
    return %arg0, %arg1, %c0_i32, %c0_i32_0 : i32, i32, i32, i32
  }
  func.func @transform_1(%arg0: i32, %arg1: i32) -> (i32, i32, i32) {
    %c0_i32 = arith.constant 0 : i32
    %c0_i32_0 = arith.constant 0 : i32
    %c0_i32_1 = arith.constant 0 : i32
    %c0_i32_2 = arith.constant 0 : i32
    return %c0_i32, %c0_i32_0, %c0_i32_1 : i32, i32, i32
  }
  func.func @transform_2(%arg0: i32, %arg1: i32) -> (i32, i32) {
    %c0_i32 = arith.constant 0 : i32
    %c0_i32_0 = arith.constant 0 : i32
    %c0_i32_1 = arith.constant 0 : i32
    return %c0_i32, %c0_i32_0 : i32, i32
  }
  func.func @transform_3(%arg0: i32, %arg1: i32) -> (i32, i32) {
    %c0_i32 = arith.constant 0 : i32
    %c0_i32_0 = arith.constant 0 : i32
    %c0_i32_1 = arith.constant 0 : i32
    return %c0_i32, %c0_i32_0 : i32, i32
  }
  func.func @transform_4(%arg0: i32, %arg1: i32) -> (i32, i32) {
    %c0_i32 = arith.constant 0 : i32
    %c0_i32_0 = arith.constant 0 : i32
    %c0_i32_1 = arith.constant 0 : i32
    return %c0_i32, %c0_i32_0 : i32, i32
  }
  func.func @transform_5(%arg0: i32, %arg1: i32) -> (i32, i32, i32) {
    %c0_i32 = arith.constant 0 : i32
    %c0_i32_0 = arith.constant 0 : i32
    %c0_i32_1 = arith.constant 0 : i32
    %c0_i32_2 = arith.constant 0 : i32
    return %c0_i32, %c0_i32_0, %c0_i32_1 : i32, i32, i32
  }
  func.func @transform_6(%arg0: i32, %arg1: i32) -> (i32, i32) {
    %c0_i32 = arith.constant 0 : i32
    %c0_i32_0 = arith.constant 0 : i32
    %c0_i32_1 = arith.constant 0 : i32
    return %c0_i32, %c0_i32_0 : i32, i32
  }
  func.func @transform_7(%arg0: i32, %arg1: i32) -> (i32, i32, i32, i32) {
    %c0_i32 = arith.constant 0 : i32
    %c0_i32_0 = arith.constant 0 : i32
    %c0_i32_1 = arith.constant 0 : i32
    return %arg0, %arg1, %c0_i32, %c0_i32_0 : i32, i32, i32, i32
  }
}

</mosaic_0001>

<bundles_post_ra>
// kernel: double_conv.1
= control target key start
LH: loop header
LB: loop body
LE: loop exit
PB: predicated region body
PF: predicated region fallthrough
CT: control target
= control target key end

     0   :  { %s7337_s24 = smov 0   ;;  %s7339_s25 = smov 0   ;;  %s10618_s0 = inlined_call_operand.vmem [shape: bf16[2,2,216,12], index: 0, kind: input, shape index: {}]   ;;  %s10619_s1 = inlined_call_operand.vmem [shape: bf16[3,12,128], index: 1, kind: input, shape index: {}]   ;;  %s10620_s2 = inlined_call_operand.vmem [shape: f32[1,128], index: 2, kind: input, shape index: {}]   ;;  %s10621_s3 = inlined_call_operand.vmem [shape: bf16[128,128], index: 3, kind: input, shape index: {}]   ;;  %s10622_s4 = inlined_call_operand.vmem [shape: f32[1,128], index: 4, kind: input, shape index: {}]   ;;  %s10623_s5 = inlined_call_operand.vmem [shape: bf16[9,128,128], index: 5, kind: input, shape index: {}]   ;;  %s10624_s6 = inlined_call_operand.vmem [shape: f32[1,128], index: 6, kind: input, shape index: {}]   ;;  %s10625_s7 = inlined_call_operand.vmem [shape: f32[2,2,144,128], index: 7, kind: output, shape index: {}]  }
   0x1   :  { %s7341_s26 = smov 0   ;;  %s7343_s27 = smov 0  }
   0x2   :  { %s7345_s28 = smov 0  }
   0x3 LB: > { %s26_s29 = sadd.s32 1, %s7285_s26  ;;  %s29_s30 = sadd.s32 1, %s7289_s27  ;;  %s7293_s28 = sphi %s7345_s28, %s17_s28   ;;  %s7289_s27 = sphi %s7343_s27, %s10963_s27   ;;  %s7285_s26 = sphi %s7341_s26, %s10962_s26   ;;  %s7281_s25 = sphi %s7339_s25, %s10961_s25   ;;  %s7277_s24 = sphi %s7337_s24, %s10960_s24  }
   0x4   : > { %p27_p0 = scmp.ge.s32.totalorder %s26_s29, 2  ;;  %p5577_p1 = scmp.ge.s32.totalorder %s7293_s28, 1 }
   0x5   : > { %p257_p2 = scmp.lt.s32.totalorder %s7293_s28, 5 }
   0x6   : > { %s10965_s29 = smov (%p27_p0, %s26_s29), 0  ;;  %s10967_s30 = smov (!%p27_p0, %s29_s30), %s7289_s27 }
   0x7   : > { %p258_p3 = pnand %p5577_p1, %p257_p2  ;;  %p31_p4 = scmp.ge.s32.totalorder %s10967_s30, 2 }
   0x9   : > { %s10969_s30 = smov (%p31_p4, %s10967_s30), 0  ;;  %261 = sbr.rel (%p258_p3) target bundleno = 1277 (0x4fd), region = 48 }
   0xe   : > { %v7060_v0 = vld [vmem:[%s10619_s1 + $0x8] sm:$0x3f]   ;;  %vm10638_vm0 = vcmask 1045504   ;;  %p297_p5 = scmp.lt.s32.totalorder %s7281_s25, 1  ;;  %v7061_v2 = vld [vmem:[%s10619_s1] sm:$0x3f]  }
   0xf   : > { %6960 = vmatprep.subr.msk.bf16.mxu0 %vm10638_vm0, %v7060_v0  ;;  %v358_v1 = vsel %vm10638_vm0, %v7060_v0, 0  ;;  %p299_p6 = scmp.lt.s32.totalorder %s7277_s24, 1  ;;  %v7069_v3 = vld [vmem:[%s10621_s3 + $0x38] sm:$0xff]   ;;  %6961 = vmatprep.subr.msk.bf16.mxu1 %vm10638_vm0, %v7061_v2  ;;  %v428_v4 = vsel %vm10638_vm0, %v7061_v2, 0  ;;  %v7065_v5 = vld [vmem:[%s10619_s1 + $0x10] sm:$0x3f]  }
  0x10   : > { %6249 = vmatpush3.bf16.msra.mxu0 %v358_v1  ;;  %s10971_s25 = smov (!%p297_p5, %s7281_s25), 1  ;;  %6255 = vmatpush3.bf16.msra.mxu1 %v428_v4  ;;  %vm10639_vm1 = vcmask 1046528   ;;  %vm349_vm2 = vcmask 97280   ;;  %v7070_v9 = vld [vmem:[%s10621_s3 + $0x30] sm:$0xff]   ;;  %v508_v13 = vsel %vm10638_vm0, %v7065_v5, 0  ;;  %v7071_v17 = vld [vmem:[%s10621_s3 + $0x28] sm:$0xff]  }
  0x11   : > { %s7386_s14 = scalar_select %p299_p6, %s7277_s24, 1  ;;  %6962 = vmatprep.subr.msk.bf16.mxu0 %vm10638_vm0, %v7065_v5  ;;  %6266 = vmatprep.subr.bf16.mxu1 %v7069_v3  ;;  %v7073_v21 = vld [vmem:[%s10619_s1 + $0x8] sm:$0x3f]   ;;  %v7072_v24 = vld [vmem:[%s10621_s3 + $0x20] sm:$0xff]   ;;  %v10628_v27 = vmov 0.0   ;;  %vm10640_vm3 = vmmov 0  }
  0x12   : > { %s6967_s17 = smul.u32 54, %s10971_s25  ;;  %v7436_v28 = vsel %vm10638_vm0, %v7073_v21, 0  ;;  %v7074_v31 = vld [vmem:[%s10621_s3 + $0x18] sm:$0xff]   ;;  %v7078_v33 = vld [vmem:[%s10621_s3 + $0x10] sm:$0xff]   ;;  %v7079_v36 = vld [vmem:[%s10621_s3 + $0x8] sm:$0xff]   ;;  %vm1274_vm4 = vcmask 1044480  }
  0x13   : > { %s6966_s18 = smul.u32 27, %s7386_s14  ;;  %v7081_v38 = vld [vmem:[%s10621_s3] sm:$0xff]   ;;  %v7083_v42 = vld [vmem:[%s10619_s1 + $0x10] sm:$0x3f]   ;;  %s5580_s13 = sshll.u32 %s7277_s24, 3 }
  0x14   : > { %v1327_v44 = vsel %vm10638_vm0, %v7083_v42, 0  ;;  %s317_s15 = ssub.s32 1, %s5580_s13  ;;  %s319_s16 = ssub.s32 17, %s5580_s13 }
  0x15   : > { %s303_s19 = sadd.s32 %s6967_s17, %s6966_s18  ;;  %s318_s24 = smul.u32 18, %s317_s15 }
  0x16   : > { %s5578_s20 = sshll.u32 %s303_s19, 2  ;;  %s320_s17 = smul.u32 18, %s319_s16 }
  0x17   : > { %s7397_s23 = scalar_lea.vmem %s10618_s0, %s5578_s20  ;;  %s6968_s20 = smul.u32 18, %s7386_s14 }
  0x18   : > { %v7062_v6 = vld [vmem:[%s7397_s23 + $0x8] sm:$0xfe]   ;;  %v7063_v7 = vld [vmem:[%s7397_s23 + $0x10] ss:$0 sps:$4 sm:$0x33]   ;;  %v7064_v8 = vld [vmem:[%s7397_s23] sm:$0xff]  }
  0x19   : > { %v341_v10 = vrot.slane %v7062_v6, 1  ;;  %v342_v11 = vrot.slane %v7063_v7, 1  ;;  %6256 = vmatprep.mubr.msk.bf16.mxu1 %vm349_vm2, %v7064_v8  ;;  %v7066_v12 = vld [vmem:[%s7397_s23 + $0x8] ss:$0 sps:$4 sm:$0x11]   ;;  %v7432_v26 = vld [vmem:[%s7397_s23 + $0x18] sm:$0xff]  }
  0x1a   : > { %6257 = vmatmul.mubr.msk.bf16.vlgmr.msra.gmra.mxu1 %vm349_vm2, %v7066_v12  ;;  %v7067_v15 = vld [vmem:[%s7397_s23 + $0x10] sm:$0xfc]   ;;  %v7068_v16 = vld [vmem:[%s7397_s23 + $0x18] ss:$0 sps:$4 sm:$0x77]   ;;  %v877_v30 = vrot.slane %v7432_v26, 2 }
  0x1b   : > { %v343_v14 = vsel %vm10639_vm1, %v341_v10, %v342_v11  ;;  %6267 = vmatpush3.bf16.msra.mxu1 %v7069_v3  ;;  %v493_v18 = vrot.slane %v7067_v15, 2  ;;  %v494_v19 = vrot.slane %v7068_v16, 2  ;;  %v7424_v22 = vld [vmem:[%s7397_s23 + $0x14] sm:$0xf]  ;;  %v822_v23 = vld [vmem:[%s7397_s23 + $0x10] sm:$0xc] }
  0x1c   : > { %6250 = vmatprep.mubr.msk.bf16.mxu0 %vm349_vm2, %v343_v14  ;;  %6268 = vmatprep.subr.bf16.mxu1 %v7070_v9  ;;  %v5615_v25 = vcombine.low %v822_v23, %v7424_v22  ;;  %v7454_v34 = vld [vmem:[%s7397_s23 + $0x20] sm:$0xff]   ;;  %v7468_v39 = vld [vmem:[%s7397_s23 + $0x28] sm:$0xff]   ;;  %v7480_v43 = vld [vmem:[%s7397_s23 + $0x30] sm:$0xff]   ;;  %v1049_v1 = vrot.slane %v7432_v26, 1  ;;  %s6969_s21 = smul.u32 36, %s10971_s25 }
  0x1d   : > { %6251 = vmatmul.mubr.msk.bf16.vlgmr.msra.gmra.mxu0 %vm349_vm2, %v342_v11  ;;  %v495_v20 = vsel %vm10638_vm0, %v493_v18, %v494_v19  ;;  %v879_v35 = vrot.slane %v7454_v34, 2  ;;  %v881_v40 = vrot.slane %v7468_v39, 2  ;;  %v883_v45 = vrot.slane %v7480_v43, 2  ;;  %v7486_v47 = vld [vmem:[%s7397_s23 + $0x38] sm:$0xff]   ;;  %v7090_v51 = vld [vmem:[%s7397_s23 + $0x20] sm:$0xff]   ;;  %v7092_v55 = vld [vmem:[%s7397_s23 + $0x28] sm:$0xff]  }
  0x1e   : > { %6261 = vmatpush3.bf16.msra.mxu0 %v508_v13  ;;  %6262 = vmatprep.mubr.msk.bf16.mxu0 %vm349_vm2, %v495_v20  ;;  %v876_v29 = vrot.slane %v5615_v25, 2  ;;  %v885_v48 = vrot.slane %v7486_v47, 2  ;;  %v7089_v50 = vld [vmem:[%s7397_s23 + $0x18] sm:$0xf8]   ;;  %v1276_v53 = vrot.slane %v7090_v51, 3  ;;  %v1278_v56 = vrot.slane %v7092_v55, 3  ;;  %s8437_s25 = sadd.s32 %s6969_s21, %s6968_s20 }
  0x1f   : > { %6269 = vmatpush3.bf16.msra.mxu1 %v7070_v9  ;;  %6286 = vmatprep.subr.bf16.mxu0 %v10628_v27  ;;  %v880_v37 = vsel %vm10638_vm0, %v877_v30, %v879_v35  ;;  %v882_v41 = vsel %vm10638_vm0, %v879_v35, %v881_v40  ;;  %v884_v46 = vsel %vm10638_vm0, %v881_v40, %v883_v45  ;;  %v1275_v52 = vrot.slane %v7089_v50, 3  ;;  %v7094_v58 = vld [vmem:[%s7397_s23 + $0x30] sm:$0xff]   ;;  %v7096_v0 = vld [vmem:[%s7397_s23 + $0x38] sm:$0xff]   ;;  %v7097_v5 = vld [vmem:[%s7397_s23 + $0x40] sm:$0xff]   ;;  %s5579_s14 = sshll.u32 %s8437_s25, 3 }
  0x20   : > { %6270 = vmatprep.subr.bf16.mxu1 %v7071_v17  ;;  %v878_v32 = vsel %vm10638_vm0, %v876_v29, %v877_v30  ;;  %v886_v49 = vsel %vm10638_vm0, %v883_v45, %v885_v48  ;;  %v1279_v57 = vsel %vm1274_vm4, %v1276_v53, %v1278_v56  ;;  %v803_v59 = vld [vmem:[%s7397_s23 + $0x10] sm:$0xf]  ;;  %v1280_v60 = vrot.slane %v7094_v58, 3  ;;  %v7098_v10 = vld [vmem:[%s7397_s23 + $0x48] sm:$0xff]   ;;  %v7100_v20 = vld [vmem:[%s7397_s23 + $0x58] sm:$0xff]   ;;  %s8540_s9 = scalar_lea.vmem %s10625_s7, %s5579_s14 }
  0x21   : > { %v1277_v54 = vsel %vm1274_vm4, %v1275_v52, %v1276_v53  ;;  %v5636_v61 = vcombine.low %v803_v59, %v7424_v22  ;;  %v1282_v2 = vrot.slane %v7096_v0, 3  ;;  %v1051_v6 = vrot.slane %v7454_v34, 1  ;;  %v7099_v15 = vld [vmem:[%s7397_s23 + $0x50] sm:$0xff]   ;;  %v7101_v23 = vld [vmem:[%s7397_s23 + $0x60] ss:$0 sps:$4 sm:$0x77]  }
  0x22   : > { %v1281_v62 = vsel %vm1274_vm4, %v1278_v56, %v1280_v60  ;;  %v1284_v7 = vrot.slane %v7097_v5, 3  ;;  %v1053_v11 = vrot.slane %v7468_v39, 1  ;;  %v1286_v12 = vrot.slane %v7098_v10, 3  ;;  %v7102_v26 = vld [vmem:[%s10619_s1 + $0x8] sm:$0x3f]   ;;  %v7114_v58 = vld [vmem:[%s10623_s5 + $0x78] sm:$0xff]  }
  0x23   : > { %6271 = vmatpush3.bf16.msra.mxu1 %v7071_v17  ;;  %v7516_v63 = vrot.slane %v5636_v61, 1  ;;  %v1283_v4 = vsel %vm1274_vm4, %v1280_v60, %v1282_v2  ;;  %v7531_v8 = vsel %vm10639_vm1, %v1049_v1, %v1051_v6  ;;  %v1055_v16 = vrot.slane %v7480_v43, 1  ;;  %v7103_v29 = vld [vmem:[%s7397_s23 + $0x58] sm:$0xfc]   ;;  %v7105_v35 = vld [vmem:[%s10619_s1] sm:$0x3f]  }
  0x24   : > { %6272 = vmatprep.subr.bf16.mxu1 %v7072_v24  ;;  %v1285_v9 = vsel %vm1274_vm4, %v1282_v2, %v1284_v7  ;;  %v7540_v13 = vsel %vm10639_vm1, %v1051_v6, %v1053_v11  ;;  %v1287_v14 = vsel %vm1274_vm4, %v1284_v7, %v1286_v12  ;;  %v1288_v17 = vrot.slane %v7099_v15, 3  ;;  %v7104_v30 = vld [vmem:[%s7397_s23 + $0x60] ss:$0 sps:$4 sm:$0x77]   ;;  %v7111_v50 = vld [vmem:[%s7397_s23 + $0x68] ss:$0 sps:$4 sm:$0xff]  }
  0x25   : > { %6263 = vmatmul.mubr.msk.bf16.vlgmr.msra.gmra.mxu0 %vm349_vm2, %v494_v19  ;;  %v7522_v3 = vsel %vm10639_vm1, %v7516_v63, %v1049_v1  ;;  %v7551_v18 = vsel %vm10639_vm1, %v1053_v11, %v1055_v16  ;;  %v1290_v21 = vrot.slane %v7100_v20, 3  ;;  %v2571_v55 = vrot.slane %v7111_v50, 3  ;;  %v7608_v5 = vld [vmem:[%s10620_s2] ss:$0 sm:$0xff] }
  0x26   : > { %6287 = vmatpush3.bf16.msra.mxu0 %v7436_v28  ;;  %6288 = vmatprep.mubr.msk.bf16.mxu0 %vm10640_vm3, %v10628_v27  ;;  %v1289_v19 = vsel %vm1274_vm4, %v1286_v12, %v1288_v17 }
  0x27   : > { %6273 = vmatpush3.bf16.msra.mxu1 %v7072_v24  ;;  %6362 = vmatprep.subr.bf16.mxu0 %v10628_v27  ;;  %v1291_v22 = vsel %vm1274_vm4, %v1288_v17, %v1290_v21  ;;  %v1292_v24 = vrot.slane %v7101_v23, 3 }
  0x28   : > { %6274 = vmatprep.subr.bf16.mxu1 %v7074_v31 }
  0x29   : > { %v1293_v25 = vsel %vm1274_vm4, %v1290_v21, %v1292_v24 }
  0x2b   : > { %6275 = vmatpush3.bf16.msra.mxu1 %v7074_v31  ;;  %v2434_v31 = vsel %vm10638_vm0, %v7102_v26, 0 }
  0x2c   : > { %6276 = vmatprep.subr.bf16.mxu1 %v7078_v33 }
  0x2d   : > { %6289 = vmatmul.mubr.msk.bf16.vlgmr.msra.gmra.mxu0 %vm349_vm2, %v878_v32  ;;  %v2419_v32 = vrot.slane %v7103_v29, 2  ;;  %v7643_v29 = vld [vmem:[%s7397_s23 + $0x48] sm:$0xff]  }
  0x2e   : > { %6292 = vmatprep.mubr.msk.bf16.mxu0 %vm10640_vm3, %v10628_v27  ;;  %6363 = vmatpush3.bf16.msra.mxu0 %v1327_v44 }
  0x2f   : > { %6277 = vmatpush3.bf16.msra.mxu1 %v7078_v33  ;;  %6963 = vmatprep.subr.msk.bf16.mxu0 %vm10638_vm0, %v7102_v26  ;;  %v2420_v33 = vrot.slane %v7104_v30, 2  ;;  %v889_v30 = vrot.slane %v7643_v29, 2 }
  0x30   : > { %6278 = vmatprep.subr.bf16.mxu1 %v7079_v36 }
  0x31   : > { %v2421_v34 = vsel %vm10638_vm0, %v2419_v32, %v2420_v33  ;;  %v7091_v32 = vld [vmem:[%s7397_s23 + $0x50] sm:$0xff]  }
  0x33   : > { %6279 = vmatpush3.bf16.msra.mxu1 %v7079_v36  ;;  %v7106_v36 = vld [vmem:[%s7397_s23 + $0x50] sm:$0xfe]  }
  0x34   : > { %6280 = vmatprep.subr.bf16.mxu1 %v7081_v38  ;;  %v2492_v39 = vrot.slane %v7106_v36, 1 }
  0x35   : > { %6293 = vmatmul.mubr.msk.bf16.gmra.mxu0 %vm349_vm2, %v880_v37  ;;  %v7107_v37 = vld [vmem:[%s7397_s23 + $0x58] ss:$0 sps:$4 sm:$0x33]  }
  0x36   : > { %6296 = vmatprep.mubr.msk.bf16.mxu0 %vm10640_vm3, %v10628_v27  ;;  %v2493_v40 = vrot.slane %v7107_v37, 1  ;;  %v7095_v37 = vld [vmem:[%s7397_s23 + $0x8] sm:$0xfe]  }
  0x37   : > { %6281 = vmatpush3.bf16.msra.mxu1 %v7081_v38  ;;  %v2507_v38 = vsel %vm10638_vm0, %v7105_v35, 0 }
  0x38   : > { %6958 = vmatprep.subr.bf16.mxu1 %v10628_v27 }
  0x3d   : > { %6297 = vmatmul.mubr.msk.bf16.gmra.mxu0 %vm349_vm2, %v882_v41  ;;  %v2494_v41 = vsel %vm10639_vm1, %v2492_v39, %v2493_v40 }
  0x3e   : > { %6300 = vmatprep.mubr.msk.bf16.mxu0 %vm10640_vm3, %v10628_v27 }
  0x45   : > { %6301 = vmatmul.mubr.msk.bf16.gmra.mxu0 %vm349_vm2, %v884_v46  ;;  %v7109_v46 = vld [vmem:[%s10619_s1 + $0x10] sm:$0x3f]  }
  0x46   : > { %6304 = vmatprep.mubr.msk.bf16.mxu0 %vm10640_vm3, %v10628_v27  ;;  %v2585_v53 = vsel %vm10638_vm0, %v7109_v46, 0 }
  0x4d   : > { %6305 = vmatmul.mubr.msk.bf16.gmra.mxu0 %vm349_vm2, %v886_v49  ;;  %v7110_v49 = vld [vmem:[%s7397_s23 + $0x60] sm:$0xf8]  }
  0x4e   : > { %6364 = vmatprep.mubr.msk.bf16.mxu0 %vm10640_vm3, %v10628_v27 }
  0x55   : > { %6365 = vmatmul.mubr.msk.bf16.vlgmr.msra.gmra.mxu0 %vm349_vm2, %v1277_v54  ;;  %v2570_v54 = vrot.slane %v7110_v49, 3 }
  0x56   : > { %6368 = vmatprep.mubr.msk.bf16.mxu0 %vm10640_vm3, %v10628_v27  ;;  %6453 = vmatpush3.bf16.msra.mxu0 %v2434_v31 }
  0x57   : > { %6964 = vmatprep.subr.msk.bf16.mxu0 %vm10638_vm0, %v7105_v35 }
  0x5d   : > { %6369 = vmatmul.mubr.msk.bf16.gmra.mxu0 %vm349_vm2, %v1279_v57  ;;  %v2572_v57 = vsel %vm1274_vm4, %v2570_v54, %v2571_v55 }
  0x5e   : > { %6372 = vmatprep.mubr.msk.bf16.mxu0 %vm10640_vm3, %v10628_v27 }
  0x65   : > { %6373 = vmatmul.mubr.msk.bf16.gmra.mxu0 %vm349_vm2, %v1281_v62  ;;  %v7115_v62 = vld [vmem:[%s10623_s5 + $0x70] sm:$0xff]  }
  0x66   : > { %6376 = vmatprep.mubr.msk.bf16.mxu0 %vm10640_vm3, %v10628_v27 }
  0x6d   : > { %6377 = vmatmul.mubr.msk.bf16.gmra.mxu0 %vm349_vm2, %v1283_v4 }
  0x6e   : > { %6380 = vmatprep.mubr.msk.bf16.mxu0 %vm10640_vm3, %v10628_v27 }
  0x75   : > { %6381 = vmatmul.mubr.msk.bf16.gmra.mxu0 %vm349_vm2, %v1285_v9 }
  0x76   : > { %6384 = vmatprep.mubr.msk.bf16.mxu0 %vm10640_vm3, %v10628_v27 }
  0x7d   : > { %6385 = vmatmul.mubr.msk.bf16.gmra.mxu0 %vm349_vm2, %v1287_v14 }
  0x7e   : > { %6388 = vmatprep.mubr.msk.bf16.mxu0 %vm10640_vm3, %v10628_v27 }
  0x85   : > { %6389 = vmatmul.mubr.msk.bf16.gmra.mxu0 %vm349_vm2, %v1289_v19 }
  0x86   : > { %6392 = vmatprep.mubr.msk.bf16.mxu0 %vm10640_vm3, %v10628_v27 }
  0x8d   : > { %6393 = vmatmul.mubr.msk.bf16.gmra.mxu0 %vm349_vm2, %v1291_v22  ;;  %v7627_v22 = vld [vmem:[%s7397_s23 + $0x40] sm:$0xff]  }
  0x8e   : > { %6396 = vmatprep.mubr.msk.bf16.mxu0 %vm10640_vm3, %v10628_v27  ;;  %v887_v24 = vrot.slane %v7627_v22, 2  ;;  %v1059_v43 = vrot.slane %v7627_v22, 1  ;;  %v7127_v22 = vld [vmem:[%s10621_s3 + $0x10] sm:$0xff]  }
  0x90   : > { %v888_v26 = vsel %vm10638_vm0, %v885_v48, %v887_v24  ;;  %v890_v31 = vsel %vm10638_vm0, %v887_v24, %v889_v30  ;;  %v891_v48 = vrot.slane %v7091_v32, 2  ;;  %v7108_v24 = vld [vmem:[%s7397_s23 + $0x50] ss:$0 sps:$4 sm:$0x11]  }
  0x95   : > { %6397 = vmatmul.mubr.msk.bf16.gmra.mxu0 %vm349_vm2, %v1293_v25  ;;  %v7087_v25 = vld [vmem:[%s10619_s1] sm:$0x3f]  }
  0x96   : > { %6454 = vmatprep.mubr.msk.bf16.mxu0 %vm349_vm2, %v2421_v34  ;;  %v7093_v34 = vld [vmem:[%s7397_s23 + $0x58] ss:$0 sps:$4 sm:$0x33]  }
  0x97   : > { %v893_v35 = vrot.slane %v7093_v34, 2 }
  0x99   : > { %v894_v36 = vsel %vm10638_vm0, %v891_v48, %v893_v35 }
  0x9d   : > { %6455 = vmatmul.mubr.msk.bf16.vlgmr.msra.gmra.mxu0 %vm349_vm2, %v2420_v33  ;;  %v892_v33 = vsel %vm10638_vm0, %v889_v30, %v891_v48 }
  0x9e   : > { %6459 = vmatpush3.bf16.msra.mxu0 %v2507_v38  ;;  %6460 = vmatprep.mubr.msk.bf16.mxu0 %vm349_vm2, %v2494_v41  ;;  %v1046_v38 = vrot.slane %v7095_v37, 1  ;;  %v7113_v41 = vld [vmem:[%s10621_s3 + $0x30] sm:$0xff]  }
  0x9f   : > { %6965 = vmatprep.subr.msk.bf16.mxu0 %vm10638_vm0, %v7109_v46 }
  0xa0   : > { %v1048_v39 = vsel %vm10639_vm1, %v1046_v38, %v7516_v63 }
  0xa5   : > { %6461 = vmatmul.mubr.msk.bf16.vlgmr.msra.gmra.mxu0 %vm349_vm2, %v2493_v40  ;;  %v7112_v40 = vld [vmem:[%s10621_s3 + $0x38] sm:$0xff]  }
  0xa6   : > { %6465 = vmatpush3.bf16.msra.mxu0 %v2585_v53  ;;  %6466 = vmatprep.mubr.msk.bf16.mxu0 %vm349_vm2, %v2572_v57 }
  0xa7   : > { %6490 = vmatprep.subr.bf16.mxu0 %v10628_v27 }
  0xad   : > { %6467 = vmatmul.mubr.msk.bf16.vlgmr.msra.gmra.mxu0 %vm349_vm2, %v2571_v55  ;;  %v7118_v55 = vld [vmem:[%s10623_s5 + $0x60] sm:$0xff]  }
  0xae   : > { %6491 = vmatpush3.bf16.msra.mxu0 %v7114_v58  ;;  %6506 = vmatprep.mubr.msk.bf16.mxu0 %vm10640_vm3, %v10628_v27  ;;  %v7120_v58 = vld [vmem:[%s10623_s5 + $0x58] sm:$0xff]  }
  0xaf   : > { %6492 = vmatprep.subr.bf16.mxu0 %v10628_v27 }
  0xb2   : > { %6493 = vmatpush3.bf16.msra.mxu0 %v7115_v62 }
  0xb3   : > { %6494 = vmatprep.subr.bf16.mxu0 %v10628_v27 }
  0xda   : > { %v6258_v42 = vpop.f32.mrf.mxu1 }
  0xdc   : > { %v464_v45 = vpop.f32.mrf.mxu1 }
  0xdd   : > { %v6252_v44 = vpop.f32.mrf.mxu0 }
  0xde   : > { %v6259_v52 = vpop.f32.mrf.mxu1  ;;  %v473_v60 = vadd.f32 %v6258_v42, %v6252_v44 }
  0xdf   : > { %v394_v51 = vpop.f32.mrf.mxu0 }
  0xe0   : > { %v465_v0 = vadd.f32 %v464_v45, %v394_v51  ;;  %v467_v1 = vpop.f32.mrf.mxu1 }
  0xe1   : > { %v6253_v56 = vpop.f32.mrf.mxu0 }
  0xe3   : > { %v397_v59 = vpop.f32.mrf.mxu0 }
  0xe4   : > { %v468_v9 = vadd.f32 %v467_v1, %v397_v59  ;;  %v7116_v59 = vld [vmem:[%s10621_s3 + $0x28] sm:$0xff]  }
  0xe5   : > { %v6264_v61 = vpop.f32.mrf.mxu0  ;;  %v7123_v1 = vld [vmem:[%s10623_s5 + $0x48] sm:$0xff]  }
  0xe6   : > { %v560_v2 = vadd.f32 %v6264_v61, %v473_v60  ;;  %v7121_v61 = vld [vmem:[%s10623_s5 + $0x50] sm:$0xff]  }
  0xe7   : > { %v544_v4 = vpop.f32.mrf.mxu0 }
  0xe8   : > { %v558_v6 = vadd.f32 %v544_v4, %v465_v0  ;;  %v570_v10 = vadd.f32 %v7608_v5, %v560_v2  ;;  %v7119_v0 = vld [vmem:[%s10621_s3 + $0x20] sm:$0xff]   ;;  %v7122_v2 = vld [vmem:[%s10621_s3 + $0x18] sm:$0xff]  }
  0xe9   : > { %v6265_v7 = vpop.f32.mrf.mxu0 }
  0xea   : > { %v7613_v12 = vadd.f32 %v7608_v5, %v558_v6  ;;  %v7618_v17 = vmax.f32 %v570_v10, 0.0 }
  0xeb   : > { %v547_v11 = vpop.f32.mrf.mxu0 }
  0xec   : > { %v559_v14 = vadd.f32 %v547_v11, %v468_v9  ;;  %v571_v19 = vmax.f32 %v7613_v12, 0.0  ;;  %v575_v23 = vpack.c.bf16 %v7618_v17, %v7618_v17  ;;  %v7124_v9 = vld [vmem:[%s10623_s5 + $0x40] sm:$0xff]   ;;  %v1061_v11 = vrot.slane %v7643_v29, 1 }
  0xed   : > { %v7679_v63 = vpop.f32.mrf.mxu0  ;;  %v1063_v29 = vrot.slane %v7108_v24, 1 }
  0xee   : > { %v7616_v15 = vadd.f32 %v7608_v5, %v559_v14 }
  0xef   : > { %v6290_v42 = vpop.f32.mrf.mxu0  ;;  %v1064_v32 = vsel %vm10639_vm1, %v1061_v11, %v1063_v29 }
  0xf0   : > { %v572_v20 = vmax.f32 %v7616_v15, 0.0 }
  0xf1   : > { %v7685_v44 = vpop.f32.mrf.mxu0 }
  0xf2   : > { %v574_v21 = vpack.c.bf16 %v572_v20, %v571_v19 }
  0xf3   : > { %v6291_v45 = vpop.f32.mrf.mxu0 }
  0xf4   : > { %6282 = vmatprep.mubr.bf16.mxu1 %v574_v21 }
  0xf5   : > { %6283 = vmatmul.mubr.bf16.vlgmr.msra.gmra.mxu1 %v575_v23  ;;  %v7687_v46 = vpop.f32.mrf.mxu0  ;;  %v1062_v23 = vsel %vm10639_vm1, %v1059_v43, %v1061_v11 }
  0xf6   : > { %6959 = vmatpush3.bf16.msra.mxu1 %v7436_v28  ;;  %6308 = vmatprep.mubr.msk.bf16.mxu1 %vm10640_vm3, %v10628_v27  ;;  %v1098_v28 = vsel %vm10638_vm0, %v7087_v25, 0 }
  0xf7   : > { %6324 = vmatprep.subr.bf16.mxu1 %v10628_v27  ;;  %v6294_v49 = vpop.f32.mrf.mxu0 }
  0xf9   : > { %v7693_v50 = vpop.f32.mrf.mxu0 }
  0xfb   : > { %v6295_v51 = vpop.f32.mrf.mxu0 }
  0xfd   : > { %6309 = vmatmul.mubr.msk.bf16.vlgmr.msra.gmra.mxu1 %vm349_vm2, %v888_v26 }
  0xfe   : > { %6325 = vmatpush3.bf16.msra.mxu1 %v1098_v28  ;;  %6312 = vmatprep.mubr.msk.bf16.mxu1 %vm10640_vm3, %v10628_v27 }
  0xff   : > { %6400 = vmatprep.subr.bf16.mxu1 %v10628_v27 }
 0x105   : > { %6313 = vmatmul.mubr.msk.bf16.gmra.mxu1 %vm349_vm2, %v890_v31  ;;  %v7128_v31 = vld [vmem:[%s10621_s3 + $0x8] sm:$0xff]  }
 0x106   : > { %6316 = vmatprep.mubr.msk.bf16.mxu1 %vm10640_vm3, %v10628_v27 }
 0x10d   : > { %6317 = vmatmul.mubr.msk.bf16.gmra.mxu1 %vm349_vm2, %v892_v33 }
 0x10e   : > { %6320 = vmatprep.mubr.msk.bf16.mxu1 %vm10640_vm3, %v10628_v27 }
 0x115   : > { %6321 = vmatmul.mubr.msk.bf16.gmra.mxu1 %vm349_vm2, %v894_v36 }
 0x116   : > { %6326 = vmatprep.mubr.msk.bf16.mxu1 %vm10640_vm3, %v10628_v27 }
 0x11d   : > { %6327 = vmatmul.mubr.msk.bf16.vlgmr.msra.gmra.mxu1 %vm349_vm2, %v1048_v39  ;;  %v7129_v39 = vld [vmem:[%s10621_s3] sm:$0xff]  }
 0x11e   : > { %6330 = vmatprep.mubr.msk.bf16.mxu1 %vm10640_vm3, %v10628_v27  ;;  %6401 = vmatpush3.bf16.msra.mxu1 %v7112_v40 }
 0x11f   : > { %6402 = vmatprep.subr.bf16.mxu1 %v10628_v27 }
 0x122   : > { %6403 = vmatpush3.bf16.msra.mxu1 %v7113_v41 }
 0x123   : > { %6404 = vmatprep.subr.bf16.mxu1 %v10628_v27 }
 0x125   : > { %6331 = vmatmul.mubr.msk.bf16.gmra.mxu1 %vm349_vm2, %v7522_v3  ;;  %v7695_v3 = vpop.f32.mrf.mxu0 }
 0x126   : > { %6334 = vmatprep.mubr.msk.bf16.mxu1 %vm10640_vm3, %v10628_v27  ;;  %6405 = vmatpush3.bf16.msra.mxu1 %v7116_v59 }
 0x127   : > { %v6298_v52 = vpop.f32.mrf.mxu0  ;;  %6406 = vmatprep.subr.bf16.mxu1 %v10628_v27 }
 0x129   : > { %v7704_v53 = vpop.f32.mrf.mxu0 }
 0x12a   : > { %6407 = vmatpush3.bf16.msra.mxu1 %v7119_v0 }
 0x12b   : > { %v6299_v54 = vpop.f32.mrf.mxu0  ;;  %6408 = vmatprep.subr.bf16.mxu1 %v10628_v27 }
 0x12d   : > { %6335 = vmatmul.mubr.msk.bf16.gmra.mxu1 %vm349_vm2, %v7531_v8  ;;  %v7117_v8 = vld [vmem:[%s10623_s5 + $0x68] sm:$0xff]   ;;  %v7710_v56 = vpop.f32.mrf.mxu0 }
 0x12e   : > { %6338 = vmatprep.mubr.msk.bf16.mxu1 %vm10640_vm3, %v10628_v27  ;;  %6495 = vmatpush3.bf16.msra.mxu0 %v7117_v8 }
 0x12f   : > { %6496 = vmatprep.subr.bf16.mxu0 %v10628_v27  ;;  %v6302_v57 = vpop.f32.mrf.mxu0  ;;  %6409 = vmatpush3.bf16.msra.mxu1 %v7122_v2 }
 0x130   : > { %6410 = vmatprep.subr.bf16.mxu1 %v10628_v27 }
 0x131   : > { %v7724_v60 = vpop.f32.mrf.mxu0 }
 0x132   : > { %6497 = vmatpush3.bf16.msra.mxu0 %v7118_v55 }
 0x133   : > { %6498 = vmatprep.subr.bf16.mxu0 %v10628_v27  ;;  %6411 = vmatpush3.bf16.msra.mxu1 %v7127_v22  ;;  %v7832_v22 = vld [vmem:[%s10621_s3 + $0x38] sm:$0xff]  }
 0x134   : > { %6412 = vmatprep.subr.bf16.mxu1 %v10628_v27 }
 0x135   : > { %6339 = vmatmul.mubr.msk.bf16.gmra.mxu1 %vm349_vm2, %v7540_v13  ;;  %v1057_v13 = vrot.slane %v7486_v47, 1  ;;  %v6303_v47 = vpop.f32.mrf.mxu0 }
 0x136   : > { %6342 = vmatprep.mubr.msk.bf16.mxu1 %vm10640_vm3, %v10628_v27  ;;  %6499 = vmatpush3.bf16.msra.mxu0 %v7120_v58  ;;  %v701_v47 = vlaneseq }
 0x137   : > { %6500 = vmatprep.subr.bf16.mxu0 %v10628_v27  ;;  %v7734_v62 = vpop.f32.mrf.mxu0  ;;  %v1060_v6 = vsel %vm10639_vm1, %v1057_v13, %v1059_v43  ;;  %6413 = vmatpush3.bf16.msra.mxu1 %v7128_v31 }
 0x138   : > { %6414 = vmatprep.subr.bf16.mxu1 %v10628_v27  ;;  %v7816_v43 = vshrl.u32 %v701_v47, 7 }
 0x13a   : > { %6501 = vmatpush3.bf16.msra.mxu0 %v7121_v61  ;;  %v7821_v2 = vadd.s32 16, %v7816_v43  ;;  %v7840_v29 = vadd.s32 8, %v7816_v43 }
 0x13b   : > { %6502 = vmatprep.subr.bf16.mxu0 %v10628_v27  ;;  %6415 = vmatpush3.bf16.msra.mxu1 %v7129_v39 }
 0x13c   : > { %6470 = vmatprep.subr.bf16.mxu1 %v7832_v22 }
 0x13d   : > { %6343 = vmatmul.mubr.msk.bf16.gmra.mxu1 %vm349_vm2, %v7551_v18  ;;  %v1058_v18 = vsel %vm10639_vm1, %v1055_v16, %v1057_v13  ;;  %v6306_v16 = vpop.f32.mrf.mxu0 }
 0x13e   : > { %6346 = vmatprep.mubr.msk.bf16.mxu1 %vm10640_vm3, %v10628_v27  ;;  %6503 = vmatpush3.bf16.msra.mxu0 %v7123_v1 }
 0x13f   : > { %v7751_v4 = vpop.f32.mrf.mxu0  ;;  %6504 = vmatprep.subr.bf16.mxu0 %v10628_v27 }
 0x141   : > { %v6307_v7 = vpop.f32.mrf.mxu0 }
 0x142   : > { %6505 = vmatpush3.bf16.msra.mxu0 %v7124_v9  ;;  %v7826_v9 = vmul.u32.u64.low 3817748708, %v7821_v2  ;;  %v7827_v11 = vmul.u32.u64.high 3817748708, %v7821_v2, %v7826_v9 }
 0x143   : > { %v7758_v10 = vpop.f32.mrf.mxu0  ;;  %6594 = vmatprep.subr.bf16.mxu0 %v10628_v27 }
 0x145   : > { %6347 = vmatmul.mubr.msk.bf16.gmra.mxu1 %vm349_vm2, %v1058_v18  ;;  %v6366_v14 = vpop.f32.mrf.mxu0 }
 0x146   : > { %6350 = vmatprep.mubr.msk.bf16.mxu1 %vm10640_vm3, %v10628_v27 }
 0x147   : > { %v7766_v21 = vpop.f32.mrf.mxu0 }
 0x149   : > { %v6367_v25 = vpop.f32.mrf.mxu0 }
 0x14a   : > { %v7836_v24 = vmul.u32.u64.low 3817748708, %v7816_v43  ;;  %v7837_v25 = vmul.u32.u64.high 3817748708, %v7816_v43, %v7836_v24 }
 0x14b   : > { %v7773_v26 = vpop.f32.mrf.mxu0 }
 0x14d   : > { %6351 = vmatmul.mubr.msk.bf16.gmra.mxu1 %vm349_vm2, %v1060_v6  ;;  %v6370_v28 = vpop.f32.mrf.mxu0 }
 0x14e   : > { %6354 = vmatprep.mubr.msk.bf16.mxu1 %vm10640_vm3, %v10628_v27 }
 0x14f   : > { %v7779_v30 = vpop.f32.mrf.mxu0 }
 0x151   : > { %v6371_v48 = vpop.f32.mrf.mxu0 }
 0x153   : > { %v7785_v33 = vpop.f32.mrf.mxu0 }
 0x155   : > { %6355 = vmatmul.mubr.msk.bf16.gmra.mxu1 %vm349_vm2, %v1062_v23  ;;  %v6374_v34 = vpop.f32.mrf.mxu0 }
 0x156   : > { %6358 = vmatprep.mubr.msk.bf16.mxu1 %vm10640_vm3, %v10628_v27  ;;  %v7844_v48 = vmul.u32.u64.low 3817748708, %v7840_v29  ;;  %v7845_v34 = vmul.u32.u64.high 3817748708, %v7840_v29, %v7844_v48 }
 0x157   : > { %v7791_v35 = vpop.f32.mrf.mxu0  ;;  %v7861_v48 = vstv %s318_s24 }
 0x158   : > { %vm765_vm4 = vcmp.ge.s32.totalorder %v7821_v2, %v7861_v48 }
 0x159   : > { %v6375_v36 = vpop.f32.mrf.mxu0 }
 0x15b   : > { %v7793_v37 = vpop.f32.mrf.mxu0 }
 0x15d   : > { %6359 = vmatmul.mubr.msk.bf16.gmra.mxu1 %vm349_vm2, %v1064_v32  ;;  %v6378_v38 = vpop.f32.mrf.mxu0  ;;  %v733_v32 = vshrl.u32 %v7827_v11, 4 }
 0x15e   : > { %6416 = vmatprep.mubr.msk.bf16.mxu1 %vm10640_vm3, %v10628_v27 }
 0x15f   : > { %v7798_v40 = vpop.f32.mrf.mxu0  ;;  %v734_v39 = vmul.u32 18, %v733_v32 }
 0x161   : > { %v6379_v41 = vpop.f32.mrf.mxu0 }
 0x162   : > { %v711_v41 = vshrl.u32 %v7837_v25, 4 }
 0x163   : > { %v7800_v42 = vpop.f32.mrf.mxu0 }
 0x165   : > { %v6382_v45 = vpop.f32.mrf.mxu0 }
 0x167   : > { %v7802_v49 = vpop.f32.mrf.mxu0 }
 0x169   : > { %v6383_v51 = vpop.f32.mrf.mxu0 }
 0x16b   : > { %v7804_v52 = vpop.f32.mrf.mxu0 }
 0x16d   : > { %v6386_v8 = vpop.f32.mrf.mxu0 }
 0x16f   : > { %v7806_v54 = vpop.f32.mrf.mxu0 }
 0x171   : > { %v6387_v55 = vpop.f32.mrf.mxu0 }
 0x172   : > { %v735_v55 = vsub.s32 %v7821_v2, %v734_v39  ;;  %v7865_v39 = vstv %s320_s17 }
 0x173   : > { %v7808_v13 = vpop.f32.mrf.mxu0 }
 0x174   : > { %vm740_vm5 = vcmp.ne.s32.totalorder %v735_v55, 0  ;;  %vm743_vm6 = vcmp.lt.s32.totalorder %v735_v55, 0 }
 0x175   : > { %v6390_v57 = vpop.f32.mrf.mxu0  ;;  %vm746_vm7 = vmand %vm743_vm6, %vm740_vm5 }
 0x176   : > { %v712_v57 = vmul.u32 18, %v711_v41  ;;  %v7870_v41 = vld [vmem:[%s10622_s4] ss:$0 sm:$0xff] }
 0x177   : > { %v7810_v58 = vpop.f32.mrf.mxu0 }
 0x179   : > { %v6391_v59 = vpop.f32.mrf.mxu0 }
 0x17a   : > { %v722_v59 = vshrl.u32 %v7845_v34, 4 }
 0x17b   : > { %v7812_v18 = vpop.f32.mrf.mxu0 }
 0x17c   : > { %v723_v9 = vmul.u32 18, %v722_v59 }
 0x17d   : > { %v6394_v61 = vpop.f32.mrf.mxu0 }
 0x17f   : > { %v7814_v0 = vpop.f32.mrf.mxu0 }
 0x181   : > { %v6395_v16 = vpop.f32.mrf.mxu0 }
 0x183   : > { %v7818_v1 = vpop.f32.mrf.mxu0 }
 0x185   : > { %v6398_v6 = vpop.f32.mrf.mxu0 }
 0x186   : > { %v713_v6 = vsub.s32 %v7816_v43, %v712_v57 }
 0x187   : > { %v7823_v7 = vpop.f32.mrf.mxu0 }
 0x188   : > { %vm738_vm8 = vcmp.ne.s32.totalorder %v713_v6, 0  ;;  %vm741_vm9 = vcmp.lt.s32.totalorder %v713_v6, 0  ;;  %v747_v32 = vadd.s32 18, %v713_v6 }
 0x189   : > { %v6399_v14 = vpop.f32.mrf.mxu0  ;;  %vm744_vm10 = vmand %vm741_vm9, %vm738_vm8  ;;  %vm772_vm8 = vcmp.lt.s32.totalorder %v7821_v2, %v7865_v39 }
 0x18a   : > { %v749_v14 = vadd.s32 18, %v735_v55  ;;  %v750_v34 = vsel %vm744_vm10, %v747_v32, %v713_v6  ;;  %vm763_vm10 = vcmp.ge.s32.totalorder %v7816_v43, %v7861_v48 }
 0x18b   : > { %v6456_v23 = vpop.f32.mrf.mxu0  ;;  %vm753_vm5 = vcmp.ge.s32.totalorder %v750_v34, 1  ;;  %vm756_vm6 = vcmp.lt.s32.totalorder %v750_v34, 17 }
 0x18c   : > { %vm759_vm9 = vmand %vm753_vm5, %vm756_vm6 }
 0x18d   : > { %v2470_v28 = vpop.f32.mrf.mxu0 }
 0x18f   : > { %v6457_v31 = vpop.f32.mrf.mxu0 }
 0x190   : > { %v724_v31 = vsub.s32 %v7840_v29, %v723_v9 }
 0x191   : > { %v7847_v36 = vpop.f32.mrf.mxu0 }
 0x192   : > { %vm739_vm11 = vcmp.ne.s32.totalorder %v724_v31, 0  ;;  %vm742_vm12 = vcmp.lt.s32.totalorder %v724_v31, 0 }
 0x193   : > { %v6462_v38 = vpop.f32.mrf.mxu0  ;;  %vm745_vm15 = vmand %vm742_vm12, %vm739_vm11 }
 0x194   : > { %v2552_v51 = vadd.f32 %v6462_v38, %v6456_v23  ;;  %v748_v38 = vadd.s32 18, %v724_v31 }
 0x195   : > { %v2543_v45 = vpop.f32.mrf.mxu0 }
 0x196   : > { %v2544_v61 = vadd.f32 %v2543_v45, %v2470_v28  ;;  %v752_v28 = vsel %vm746_vm7, %v749_v14, %v735_v55  ;;  %v751_v45 = vsel %vm745_vm15, %v748_v38, %v724_v31  ;;  %vm770_vm15 = vcmp.lt.s32.totalorder %v7816_v43, %v7865_v39 }
 0x197   : > { %v6463_v8 = vpop.f32.mrf.mxu0  ;;  %vm755_vm13 = vcmp.ge.s32.totalorder %v752_v28, 1  ;;  %vm758_vm14 = vcmp.lt.s32.totalorder %v752_v28, 17  ;;  %vm754_vm11 = vcmp.ge.s32.totalorder %v751_v45, 1  ;;  %vm757_vm12 = vcmp.lt.s32.totalorder %v751_v45, 17 }
 0x198   : > { %vm761_vm2 = vmand %vm755_vm13, %vm758_vm14 }
 0x199   : > { %v7852_v47 = vpop.f32.mrf.mxu0  ;;  %vm768_vm7 = vmand %vm761_vm2, %vm765_vm4  ;;  %vm764_vm4 = vcmp.ge.s32.totalorder %v7840_v29, %v7861_v48 }
 0x19a   : > { %vm775_vm13 = vmand %vm768_vm7, %vm772_vm8  ;;  %vm771_vm7 = vcmp.lt.s32.totalorder %v7840_v29, %v7865_v39 }
 0x19b   : > { %v6468_v16 = vpop.f32.mrf.mxu0  ;;  %vm766_vm14 = vmand %vm759_vm9, %vm763_vm10 }
 0x19c   : > { %v7856_v23 = vadd.f32 %v6468_v16, %v2552_v51  ;;  %vm760_vm2 = vmand %vm754_vm11, %vm757_vm12 }
 0x19d   : > { %v2621_v11 = vpop.f32.mrf.mxu0  ;;  %vm773_vm5 = vmand %vm766_vm14, %vm770_vm15 }
 0x19e   : > { %v7858_v24 = vadd.f32 %v2621_v11, %v2544_v61  ;;  %vm767_vm6 = vmand %vm760_vm2, %vm764_vm4 }
 0x19f   : > { %v6469_v25 = vpop.f32.mrf.mxu0  ;;  %vm774_vm8 = vmand %vm767_vm6, %vm771_vm7 }
 0x1b5   : > { %v6284_v51 = vpop.f32.mrf.mxu1 }
 0x1b6   : > { %v690_v8 = vadd.f32 %v6284_v51, %v7870_v41 }
 0x1b7   : > { %v681_v55 = vpop.f32.mrf.mxu1 }
 0x1b8   : > { %v697_v57 = vmax.f32 %v690_v8, 0.0  ;;  %v682_v59 = vadd.f32 %v7870_v41, %v681_v55 }
 0x1b9   : > { %v6285_v61 = vpop.f32.mrf.mxu1 }
 0x1ba   : > { %v700_v16 = vadd.f32 %v697_v57, %v7618_v17  ;;  %v695_v6 = vmax.f32 %v682_v59, 0.0 }
 0x1bb   : > { %v684_v9 = vpop.f32.mrf.mxu1 }
 0x1bc   : > { %v784_v11 = vsel %vm775_vm13, %v700_v16, 0.0  ;;  %v698_v14 = vadd.f32 %v695_v6, %v571_v19  ;;  %v685_v25 = vadd.f32 %v7870_v41, %v684_v9 }
 0x1bd   : > { %v5988_v31 = vpack.c.bf16 %v784_v11, %v784_v11  ;;  %v7888_v28 = vpop.f32.mrf.mxu1 }
 0x1be   : > { %v782_v32 = vsel %vm773_vm5, %v698_v14, 0.0  ;;  %v696_v34 = vmax.f32 %v685_v25, 0.0 }
 0x1bf   : > { %800 = vst [vmem:[#allocation2 + $0xc] sm:$0x1] %v5988_v31  ;;  %v5986_v17 = vpack.c.bf16 %v782_v32, %v782_v32  ;;  %v6310_v38 = vpop.f32.mrf.mxu1 }
 0x1c0   : > { %v699_v45 = vadd.f32 %v696_v34, %v572_v20 }
 0x1c1   : > { %798 = vst [vmem:[#allocation2 + $0x4] sm:$0xf] %v5986_v17  ;;  %v7892_v12 = vpop.f32.mrf.mxu1 }
 0x1c2   : > { %v783_v19 = vsel %vm774_vm8, %v699_v45, 0.0 }
 0x1c3   : > { %v5987_v51 = vpack.c.bf16 %v783_v19, %v783_v19  ;;  %v6311_v8 = vpop.f32.mrf.mxu1 }
 0x1c5   : > { %799 = vst [vmem:[#allocation2 + $0x8] sm:$0xf] %v5987_v51  ;;  %v7894_v55 = vpop.f32.mrf.mxu1 }
 0x1c7   : > { %v6314_v57 = vpop.f32.mrf.mxu1 }
 0x1c8   : > { %v7898_v16 = vld [vmem:[#allocation2 + $0x4] sm:$0xf] }
 0x1c9   : > { %v7896_v59 = vpop.f32.mrf.mxu1 }
 0x1cb   : > { %v6315_v61 = vpop.f32.mrf.mxu1 }
 0x1cc   : > { %v2884_v6 = vld [vmem:[#allocation2 + $0x8] sm:$0xf] }
 0x1cd   : > { %v7900_v9 = vpop.f32.mrf.mxu1  ;;  %v5746_v15 = vcombine.low %v7898_v16, %v2884_v6 }
 0x1cf   : > { %v6318_v20 = vpop.f32.mrf.mxu1  ;;  %6507 = vmatmul.mubr.bf16.vlgmr.msra.gmra.mxu0 %v5746_v15 }
 0x1d0   : > { %6510 = vmatprep.mubr.msk.bf16.mxu0 %vm10640_vm3, %v10628_v27 }
 0x1d1   : > { %v7905_v11 = vpop.f32.mrf.mxu1 }
 0x1d3   : > { %v6319_v14 = vpop.f32.mrf.mxu1 }
 0x1d5   : > { %v7907_v25 = vpop.f32.mrf.mxu1 }
 0x1d7   : > { %v6322_v31 = vpop.f32.mrf.mxu1 }
 0x1d9   : > { %v7909_v32 = vpop.f32.mrf.mxu1 }
 0x1db   : > { %v6323_v34 = vpop.f32.mrf.mxu1 }
 0x1dd   : > { %v1134_v17 = vpop.f32.mrf.mxu1 }
 0x1de   : > { %v1135_v38 = vadd.f32 %v1134_v17, %v7679_v63 }
 0x1df   : > { %v6328_v45 = vpop.f32.mrf.mxu1 }
 0x1e0   : > { %v1434_v19 = vadd.f32 %v7758_v10, %v1135_v38 }
 0x1e1   : > { %v1137_v51 = vpop.f32.mrf.mxu1 }
 0x1e2   : > { %v1138_v8 = vadd.f32 %v1137_v51, %v7685_v44  ;;  %v1459_v61 = vadd.f32 %v7608_v5, %v1434_v19 }
 0x1e3   : > { %v6329_v57 = vpop.f32.mrf.mxu1 }
 0x1e4   : > { %v1435_v6 = vadd.f32 %v7766_v21, %v1138_v8  ;;  %v7918_v34 = vmax.f32 %v1459_v61, 0.0  ;;  %v7131_v21 = vld [vmem:[%s10621_s3 + $0x30] sm:$0xff]   ;;  %v7132_v8 = vld [vmem:[%s10621_s3 + $0x28] sm:$0xff]  }
 0x1e5   : > { %v1142_v15 = vpop.f32.mrf.mxu1 }
 0x1e6   : > { %v1460_v20 = vadd.f32 %v7608_v5, %v1435_v6  ;;  %v1143_v14 = vadd.f32 %v1142_v15, %v7687_v46 }
 0x1e7   : > { %v6332_v31 = vpop.f32.mrf.mxu1 }
 0x1e8   : > { %v7920_v63 = vmax.f32 %v1460_v20, 0.0  ;;  %v1436_v10 = vadd.f32 %v7773_v26, %v1143_v14 }
 0x1e9   : > { %v1145_v17 = vpop.f32.mrf.mxu1 }
 0x1ea   : > { %v1495_v44 = vpack.c.bf16 %v7920_v63, %v7918_v34  ;;  %v1146_v38 = vadd.f32 %v1145_v17, %v7693_v50  ;;  %v1461_v46 = vadd.f32 %v7608_v5, %v1436_v10 }
 0x1eb   : > { %v6333_v45 = vpop.f32.mrf.mxu1 }
 0x1ec   : > { %v1437_v19 = vadd.f32 %v7779_v30, %v1146_v38  ;;  %6417 = vmatmul.mubr.bf16.vlgmr.msra.gmra.mxu1 %v1495_v44  ;;  %v7939_v61 = vmax.f32 %v1461_v46, 0.0  ;;  %v7134_v44 = vld [vmem:[%s10621_s3 + $0x18] sm:$0xff]  }
 0x1ed   : > { %v1150_v51 = vpop.f32.mrf.mxu1  ;;  %6420 = vmatprep.mubr.msk.bf16.mxu1 %vm10640_vm3, %v10628_v27  ;;  %6471 = vmatpush3.bf16.msra.mxu1 %v7832_v22 }
 0x1ee   : > { %v1462_v26 = vadd.f32 %v7608_v5, %v1437_v19  ;;  %v1151_v50 = vadd.f32 %v1150_v51, %v7695_v3  ;;  %6472 = vmatprep.subr.bf16.mxu1 %v7131_v21  ;;  %v7133_v3 = vld [vmem:[%s10621_s3 + $0x20] sm:$0xff]  }
 0x1ef   : > { %v6336_v57 = vpop.f32.mrf.mxu1 }
 0x1f0   : > { %v7941_v30 = vmax.f32 %v1462_v26, 0.0  ;;  %v1438_v6 = vadd.f32 %v7785_v33, %v1151_v50 }
 0x1f1   : > { %v1153_v15 = vpop.f32.mrf.mxu1  ;;  %6473 = vmatpush3.bf16.msra.mxu1 %v7131_v21 }
 0x1f2   : > { %v1154_v22 = vadd.f32 %v1153_v15, %v7704_v53  ;;  %v1496_v20 = vpack.c.bf16 %v7941_v30, %v7939_v61  ;;  %6474 = vmatprep.subr.bf16.mxu1 %v7132_v8  ;;  %v1463_v31 = vadd.f32 %v7608_v5, %v1438_v6  ;;  %v7136_v6 = vld [vmem:[%s10621_s3 + $0x8] sm:$0xff]  }
 0x1f3   : > { %v6337_v14 = vpop.f32.mrf.mxu1 }
 0x1f4   : > { %v1439_v10 = vadd.f32 %v7791_v35, %v1154_v22  ;;  %6421 = vmatmul.mubr.bf16.gmra.mxu1 %v1496_v20  ;;  %v7959_v21 = vmax.f32 %v1463_v31, 0.0 }
 0x1f5   : > { %v1158_v17 = vpop.f32.mrf.mxu1  ;;  %6424 = vmatprep.mubr.msk.bf16.mxu1 %vm10640_vm3, %v10628_v27  ;;  %6475 = vmatpush3.bf16.msra.mxu1 %v7132_v8 }
 0x1f6   : > { %v1464_v53 = vadd.f32 %v7608_v5, %v1439_v10  ;;  %v1159_v33 = vadd.f32 %v1158_v17, %v7710_v56  ;;  %6476 = vmatprep.subr.bf16.mxu1 %v7133_v3  ;;  %v7135_v56 = vld [vmem:[%s10621_s3 + $0x10] sm:$0xff]  }
 0x1f7   : > { %v6340_v38 = vpop.f32.mrf.mxu1 }
 0x1f8   : > { %v7961_v45 = vmax.f32 %v1464_v53, 0.0  ;;  %v1440_v35 = vadd.f32 %v7793_v37, %v1159_v33 }
 0x1f9   : > { %v1161_v46 = vpop.f32.mrf.mxu1  ;;  %6477 = vmatpush3.bf16.msra.mxu1 %v7133_v3 }
 0x1fa   : > { %v1162_v19 = vadd.f32 %v1161_v46, %v7724_v60  ;;  %v1497_v51 = vpack.c.bf16 %v7961_v45, %v7959_v21  ;;  %6478 = vmatprep.subr.bf16.mxu1 %v7134_v44  ;;  %v1465_v50 = vadd.f32 %v7608_v5, %v1440_v35 }
 0x1fb   : > { %v6341_v26 = vpop.f32.mrf.mxu1 }
 0x1fc   : > { %v1441_v8 = vadd.f32 %v7798_v40, %v1162_v19  ;;  %6425 = vmatmul.mubr.bf16.gmra.mxu1 %v1497_v51  ;;  %v7979_v22 = vmax.f32 %v1465_v50, 0.0 }
 0x1fd   : > { %v1166_v57 = vpop.f32.mrf.mxu1  ;;  %6428 = vmatprep.mubr.msk.bf16.mxu1 %vm10640_vm3, %v10628_v27  ;;  %6479 = vmatpush3.bf16.msra.mxu1 %v7134_v44 }
 0x1fe   : > { %v1466_v60 = vadd.f32 %v7608_v5, %v1441_v8  ;;  %v1167_v37 = vadd.f32 %v1166_v57, %v7734_v62  ;;  %6480 = vmatprep.subr.bf16.mxu1 %v7135_v56  ;;  %v7137_v62 = vld [vmem:[%s10621_s3] sm:$0xff]  }
 0x1ff   : > { %v6344_v15 = vpop.f32.mrf.mxu1 }
 0x200   : > { %v7981_v20 = vmax.f32 %v1466_v60, 0.0  ;;  %v1442_v40 = vadd.f32 %v7800_v42, %v1167_v37 }
 0x201   : > { %v1169_v3 = vpop.f32.mrf.mxu1  ;;  %6481 = vmatpush3.bf16.msra.mxu1 %v7135_v56 }
 0x202   : > { %10673 = vst [vmem:[#allocation3_spill] sm:$0xff] %v7981_v20  ;;  %v1170_v14 = vadd.f32 %v1169_v3, %v7751_v4  ;;  %v1498_v31 = vpack.c.bf16 %v7981_v20, %v7979_v22  ;;  %6482 = vmatprep.subr.bf16.mxu1 %v7136_v6  ;;  %v1467_v17 = vadd.f32 %v7608_v5, %v1442_v40 }
 0x203   : > { %v6345_v10 = vpop.f32.mrf.mxu1 }
 0x204   : > { %v1443_v53 = vadd.f32 %v7802_v49, %v1170_v14  ;;  %6429 = vmatmul.mubr.bf16.gmra.mxu1 %v1498_v31  ;;  %v7996_v38 = vmax.f32 %v1467_v17, 0.0 }
 0x205   : > { %v1174_v33 = vpop.f32.mrf.mxu1  ;;  %6432 = vmatprep.mubr.msk.bf16.mxu1 %vm10640_vm3, %v10628_v27  ;;  %6483 = vmatpush3.bf16.msra.mxu1 %v7136_v6 }
 0x206   : > { %v1468_v4 = vadd.f32 %v7608_v5, %v1443_v53  ;;  %v1175_v42 = vadd.f32 %v1174_v33, %v7888_v28  ;;  %6484 = vmatprep.subr.bf16.mxu1 %v7137_v62  ;;  %10674 = vst [vmem:[#allocation4_spill] sm:$0xff] %v7996_v38 }
 0x207   : > { %v6348_v44 = vpop.f32.mrf.mxu1 }
 0x208   : > { %v7998_v35 = vmax.f32 %v1468_v4, 0.0  ;;  %v1444_v46 = vadd.f32 %v7804_v52, %v1175_v42  ;;  %v2624_v42 = vpop.f32.mrf.mxu0 }
 0x209   : > { %v1177_v19 = vpop.f32.mrf.mxu1  ;;  %6485 = vmatpush3.bf16.msra.mxu1 %v7137_v62 }
 0x20a   : > { %10675 = vst [vmem:[#allocation5_spill] sm:$0xff] %v7998_v35  ;;  %v1178_v49 = vadd.f32 %v1177_v19, %v7892_v12  ;;  %v1499_v51 = vpack.c.bf16 %v7998_v35, %v7996_v38  ;;  %6542 = vmatprep.subr.bf16.mxu1 %v10628_v27  ;;  %v1469_v28 = vadd.f32 %v7608_v5, %v1444_v46 }
 0x20b   : > { %v6349_v56 = vpop.f32.mrf.mxu1 }
 0x20c   : > { %v1445_v26 = vadd.f32 %v7806_v54, %v1178_v49  ;;  %6433 = vmatmul.mubr.bf16.gmra.mxu1 %v1499_v51  ;;  %v8011_v57 = vmax.f32 %v1469_v28, 0.0 }
 0x20d   : > { %v1182_v50 = vpop.f32.mrf.mxu1  ;;  %6436 = vmatprep.mubr.msk.bf16.mxu1 %vm10640_vm3, %v10628_v27 }
 0x20e   : > { %v1470_v52 = vadd.f32 %v7608_v5, %v1445_v26  ;;  %v1183_v8 = vadd.f32 %v1182_v50, %v7894_v55  ;;  %10676 = vst [vmem:[#allocation6_spill] sm:$0xff] %v8011_v57 }
 0x20f   : > { %v6352_v12 = vpop.f32.mrf.mxu1 }
 0x210   : > { %v8013_v60 = vmax.f32 %v1470_v52, 0.0  ;;  %v1446_v37 = vadd.f32 %v7808_v13, %v1183_v8 }
 0x211   : > { %v1185_v6 = vpop.f32.mrf.mxu1 }
 0x212   : > { %10677 = vst [vmem:[#allocation7_spill] sm:$0xff] %v8013_v60  ;;  %v1186_v15 = vadd.f32 %v1185_v6, %v7896_v59  ;;  %v1500_v54 = vpack.c.bf16 %v8013_v60, %v8011_v57  ;;  %v1471_v3 = vadd.f32 %v7608_v5, %v1446_v37 }
 0x213   : > { %v6353_v40 = vpop.f32.mrf.mxu1 }
 0x214   : > { %v1447_v14 = vadd.f32 %v7810_v58, %v1186_v15  ;;  %6437 = vmatmul.mubr.bf16.gmra.mxu1 %v1500_v54  ;;  %v8025_v10 = vmax.f32 %v1471_v3, 0.0  ;;  %v2547_v58 = vadd.f32 %v7852_v47, %v7847_v36  ;;  %v5717_v47 = vld [vmem:[%s10620_s2] ss:$0 sm:$0xff] }
 0x215   : > { %v1190_v55 = vpop.f32.mrf.mxu1  ;;  %6440 = vmatprep.mubr.msk.bf16.mxu1 %vm10640_vm3, %v10628_v27  ;;  %v8050_v26 = vadd.f32 %v5717_v47, %v7858_v24  ;;  %v2647_v54 = vadd.f32 %v5717_v47, %v7856_v23  ;;  %v7139_v23 = vld [vmem:[%s10623_s5 + $0x30] sm:$0xff]  }
 0x216   : > { %v1472_v31 = vadd.f32 %v7608_v5, %v1447_v14  ;;  %v1191_v13 = vadd.f32 %v1190_v55, %v7900_v9  ;;  %10678 = vst [vmem:[#allocation8_spill] sm:$0xff] %v8025_v10  ;;  %v7138_v14 = vld [vmem:[%s10623_s5 + $0x38] sm:$0xff]   ;;  %v7140_v55 = vld [vmem:[%s10623_s5 + $0x28] sm:$0xff]  }
 0x217   : > { %v6356_v62 = vpop.f32.mrf.mxu1  ;;  %10682 = vst [vmem:[#allocation12_spill] sm:$0xff] %v8050_v26  ;;  %v10627_v6 = vmax.f32 %v8050_v26, 0.0  ;;  %v8075_v3 = vmax.f32 %v2647_v54, 0.0 }
 0x218   : > { %v8027_v59 = vmax.f32 %v1472_v31, 0.0  ;;  %v1448_v17 = vadd.f32 %v7812_v18, %v1191_v13  ;;  %v2636_v18 = vadd.f32 %v2624_v42, %v2547_v58  ;;  %v7141_v31 = vld [vmem:[%s10623_s5 + $0x20] sm:$0xff]   ;;  %v7142_v13 = vld [vmem:[%s10623_s5 + $0x18] sm:$0xff]   ;;  %v7143_v62 = vld [vmem:[%s10623_s5 + $0x10] sm:$0xff]  }
 0x219   : > { %v1193_v53 = vpop.f32.mrf.mxu1  ;;  %10686 = vst [vmem:[#allocation16_spill] sm:$0xff] %v8075_v3  ;;  %v7146_v58 = vld [vmem:[%s10623_s5] sm:$0xff]  }
 0x21a   : > { %10679 = vst [vmem:[#allocation9_spill] sm:$0xff] %v8027_v59  ;;  %v1194_v33 = vadd.f32 %v1193_v53, %v7905_v11  ;;  %v1501_v4 = vpack.c.bf16 %v8027_v59, %v8025_v10  ;;  %v1473_v9 = vadd.f32 %v7608_v5, %v1448_v17  ;;  %v8052_v50 = vadd.f32 %v5717_v47, %v2636_v18  ;;  %v7144_v17 = vld [vmem:[%s10623_s5 + $0xb8] sm:$0xff]   ;;  %v7145_v53 = vld [vmem:[%s10623_s5 + $0x8] sm:$0xff]   ;;  %v7154_v42 = vld [vmem:[%s10623_s5 + $0xa0] sm:$0xff]  }
 0x21b   : > { %v6357_v44 = vpop.f32.mrf.mxu1  ;;  %6595 = vmatpush3.bf16.msra.mxu0 %v7144_v17  ;;  %v7160_v18 = vld [vmem:[%s10623_s5 + $0x90] sm:$0xff]   ;;  %v7164_v47 = vld [vmem:[%s10623_s5 + $0x88] sm:$0xff]  }
 0x21c   : > { %v1449_v46 = vadd.f32 %v7814_v0, %v1194_v33  ;;  %6441 = vmatmul.mubr.bf16.gmra.mxu1 %v1501_v4  ;;  %v8044_v51 = vmax.f32 %v1473_v9, 0.0  ;;  %10683 = vst [vmem:[#allocation13_spill] sm:$0xff] %v8052_v50  ;;  %6596 = vmatprep.subr.bf16.mxu0 %v10628_v27  ;;  %v7148_v33 = vld [vmem:[%s10623_s5 + $0xb0] sm:$0xff]   ;;  %v7151_v4 = vld [vmem:[%s10623_s5 + $0xa8] sm:$0xff]   ;;  %v7157_v44 = vld [vmem:[%s10623_s5 + $0x98] sm:$0xff]   ;;  %v8134_v9 = vadd.s32 18, %v7816_v43 }
 0x21d   : > { %v1198_v19 = vpop.f32.mrf.mxu1  ;;  %6444 = vmatprep.mubr.msk.bf16.mxu1 %vm10640_vm3, %v10628_v27 }
 0x21e   : > { %v1474_v49 = vadd.f32 %v7608_v5, %v1449_v46  ;;  %v1199_v36 = vadd.f32 %v1198_v19, %v7907_v25  ;;  %10680 = vst [vmem:[#allocation10_spill] sm:$0xff] %v8044_v51  ;;  %v8137_v46 = vmul.u32.u64.low 3817748708, %v8134_v9  ;;  %v8138_v19 = vmul.u32.u64.high 3817748708, %v8134_v9, %v8137_v46 }
 0x21f   : > { %v6360_v11 = vpop.f32.mrf.mxu1  ;;  %6597 = vmatpush3.bf16.msra.mxu0 %v7148_v33  ;;  %vm2091_vm7 = vcmp.ge.s32.totalorder %v8134_v9, %v7861_v48 }
 0x220   : > { %v8046_v56 = vmax.f32 %v1474_v49, 0.0  ;;  %v1450_v0 = vadd.f32 %v7818_v1, %v1199_v36  ;;  %v10626_v1 = vmax.f32 %v8052_v50, 0.0  ;;  %6598 = vmatprep.subr.bf16.mxu0 %v10628_v27  ;;  %v8144_v49 = vadd.s32 18, %v7840_v29 }
 0x221   : > { %v1201_v28 = vpop.f32.mrf.mxu1  ;;  %v8148_v36 = vadd.s32 18, %v7821_v2 }
 0x222   : > { %10681 = vst [vmem:[#allocation11_spill] sm:$0xff] %v8046_v56  ;;  %v1202_v52 = vadd.f32 %v1201_v28, %v7909_v32  ;;  %v1502_v25 = vpack.c.bf16 %v8046_v56, %v8044_v51  ;;  %v1475_v12 = vadd.f32 %v7608_v5, %v1450_v0  ;;  %v1755_v28 = vshrl.u32 %v8138_v19, 4 }
 0x223   : > { %v6361_v8 = vpop.f32.mrf.mxu1  ;;  %6599 = vmatpush3.bf16.msra.mxu0 %v7151_v4  ;;  %v8154_v11 = vmul.u32.u64.low 3817748708, %v8144_v49  ;;  %v8155_v0 = vmul.u32.u64.high 3817748708, %v8144_v49, %v8154_v11 }
 0x224   : > { %v1451_v37 = vadd.f32 %v7823_v7, %v1202_v52  ;;  %6445 = vmatmul.mubr.bf16.gmra.mxu1 %v1502_v25  ;;  %v8064_v15 = vmax.f32 %v1475_v12, 0.0  ;;  %v2651_v7 = vpack.c.bf16 %v10626_v1, %v10627_v6  ;;  %6600 = vmatprep.subr.bf16.mxu0 %v10628_v27  ;;  %v1716_v52 = vadd.s32 24, %v7816_v43  ;;  %v7169_v12 = vld [vmem:[%s10623_s5 + $0x80] sm:$0xff]  }
 0x225   : > { %6448 = vmatprep.mubr.msk.bf16.mxu1 %vm10640_vm3, %v10628_v27  ;;  %v8160_v25 = vmul.u32.u64.low 3817748708, %v8148_v36  ;;  %v8161_v8 = vmul.u32.u64.high 3817748708, %v8148_v36, %v8160_v25  ;;  %v8237_v6 = vld [vmem:[#allocation2 + $0x4] sm:$0xff]  }
 0x226   : > { %v1476_v24 = vadd.f32 %v7608_v5, %v1451_v37  ;;  %10684 = vst [vmem:[#allocation14_spill] sm:$0xff] %v8064_v15  ;;  %v2652_v5 = vpack.c.bf16 %v8075_v3, %v8075_v3  ;;  %v2882_v37 = vld [vmem:[#allocation2] sm:$0x8]  ;;  %v8167_v54 = vadd.s32 18, %v1716_v52  ;;  %v1723_v25 = vadd.s32 80, %v7816_v43  ;;  %10690 = vst [vmem:[#allocation20_spill] sm:$0xff] %v8237_v6 }
 0x227   : > { %6601 = vmatpush3.bf16.msra.mxu0 %v7154_v42 }
 0x228   : > { %v8066_v32 = vmax.f32 %v1476_v24, 0.0  ;;  %6602 = vmatprep.subr.bf16.mxu0 %v10628_v27  ;;  %v1756_v24 = vmul.u32 18, %v1755_v28 }
 0x22a   : > { %10685 = vst [vmem:[#allocation15_spill] sm:$0xff] %v8066_v32  ;;  %v1503_v40 = vpack.c.bf16 %v8066_v32, %v8064_v15 }
 0x22b   : > { %6603 = vmatpush3.bf16.msra.mxu0 %v7157_v44  ;;  %v1721_v44 = vadd.s32 64, %v7816_v43 }
 0x22c   : > { %6449 = vmatmul.mubr.bf16.gmra.mxu1 %v1503_v40  ;;  %6604 = vmatprep.subr.bf16.mxu0 %v10628_v27  ;;  %v5763_v40 = vcombine.low %v2882_v37, %v7898_v16 }
 0x22d   : > { %6486 = vmatprep.mubr.bf16.mxu1 %v2651_v7  ;;  %v1717_v7 = vadd.s32 32, %v7816_v43 }
 0x22e   : > { %v3155_v33 = vshrl.u32 %v5763_v40, 16  ;;  %v3158_v52 = vshll.u32 %v5763_v40, 16  ;;  %v8213_v40 = vadd.s32 18, %v1721_v44 }
 0x22f   : > { %6605 = vmatpush3.bf16.msra.mxu0 %v7160_v18  ;;  %v8181_v17 = vadd.s32 18, %v1717_v7 }
 0x230   : > { %6606 = vmatprep.subr.bf16.mxu0 %v10628_v27 }
 0x231   : > { %v8190_v46 = vmul.u32.u64.low 3817748708, %v8181_v17  ;;  %v8191_v19 = vmul.u32.u64.high 3817748708, %v8181_v17, %v8190_v46 }
 0x232   : > { %v8225_v46 = vadd.s32 18, %v1723_v25 }
 0x233   : > { %6607 = vmatpush3.bf16.msra.mxu0 %v7164_v47  ;;  %v1722_v47 = vadd.s32 72, %v7816_v43 }
 0x234   : > { %6487 = vmatmul.mubr.bf16.vlgmr.msra.gmra.mxu1 %v2652_v5  ;;  %6608 = vmatprep.subr.bf16.mxu0 %v10628_v27  ;;  %v1766_v5 = vshrl.u32 %v8155_v0, 4 }
 0x235   : > { %6543 = vmatpush3.bf16.msra.mxu1 %v7138_v14  ;;  %6558 = vmatprep.mubr.msk.bf16.mxu1 %vm10640_vm3, %v10628_v27  ;;  %v1757_v14 = vsub.s32 %v8134_v9, %v1756_v24  ;;  %v1724_v24 = vadd.s32 88, %v7816_v43 }
 0x236   : > { %6544 = vmatprep.subr.bf16.mxu1 %v10628_v27 }
 0x237   : > { %6609 = vmatpush3.bf16.msra.mxu0 %v7169_v12  ;;  %vm1947_vm9 = vcmp.ne.s32.totalorder %v1757_v14, 0  ;;  %vm1965_vm10 = vcmp.lt.s32.totalorder %v1757_v14, 0  ;;  %v2001_v0 = vadd.s32 18, %v1757_v14  ;;  %v8231_v44 = vadd.s32 18, %v1724_v24 }
 0x238   : > { %6698 = vmatprep.subr.bf16.mxu0 %v10628_v27  ;;  %vm1983_vm11 = vmand %vm1965_vm10, %vm1947_vm9  ;;  %v1725_v24 = vadd.s32 96, %v7816_v43  ;;  %vm2092_vm9 = vcmp.ge.s32.totalorder %v8144_v49, %v7861_v48 }
 0x239   : > { %6545 = vmatpush3.bf16.msra.mxu1 %v7139_v23 }
 0x23a   : > { %6546 = vmatprep.subr.bf16.mxu1 %v10628_v27 }
 0x23d   : > { %6547 = vmatpush3.bf16.msra.mxu1 %v7140_v55  ;;  %v8175_v23 = vmul.u32.u64.low 3817748708, %v8167_v54  ;;  %v8176_v55 = vmul.u32.u64.high 3817748708, %v8167_v54, %v8175_v23 }
 0x23e   : > { %6548 = vmatprep.subr.bf16.mxu1 %v10628_v27 }
 0x241   : > { %6549 = vmatpush3.bf16.msra.mxu1 %v7141_v31  ;;  %v1718_v31 = vadd.s32 40, %v7816_v43 }
 0x242   : > { %6550 = vmatprep.subr.bf16.mxu1 %v10628_v27 }
 0x243   : > { %v8184_v16 = vadd.s32 18, %v1718_v31 }
 0x245   : > { %6551 = vmatpush3.bf16.msra.mxu1 %v7142_v13  ;;  %v1777_v13 = vshrl.u32 %v8161_v8, 4  ;;  %v1788_v8 = vshrl.u32 %v8176_v55, 4  ;;  %v8202_v12 = vmul.u32.u64.low 3817748708, %v8184_v16  ;;  %v8203_v37 = vmul.u32.u64.high 3817748708, %v8184_v16, %v8202_v12 }
 0x246   : > { %6552 = vmatprep.subr.bf16.mxu1 %v10628_v27 }
 0x247   : > { %v1778_v4 = vmul.u32 18, %v1777_v13  ;;  %v1789_v12 = vmul.u32 18, %v1788_v8 }
 0x248   : > { %v8245_v25 = vmul.u32.u64.low 3817748708, %v8225_v46  ;;  %v8246_v8 = vmul.u32.u64.high 3817748708, %v8225_v46, %v8245_v25 }
 0x249   : > { %6553 = vmatpush3.bf16.msra.mxu1 %v7143_v62  ;;  %v1719_v62 = vadd.s32 48, %v7816_v43 }
 0x24a   : > { %6554 = vmatprep.subr.bf16.mxu1 %v10628_v27  ;;  %v1865_v32 = vshrl.u32 %v8246_v8, 4 }
 0x24b   : > { %v8186_v42 = vadd.s32 18, %v1719_v62  ;;  %v8219_v62 = vadd.s32 18, %v1722_v47 }
 0x24d   : > { %6555 = vmatpush3.bf16.msra.mxu1 %v7145_v53  ;;  %v1720_v53 = vadd.s32 56, %v7816_v43  ;;  %v8210_v23 = vmul.u32.u64.low 3817748708, %v8186_v42  ;;  %v8211_v31 = vmul.u32.u64.high 3817748708, %v8186_v42, %v8210_v23 }
 0x24e   : > { %6556 = vmatprep.subr.bf16.mxu1 %v10628_v27 }
 0x24f   : > { %v8193_v18 = vadd.s32 18, %v1720_v53 }
 0x251   : > { %6557 = vmatpush3.bf16.msra.mxu1 %v7146_v58  ;;  %v1767_v58 = vmul.u32 18, %v1766_v5  ;;  %v1779_v5 = vsub.s32 %v8148_v36, %v1778_v4  ;;  %v8216_v55 = vmul.u32.u64.low 3817748708, %v8193_v18  ;;  %v8217_v13 = vmul.u32.u64.high 3817748708, %v8193_v18, %v8216_v55 }
 0x252   : > { %6646 = vmatprep.subr.bf16.mxu1 %v10628_v27  ;;  %v8227_v4 = vsel %vm1983_vm11, %v2001_v0, %v1757_v14  ;;  %v8234_v47 = vmul.u32.u64.low 3817748708, %v8213_v40  ;;  %v8235_v55 = vmul.u32.u64.high 3817748708, %v8213_v40, %v8234_v47 }
 0x253   : > { %v1768_v28 = vsub.s32 %v8144_v49, %v1767_v58  ;;  %v8223_v58 = vrot.slane %v3155_v33, 3  ;;  %vm1949_vm14 = vcmp.ne.s32.totalorder %v1779_v5, 0  ;;  %vm1967_vm2 = vcmp.lt.s32.totalorder %v1779_v5, 0 }
 0x254   : > { %v1799_v33 = vshrl.u32 %v8191_v19, 4  ;;  %v8241_v14 = vmul.u32.u64.low 3817748708, %v8219_v62  ;;  %v8242_v0 = vmul.u32.u64.high 3817748708, %v8219_v62, %v8241_v14  ;;  %vm8256_vm4 = vmand %vm1967_vm2, %vm1949_vm14  ;;  %vm2037_vm5 = vcmp.ge.s32.totalorder %v8227_v4, 1 }
 0x255   : > { %vm1948_vm12 = vcmp.ne.s32.totalorder %v1768_v28, 0  ;;  %vm1966_vm13 = vcmp.lt.s32.totalorder %v1768_v28, 0  ;;  %10689 = vst [vmem:[#allocation19_spill] sm:$0xff] %v8223_v58  ;;  %v2002_v1 = vadd.s32 18, %v1768_v28  ;;  %v1810_v14 = vshrl.u32 %v8203_v37, 4 }
 0x256   : > { %vm1984_vm15 = vmand %vm1966_vm13, %vm1948_vm12  ;;  %v8251_v47 = vmul.u32.u64.low 3817748708, %v8231_v44  ;;  %v8252_v27 = vmul.u32.u64.high 3817748708, %v8231_v44, %v8251_v47  ;;  %v1832_v26 = vshrl.u32 %v8217_v13, 4  ;;  %vm2055_vm6 = vcmp.lt.s32.totalorder %v8227_v4, 17 }
 0x257   : > { %v2020_v19 = vsel %vm1984_vm15, %v2002_v1, %v1768_v28  ;;  %v1821_v47 = vshrl.u32 %v8211_v31, 4  ;;  %v8270_v1 = vadd.s32 18, %v1725_v24  ;;  %v1727_v28 = vadd.s32 112, %v7816_v43  ;;  %vm8304_vm15 = vmand %vm2037_vm5, %vm2055_vm6 }
 0x258   : > { %vm2038_vm8 = vcmp.ge.s32.totalorder %v2020_v19, 1  ;;  %v1843_v50 = vshrl.u32 %v8235_v55, 4  ;;  %v1833_v3 = vmul.u32 18, %v1832_v26  ;;  %v1854_v6 = vshrl.u32 %v8242_v0, 4  ;;  %vm8332_vm6 = vmand %vm8304_vm15, %vm2091_vm7 }
 0x259   : > { %v1822_v25 = vmul.u32 18, %v1821_v47  ;;  %v1728_v55 = vadd.s32 120, %v7816_v43  ;;  %vm2056_vm12 = vcmp.lt.s32.totalorder %v2020_v19, 17  ;;  %v1866_v47 = vmul.u32 18, %v1865_v32 }
 0x25a   : > { %v1844_v0 = vmul.u32 18, %v1843_v50  ;;  %v1855_v8 = vmul.u32 18, %v1854_v6 }
 0x28f   : > { %v8196_v11 = vpop.f32.mrf.mxu0 }
 0x290   : > { %10687 = vst [vmem:[#allocation17_spill] sm:$0xff] %v8196_v11  ;;  %v8284_v15 = vmul.u32.u64.low 3817748708, %v8270_v1  ;;  %v8285_v11 = vmul.u32.u64.high 3817748708, %v8270_v1, %v8284_v15 }
 0x291   : > { %v6508_v7 = vpop.f32.mrf.mxu0  ;;  %v8309_v15 = vsub.s32 %v8186_v42, %v1822_v25 }
 0x292   : > { %v8229_v7 = vrot.slane %v3158_v52, 4  ;;  %v2003_v52 = vadd.s32 18, %v1779_v5 }
 0x293   : > { %v8221_v53 = vpop.f32.mrf.mxu0  ;;  %vm1953_vm15 = vcmp.ne.s32.totalorder %v8309_v15, 0  ;;  %vm1971_vm0 = vcmp.lt.s32.totalorder %v8309_v15, 0 }
 0x294   : > { %10688 = vst [vmem:[#allocation18_spill] sm:$0xff] %v8221_v53  ;;  %v1726_v53 = vadd.s32 104, %v7816_v43  ;;  %v2021_v37 = vsel %vm8256_vm4, %v2003_v52, %v1779_v5  ;;  %v8287_v5 = vadd.s32 18, %v1727_v28 }
 0x295   : > { %v6509_v23 = vpop.f32.mrf.mxu0  ;;  %vm2039_vm13 = vcmp.ge.s32.totalorder %v2021_v37, 1  ;;  %vm2057_vm5 = vcmp.lt.s32.totalorder %v2021_v37, 17 }
 0x296   : > { %v1790_v23 = vsub.s32 %v8167_v54, %v1789_v12  ;;  %v1800_v12 = vmul.u32 18, %v1799_v33  ;;  %v8277_v31 = vadd.s32 18, %v1726_v53  ;;  %v1811_v33 = vmul.u32 18, %v1810_v14 }
 0x297   : > { %v1876_v53 = vshrl.u32 %v8252_v27, 4  ;;  %v8315_v50 = vmul.u32.u64.low 3817748708, %v8287_v5  ;;  %v8316_v28 = vmul.u32.u64.high 3817748708, %v8287_v5, %v8315_v50  ;;  %v1730_v27 = vadd.s32 136, %v7816_v43 }
 0x298   : > { %vm1950_vm10 = vcmp.ne.s32.totalorder %v1790_v23, 0  ;;  %vm1968_vm11 = vcmp.lt.s32.totalorder %v1790_v23, 0  ;;  %v2004_v13 = vadd.s32 18, %v1790_v23  ;;  %v1801_v24 = vsub.s32 %v8181_v17, %v1800_v12 }
 0x299   : > { %v8291_v52 = vmul.u32.u64.low 3817748708, %v8277_v31  ;;  %v8292_v14 = vmul.u32.u64.high 3817748708, %v8277_v31, %v8291_v52  ;;  %vm1986_vm14 = vmand %vm1968_vm11, %vm1950_vm10  ;;  %v8298_v26 = vsub.s32 %v8184_v16, %v1811_v33  ;;  %v8312_v12 = vsub.s32 %v8193_v18, %v1833_v3 }
 0x29a   : > { %vm1951_vm2 = vcmp.ne.s32.totalorder %v1801_v24, 0  ;;  %vm1969_vm4 = vcmp.lt.s32.totalorder %v1801_v24, 0  ;;  %vm8319_vm10 = vmand %vm2038_vm8, %vm2056_vm12  ;;  %v8323_v33 = vsel %vm1986_vm14, %v2004_v13, %v1790_v23  ;;  %v1877_v25 = vmul.u32 18, %v1876_v53 }
 0x29b   : > { %v8325_v52 = vadd.s32 18, %v1728_v55  ;;  %v2005_v32 = vadd.s32 18, %v1801_v24  ;;  %vm1952_vm11 = vcmp.ne.s32.totalorder %v8298_v26, 0  ;;  %vm1970_vm12 = vcmp.lt.s32.totalorder %v8298_v26, 0  ;;  %vm8347_vm7 = vmand %vm1969_vm4, %vm1951_vm2 }
 0x29c   : > { %v8341_v3 = vsub.s32 %v8213_v40, %v1844_v0  ;;  %v2006_v19 = vadd.s32 18, %v8298_v26  ;;  %v8355_v13 = vsub.s32 %v8219_v62, %v1855_v8  ;;  %vm8363_vm1 = vmand %vm8319_vm10, %vm2092_vm9  ;;  %vm1954_vm4 = vcmp.ne.s32.totalorder %v8312_v12, 0 }
 0x29d   : > { %vm1972_vm3 = vcmp.lt.s32.totalorder %v8312_v12, 0  ;;  %v8372_v55 = vsub.s32 %v8225_v46, %v1866_v47  ;;  %v1887_v0 = vshrl.u32 %v8285_v11, 4  ;;  %vm8378_vm14 = vmand %vm2039_vm13, %vm2057_vm5  ;;  %v8385_v8 = vsub.s32 %v8231_v44, %v1877_v25 }
 0x29e   : > { %v1898_v50 = vshrl.u32 %v8292_v14, 4  ;;  %v8389_v47 = vmul.u32.u64.low 3817748708, %v8325_v52  ;;  %v8390_v4 = vmul.u32.u64.high 3817748708, %v8325_v52, %v8389_v47  ;;  %v8394_v37 = vsel %vm8347_vm7, %v2005_v32, %v1801_v24  ;;  %vm8400_vm13 = vmand %vm1970_vm12, %vm1952_vm11 }
 0x29f   : > { %vm1955_vm5 = vcmp.ne.s32.totalorder %v8341_v3, 0  ;;  %vm1973_vm9 = vcmp.lt.s32.totalorder %v8341_v3, 0  ;;  %v1729_v14 = vadd.s32 128, %v7816_v43  ;;  %vm8413_vm7 = vmand %vm1971_vm0, %vm1953_vm15  ;;  %v2007_v25 = vadd.s32 18, %v8309_v15 }
 0x2a0   : > { %v2008_v32 = vadd.s32 18, %v8312_v12  ;;  %vm1956_vm11 = vcmp.ne.s32.totalorder %v8355_v13, 0  ;;  %vm1974_vm12 = vcmp.lt.s32.totalorder %v8355_v13, 0  ;;  %vm8427_vm2 = vmand %vm1972_vm3, %vm1954_vm4  ;;  %v2009_v47 = vadd.s32 18, %v8341_v3 }
 0x2a1   : > { %vm1957_vm0 = vcmp.ne.s32.totalorder %v8372_v55, 0  ;;  %v1909_v56 = vshrl.u32 %v8316_v28, 4  ;;  %vm8443_vm3 = vmand %vm1973_vm9, %vm1955_vm5  ;;  %vm1958_vm4 = vcmp.ne.s32.totalorder %v8385_v8, 0  ;;  %vm1976_vm8 = vcmp.lt.s32.totalorder %v8385_v8, 0 }
 0x2a2   : > { %v1888_v10 = vmul.u32 18, %v1887_v0  ;;  %v1899_v60 = vmul.u32 18, %v1898_v50  ;;  %vm2041_vm10 = vcmp.ge.s32.totalorder %v8394_v37, 1  ;;  %vm2059_vm15 = vcmp.lt.s32.totalorder %v8394_v37, 17  ;;  %vm8456_vm9 = vmand %vm1974_vm12, %vm1956_vm11 }
 0x2a3   : > { %v8460_v35 = vadd.s32 18, %v1729_v14  ;;  %vm2130_vm5 = vcmp.lt.s32.totalorder %v8167_v54, %v7865_v39  ;;  %v2010_v0 = vadd.s32 18, %v8355_v13  ;;  %vm10715_vm11 = vcmp.lt.s32.totalorder %v8372_v55, 0 }
 0x2a4   : > { %vm8474_vm12 = vmand %vm10715_vm11, %vm1957_vm0  ;;  %v2012_v14 = vadd.s32 18, %v8385_v8  ;;  %v1910_v58 = vmul.u32 18, %v1909_v56  ;;  %vm10720_vm0 = vcmp.lt.s32.totalorder %v8134_v9, %v7865_v39  ;;  %v8513_v24 = vsel %vm8443_vm3, %v2009_v47, %v8341_v3 }
 0x2a5   : > { %v8516_v56 = vsub.s32 %v8270_v1, %v1888_v10  ;;  %v8519_v9 = vsub.s32 %v8277_v31, %v1899_v60  ;;  %v1920_v6 = vshrl.u32 %v8390_v4, 4  ;;  %vm10726_vm3 = vcmp.ge.s32.totalorder %v8148_v36, %v7861_v48 }
 0x2a6   : > { %v8534_v10 = vmul.u32.u64.low 3817748708, %v8460_v35  ;;  %v8535_v3 = vmul.u32.u64.high 3817748708, %v8460_v35, %v8534_v10  ;;  %v8556_v60 = vsel %vm8456_vm9, %v2010_v0, %v8355_v13  ;;  %vm10730_vm9 = vcmp.ge.s32.totalorder %v8323_v33, 1 }
 0x2ac   : > { %v1609_v51 = vpop.f32.mrf.mxu1 }
 0x2ad   : > { %v1610_v28 = vadd.f32 %v7870_v41, %v1609_v51  ;;  %v8467_v51 = vsel %vm8400_vm13, %v2006_v19, %v8298_v26  ;;  %v8484_v26 = vsel %vm8413_vm7, %v2007_v25, %v8309_v15  ;;  %v8489_v19 = vsel %vm8427_vm2, %v2008_v32, %v8312_v12  ;;  %vm8495_vm13 = vmand %vm1976_vm8, %vm1958_vm4 }
 0x2ae   : > { %v6418_v38 = vpop.f32.mrf.mxu1  ;;  %vm8504_vm7 = vmand %vm8332_vm6, %vm10720_vm0  ;;  %vm2095_vm2 = vcmp.ge.s32.totalorder %v8181_v17, %v7861_v48  ;;  %vm10723_vm6 = vcmp.lt.s32.totalorder %v8144_v49, %v7865_v39  ;;  %v8566_v53 = vsel %vm8495_vm13, %v2012_v14, %v8385_v8  ;;  %v8583_v8 = vsub.s32 %v8287_v5, %v1910_v58 }
 0x2af   : > { %v2011_v38 = vadd.s32 18, %v8372_v55  ;;  %v1680_v20 = vmax.f32 %v1610_v28, 0.0  ;;  %vm8529_vm8 = vmand %vm8363_vm1, %vm10723_vm6  ;;  %vm10733_vm0 = vcmask 1044484   ;;  %vm1977_vm1 = vcmp.lt.s32.totalorder %v8516_v56, 0  ;;  %v8601_v28 = vld [vmem:[%s10622_s4] ss:$0 sm:$0xff] }
 0x2b0   : > { %v1612_v12 = vpop.f32.mrf.mxu1  ;;  %vm8547_vm4 = vmand %vm8378_vm14, %vm10726_vm3  ;;  %vm10729_vm14 = vcmp.lt.s32.totalorder %v8323_v33, 17  ;;  %v2013_v33 = vadd.s32 18, %v8516_v56  ;;  %vm10740_vm13 = vcmp.ge.s32.totalorder %v8167_v54, %v7861_v48  ;;  %vm1978_vm3 = vcmp.lt.s32.totalorder %v8519_v9, 0 }
 0x2b1   : > { %v1698_v25 = vadd.f32 %v1680_v20, %v7918_v34  ;;  %v1613_v32 = vadd.f32 %v7870_v41, %v1612_v12  ;;  %v8561_v49 = vsel %vm8474_vm12, %v2011_v38, %v8372_v55  ;;  %vm8576_vm12 = vmand %vm10730_vm9, %vm10729_vm14  ;;  %vm1959_vm9 = vcmp.ne.s32.totalorder %v8516_v56, 0 }
 0x2b2   : > { %v6419_v20 = vpop.f32.mrf.mxu1  ;;  %vm1960_vm14 = vcmp.ne.s32.totalorder %v8519_v9, 0  ;;  %v1921_v38 = vmul.u32 18, %v1920_v6  ;;  %vm8621_vm11 = vmand %vm8576_vm12, %vm10740_vm13  ;;  %v2014_v15 = vadd.s32 18, %v8519_v9  ;;  %v8629_v12 = vadd.s32 18, %v1730_v27 }
 0x2b3   : > { %v2199_v4 = vsel %vm8504_vm7, %v1698_v25, 0.0  ;;  %v2365_v57 = vadd.f32 %v1698_v25, %v7918_v34  ;;  %v1681_v13 = vmax.f32 %v1613_v32, 0.0  ;;  %vm10734_vm7 = vcmask 1040384   ;;  %vm8638_vm12 = vmand %vm2041_vm10, %vm2059_vm15 }
 0x2b4   : > { %v5989_v23 = vpack.c.bf16 %v2199_v4, %v2199_v4  ;;  %vm8587_vm6 = vmor %vm10734_vm7, %vm10733_vm0  ;;  %v1617_v47 = vpop.f32.mrf.mxu1  ;;  %vm10737_vm0 = vcmp.lt.s32.totalorder %v8148_v36, %v7865_v39  ;;  %vm2097_vm13 = vcmp.ge.s32.totalorder %v8186_v42, %v7861_v48  ;;  %vm1979_vm10 = vcmp.lt.s32.totalorder %v8583_v8, 0 }
 0x2b5   : > { %2383 = vst [vmem:[%s8540_s9] sm:$0xff] %v2365_v57  ;;  %v1699_v58 = vadd.f32 %v1681_v13, %v7920_v63  ;;  %v1618_v0 = vadd.f32 %v8601_v28, %v1617_v47  ;;  %vm8609_vm7 = vmand %vm8547_vm4, %vm10737_vm0  ;;  %vm1961_vm4 = vcmp.ne.s32.totalorder %v8583_v8, 0  ;;  %v2015_v37 = vadd.s32 18, %v8583_v8 }
 0x2b6   : > { %v2274_v14 = vrot.slane %v5989_v23, 7  ;;  %v6422_v11 = vpop.f32.mrf.mxu1  ;;  %vm8651_vm0 = vmand %vm1977_vm1, %vm1959_vm9  ;;  %v8658_v41 = vadd.s32 162, %v7821_v2  ;;  %vm2098_vm1 = vcmp.ge.s32.totalorder %v8193_v18, %v7861_v48  ;;  %v8675_v2 = vsub.s32 %v8325_v52, %v1921_v38 }
 0x2b7   : > { %v2200_v6 = vsel %vm8529_vm8, %v1699_v58, 0.0  ;;  %v2366_v25 = vadd.f32 %v1699_v58, %v7920_v63  ;;  %v1682_v32 = vmax.f32 %v1618_v0, 0.0  ;;  %vm2132_vm8 = vcmp.lt.s32.totalorder %v8184_v16, %v7865_v39  ;;  %vm8668_vm15 = vmand %vm8621_vm11, %vm2130_vm5 }
 0x2b8   : > { %2346 = vst [vmem:[#allocation2 + $0xc] sm:$0xe] %v2274_v14  ;;  %v5990_v20 = vpack.c.bf16 %v2200_v6, %v2200_v6  ;;  %v1620_v59 = vpop.f32.mrf.mxu1  ;;  %v1931_v13 = vshrl.u32 %v8535_v3, 4  ;;  %v2275_v55 = vrot.slane %v2274_v14, 4  ;;  %vm2133_vm9 = vcmp.lt.s32.totalorder %v8186_v42, %v7865_v39  ;;  %vm8684_vm5 = vmand %vm1978_vm3, %vm1960_vm14 }
 0x2b9   : > { %2384 = vst [vmem:[%s8540_s9 + $0x8] sm:$0xff] %v2366_v25  ;;  %v1700_v27 = vadd.f32 %v1682_v32, %v7939_v61  ;;  %v1621_v4 = vadd.f32 %v8601_v28, %v1620_v59  ;;  %v8689_v58 = vmul.u32.u64.low 3817748708, %v8629_v12  ;;  %v8690_v0 = vmul.u32.u64.high 3817748708, %v8629_v12, %v8689_v58  ;;  %vm8700_vm11 = vmand %vm8638_vm12, %vm2095_vm2 }
 0x2ba   : > { %v2276_v23 = vrot.slane %v5990_v20, 7  ;;  %v6423_v47 = vpop.f32.mrf.mxu1  ;;  %vm2045_vm3 = vcmp.ge.s32.totalorder %v8513_v24, 1  ;;  %vm2063_vm14 = vcmp.lt.s32.totalorder %v8513_v24, 17  ;;  %v8709_v50 = vsel %vm8651_vm0, %v2013_v33, %v8516_v56 }
 0x2bb   : > { %v2201_v3 = vsel %vm8609_vm7, %v1700_v27, 0.0  ;;  %v2367_v38 = vadd.f32 %v1700_v27, %v7939_v61  ;;  %v1683_v14 = vmax.f32 %v1621_v4, 0.0  ;;  %vm8719_vm7 = vmand %vm1979_vm10, %vm1961_vm4  ;;  %vm10755_vm0 = vcmp.lt.s32.totalorder %v8467_v51, 17 }
 0x2bc   : > { %v2277_v61 = vsel %vm8587_vm6, %v2275_v55, %v2276_v23  ;;  %v5991_v36 = vpack.c.bf16 %v2201_v3, %v2201_v3  ;;  %v1625_v6 = vpop.f32.mrf.mxu1  ;;  %v8724_v32 = vmul.u32.u64.low 3817748708, %v8658_v41  ;;  %v8725_v56 = vmul.u32.u64.high 3817748708, %v8658_v41, %v8724_v32  ;;  %v7253_v3 = vld [vmem:[#allocation2 + $0x8] sm:$0xf] }
 0x2bd   : > { %2347 = vst [vmem:[#allocation2 + $0x10] sm:$0xf] %v2277_v61  ;;  %2385 = vst [vmem:[%s8540_s9 + $0x10] sm:$0xff] %v2367_v38  ;;  %v1701_v33 = vadd.f32 %v1683_v14, %v7941_v30  ;;  %v1626_v10 = vadd.f32 %v8601_v28, %v1625_v6  ;;  %vm10756_vm12 = vcmp.ge.s32.totalorder %v8467_v51, 1  ;;  %v8743_v59 = vsel %vm8684_vm5, %v2014_v15, %v8519_v9 }
 0x2be   : > { %vm8734_vm2 = vmand %vm10756_vm12, %vm10755_vm0  ;;  %v8746_v63 = vadd.s32 162, %v7816_v43  ;;  %v2278_v27 = vrot.slane %v2276_v23, 4  ;;  %v2279_v4 = vrot.slane %v5991_v36, 7  ;;  %vm10759_vm0 = vcmp.lt.s32.totalorder %v8181_v17, %v7865_v39  ;;  %v6426_v55 = vpop.f32.mrf.mxu1 }
 0x2bf   : > { %vm8753_vm12 = vmand %vm8700_vm11, %vm10759_vm0  ;;  %v8760_v9 = vadd.s32 18, %v8675_v2  ;;  %v8762_v43 = vmul.u32 18, %v1931_v13  ;;  %v2202_v15 = vsel %vm8668_vm15, %v1701_v33, 0.0  ;;  %v2368_v17 = vadd.f32 %v1701_v33, %v7941_v30  ;;  %v2885_v54 = vld [vmem:[#allocation2 + $0xc] sm:$0xf] }
 0x2c0   : > { %v1684_v23 = vmax.f32 %v1626_v10, 0.0  ;;  %vm10762_vm11 = vcmp.lt.s32.totalorder %v8484_v26, 17  ;;  %vm10763_vm0 = vcmp.ge.s32.totalorder %v8484_v26, 1  ;;  %vm2065_vm10 = vcmp.lt.s32.totalorder %v8561_v49, 17  ;;  %v1628_v58 = vpop.f32.mrf.mxu1 }
 0x2c1   : > { %vm8771_vm4 = vmand %vm10763_vm0, %vm10762_vm11  ;;  %v8780_v57 = vsel %vm8719_vm7, %v2015_v37, %v8583_v8  ;;  %v2280_v30 = vsel %vm8587_vm6, %v2278_v27, %v2279_v4  ;;  %v5992_v13 = vpack.c.bf16 %v2202_v15, %v2202_v15  ;;  %vm10766_vm15 = vcmp.ge.s32.totalorder %v8184_v16, %v7861_v48  ;;  %2386 = vst [vmem:[%s8540_s9 + $0x18] sm:$0xff] %v2368_v17 }
 0x2c2   : > { %vm8789_vm11 = vmand %vm8734_vm2, %vm10766_vm15  ;;  %v5764_v38 = vcombine.low %v7253_v3, %v2885_v54  ;;  %v8796_v8 = vadd.s32 162, %v7840_v29  ;;  %2348 = vst [vmem:[#allocation2 + $0x14] sm:$0xf] %v2280_v30  ;;  %v1702_v37 = vadd.f32 %v1684_v23, %v7959_v21  ;;  %v1629_v14 = vadd.f32 %v8601_v28, %v1628_v58  ;;  %v6427_v25 = vpop.f32.mrf.mxu1 }
 0x2c3   : > { %vm10769_vm0 = vcmp.lt.s32.totalorder %v8489_v19, 17  ;;  %vm10770_vm2 = vcmp.ge.s32.totalorder %v8489_v19, 1  ;;  %vm2135_vm7 = vcmp.lt.s32.totalorder %v8213_v40, %v7865_v39  ;;  %v2281_v36 = vrot.slane %v2279_v4, 4  ;;  %vm8820_vm5 = vmand %vm8771_vm4, %vm2097_vm13 }
 0x2c4   : > { %vm8805_vm15 = vmand %vm10770_vm2, %vm10769_vm0  ;;  %v8812_v29 = vmul.u32.u64.low 3817748708, %v8746_v63  ;;  %v8813_v61 = vmul.u32.u64.high 3817748708, %v8746_v63, %v8812_v29  ;;  %v2282_v6 = vrot.slane %v5992_v13, 7  ;;  %v3163_v32 = vshrl.u32 %v5764_v38, 16  ;;  %v2886_v17 = vld [vmem:[#allocation2 + $0x10] sm:$0xf] }
 0x2c5   : > { %v3166_v33 = vshll.u32 %v5764_v38, 16  ;;  %vm2101_vm0 = vcmp.ge.s32.totalorder %v8225_v46, %v7861_v48  ;;  %v2203_v10 = vsel %vm8753_vm12, %v1702_v37, 0.0  ;;  %v2369_v20 = vadd.f32 %v1702_v37, %v7959_v21  ;;  %vm8834_vm13 = vmand %vm8789_vm11, %vm2132_vm8  ;;  %v1633_v21 = vpop.f32.mrf.mxu1 }
 0x2c6   : > { %v1685_v27 = vmax.f32 %v1629_v14, 0.0  ;;  %vm2136_vm4 = vcmp.lt.s32.totalorder %v8219_v62, %v7865_v39  ;;  %v1942_v55 = vshrl.u32 %v8690_v0, 4  ;;  %v2283_v51 = vsel %vm8587_vm6, %v2281_v36, %v2282_v6  ;;  %vm8848_vm8 = vmand %vm8805_vm15, %vm2098_vm1 }
 0x2c7   : > { %v5993_v15 = vpack.c.bf16 %v2203_v10, %v2203_v10  ;;  %v3165_v23 = vrot.slane %v3163_v32, 3  ;;  %vm2066_vm11 = vcmp.lt.s32.totalorder %v8566_v53, 17  ;;  %v2809_v0 = vshrl.u32 %v8725_v56, 4  ;;  %2349 = vst [vmem:[#allocation2 + $0x18] sm:$0xf] %v2283_v51  ;;  %2387 = vst [vmem:[%s8540_s9 + $0x20] sm:$0xff] %v2369_v20  ;;  %v6430_v38 = vpop.f32.mrf.mxu1 }
 0x2c8   : > { %v1703_v47 = vadd.f32 %v1685_v27, %v7961_v45  ;;  %v1634_v30 = vadd.f32 %v8601_v28, %v1633_v21  ;;  %vm8863_vm1 = vmand %vm8820_vm5, %vm2133_vm9  ;;  %v5747_v58 = vcombine.low %v2885_v54, %v2886_v17  ;;  %v3168_v26 = vrot.slane %v3166_v33, 4 }
 0x2c9   : > { %v2284_v56 = vrot.slane %v2282_v6, 4  ;;  %v2285_v3 = vrot.slane %v5993_v15, 7  ;;  %vm8873_vm15 = vmand %vm2045_vm3, %vm2063_vm14  ;;  %v8880_v54 = vmul.u32.u64.low 3817748708, %v8796_v8  ;;  %v8881_v37 = vmul.u32.u64.high 3817748708, %v8796_v8, %v8880_v54  ;;  %v1636_v25 = vpop.f32.mrf.mxu1  ;;  %v2887_v32 = vld [vmem:[#allocation2 + $0x14] sm:$0xf] }
 0x2ca   : > { %v2204_v14 = vsel %vm8834_vm13, %v1703_v47, 0.0  ;;  %v2370_v11 = vadd.f32 %v1703_v47, %v7961_v45  ;;  %v1686_v29 = vmax.f32 %v1634_v30, 0.0  ;;  %6511 = vmatmul.mubr.bf16.gmra.mxu0 %v5747_v58  ;;  %vm10783_vm3 = vcmp.lt.s32.totalorder %v8193_v18, %v7865_v39  ;;  %v7163_v45 = vld [vmem:[%s10623_s5 + $0xf8] sm:$0xff]  }
 0x2cb   : > { %vm8892_vm14 = vmand %vm8848_vm8, %vm10783_vm3  ;;  %v8896_v36 = vor.u32 %v3168_v26, %v3165_v23  ;;  %v2286_v6 = vsel %vm8587_vm6, %v2284_v56, %v2285_v3  ;;  %v5994_v18 = vpack.c.bf16 %v2204_v14, %v2204_v14  ;;  %v10786_v19 = vmov 0.0   ;;  %v6431_v16 = vpop.f32.mrf.mxu1 }
 0x2cc   : > { %vm10787_vm13 = vmmov 0   ;;  %vm10788_vm8 = vcmp.lt.s32.totalorder %v8556_v60, 17  ;;  %vm10789_vm3 = vcmp.ge.s32.totalorder %v8556_v60, 1  ;;  %v8919_v10 = vsub.s32 %v8460_v35, %v8762_v43  ;;  %2350 = vst [vmem:[#allocation2 + $0x1c] sm:$0xf] %v2286_v6  ;;  %2388 = vst [vmem:[%s8540_s9 + $0x28] sm:$0xff] %v2370_v11 }
 0x2cd   : > { %6514 = vmatprep.mubr.msk.bf16.mxu0 %vm10787_vm13, %v10786_v19  ;;  %vm8911_vm9 = vmand %vm10789_vm3, %vm10788_vm8  ;;  %v1943_v20 = vmul.u32 18, %v1942_v55  ;;  %v1704_v27 = vadd.f32 %v1686_v29, %v7979_v22  ;;  %v1637_v4 = vadd.f32 %v8601_v28, %v1636_v25  ;;  %v10792_v60 = vld [vmem:[#allocation19_spill] sm:$0xff]  ;;  %vm10794_vm8 = vsmask.f32 4352  ;;  %v1641_v13 = vpop.f32.mrf.mxu1 }
 0x2ce   : > { %v10793_v51 = vor.u32 %v8229_v7, %v10792_v60  ;;  %vm10795_vm3 = vcmp.ge.s32.totalorder %v8213_v40, %v7861_v48  ;;  %v5765_v55 = vcombine.low %v2886_v17, %v2887_v32  ;;  %v2287_v21 = vrot.slane %v2285_v3, 4  ;;  %v2888_v38 = vld [vmem:[#allocation2 + $0x18] sm:$0xf]  ;;  %v10806_v40 = vld [vmem:[#allocation3_spill] sm:$0xff]  ;;  %v10817_v7 = vld [vmem:[#allocation4_spill] sm:$0xff] }
 0x2cf   : > { %vm8934_vm5 = vmand %vm8873_vm15, %vm10795_vm3  ;;  %v2288_v23 = vrot.slane %v5994_v18, 7  ;;  %vm10798_vm2 = vcmp.ge.s32.totalorder %v8561_v49, 1  ;;  %v2810_v47 = vmul.u32 18, %v2809_v0  ;;  %v2787_v30 = vshrl.u32 %v8813_v61, 4  ;;  %v6434_v33 = vpop.f32.mrf.mxu1 }
 0x2d0   : > { %v3170_v15 = vsel %vm10794_vm8, %v10793_v51, %v8896_v36  ;;  %vm8942_vm12 = vmand %vm10798_vm2, %vm2065_vm10  ;;  %vm2138_vm8 = vcmp.lt.s32.totalorder %v8231_v44, %v7865_v39  ;;  %v2205_v17 = vsel %vm8863_vm1, %v1704_v27, 0.0  ;;  %v2371_v58 = vadd.f32 %v1704_v27, %v7979_v22  ;;  %v7167_v22 = vld [vmem:[%s10623_s5 + $0xf0] sm:$0xff]  }
 0x2d1   : > { %6559 = vmatmul.mubr.bf16.vlgmr.msra.gmra.mxu1 %v3170_v15  ;;  %v1687_v26 = vmax.f32 %v1637_v4, 0.0  ;;  %v3172_v56 = vshrl.u32 %v5765_v55, 16  ;;  %vm10801_vm15 = vcmp.ge.s32.totalorder %v8219_v62, %v7861_v48  ;;  %vm2103_vm1 = vcmp.ge.s32.totalorder %v8270_v1, %v7861_v48  ;;  %vm8975_vm2 = vmand %vm8934_vm5, %vm2135_vm7 }
 0x2d2   : > { %vm8957_vm10 = vmand %vm8911_vm9, %vm10801_vm15  ;;  %6562 = vmatprep.mubr.msk.bf16.mxu1 %vm10787_vm13, %v10786_v19  ;;  %6647 = vmatpush3.bf16.msra.mxu1 %v7163_v45  ;;  %v2289_v61 = vsel %vm8587_vm6, %v2287_v21, %v2288_v23  ;;  %v5995_v0 = vpack.c.bf16 %v2205_v17, %v2205_v17  ;;  %v3175_v42 = vshll.u32 %v5765_v55, 16  ;;  %vm2050_vm9 = vcmp.ge.s32.totalorder %v8743_v59, 1  ;;  %2389 = vst [vmem:[%s8540_s9 + $0x30] sm:$0xff] %v2371_v58  ;;  %v1644_v55 = vpop.f32.mrf.mxu1 }
 0x2d3   : > { %vm2068_vm3 = vcmp.lt.s32.totalorder %v8743_v59, 17  ;;  %v8982_v54 = vsub.s32 %v8629_v12, %v1943_v20  ;;  %6648 = vmatprep.subr.bf16.mxu1 %v10786_v19  ;;  %2351 = vst [vmem:[#allocation2 + $0x20] sm:$0xf] %v2289_v61  ;;  %v1705_v14 = vadd.f32 %v1687_v26, %v10806_v40  ;;  %v1642_v11 = vadd.f32 %v8601_v28, %v1641_v13  ;;  %vm8993_vm7 = vmand %vm8942_vm12, %vm2101_vm0  ;;  %v7174_v26 = vld [vmem:[%s10623_s5 + $0xd8] sm:$0xff]  }
 0x2d4   : > { %v5748_v29 = vcombine.low %v2887_v32, %v2888_v38  ;;  %v3174_v45 = vrot.slane %v3172_v56, 3  ;;  %v2290_v18 = vrot.slane %v2288_v23, 4  ;;  %v2291_v25 = vrot.slane %v5995_v0, 7  ;;  %vm9002_vm5 = vmand %vm8957_vm10, %vm2136_vm4  ;;  %v2889_v23 = vld [vmem:[#allocation2 + $0x1c] sm:$0xf]  ;;  %v6435_v61 = vpop.f32.mrf.mxu1 }
 0x2d5   : > { %v3177_v20 = vrot.slane %v3175_v42, 4  ;;  %v9009_v27 = vadd.s32 18, %v8919_v10  ;;  %v2206_v4 = vsel %vm8892_vm14, %v1705_v14, 0.0  ;;  %v2372_v60 = vadd.f32 %v1705_v14, %v10806_v40 }
 0x2d6   : > { %v1688_v62 = vmax.f32 %v1642_v11, 0.0  ;;  %6515 = vmatmul.mubr.bf16.gmra.mxu0 %v5748_v29  ;;  %vm10811_vm4 = vcmp.ge.s32.totalorder %v8566_v53, 1  ;;  %v9025_v15 = vsub.s32 %v8658_v41, %v2810_v47  ;;  %6649 = vmatpush3.bf16.msra.mxu1 %v7167_v22  ;;  %v2292_v24 = vsel %vm8587_vm6, %v2290_v18, %v2291_v25  ;;  %v1649_v29 = vpop.f32.mrf.mxu1  ;;  %v7173_v18 = vld [vmem:[%s10623_s5 + $0xe0] sm:$0xff]  }
 0x2d7   : > { %vm9018_vm12 = vmand %vm10811_vm4, %vm2066_vm11  ;;  %v5996_v43 = vpack.c.bf16 %v2206_v4, %v2206_v4  ;;  %v9029_v21 = vor.u32 %v3177_v20, %v3174_v45  ;;  %vm10814_vm11 = vcmp.lt.s32.totalorder %v8225_v46, %v7865_v39  ;;  %6518 = vmatprep.mubr.msk.bf16.mxu0 %vm10787_vm13, %v10786_v19  ;;  %v9045_v16 = vadd.s32 18, %v8982_v54  ;;  %6650 = vmatprep.subr.bf16.mxu1 %v10786_v19  ;;  %v7168_v46 = vld [vmem:[%s10623_s5 + $0xe8] sm:$0xff]  }
 0x2d8   : > { %vm9036_vm14 = vmand %vm8993_vm7, %vm10814_vm11  ;;  %2352 = vst [vmem:[#allocation2 + $0x24] sm:$0xf] %v2292_v24  ;;  %v1706_v47 = vadd.f32 %v1688_v62, %v10817_v7  ;;  %v1645_v17 = vadd.f32 %v8601_v28, %v1644_v55  ;;  %v5766_v58 = vcombine.low %v2888_v38, %v2889_v23  ;;  %vm10818_vm7 = vcmp.ne.s32.totalorder %v8675_v2, 0  ;;  %v6438_v51 = vpop.f32.mrf.mxu1 }
 0x2d9   : > { %2390 = vst [vmem:[%s8540_s9 + $0x38] sm:$0xff] %v2372_v60  ;;  %vm10819_vm11 = vcmp.lt.s32.totalorder %v8675_v2, 0  ;;  %v9062_v56 = vmul.u32 18, %v2787_v30  ;;  %v2293_v49 = vrot.slane %v2291_v25, 4  ;;  %v2294_v22 = vrot.slane %v5996_v43, 7  ;;  %v10830_v25 = vld [vmem:[#allocation5_spill] sm:$0xff] }
 0x2da   : > { %vm9058_vm10 = vmand %vm10819_vm11, %vm10818_vm7  ;;  %vm10822_vm4 = vsmask.f32 4352  ;;  %vm10823_vm0 = vcmp.ge.s32.totalorder %v8231_v44, %v7861_v48  ;;  %vm2139_vm7 = vcmp.lt.s32.totalorder %v8270_v1, %v7865_v39  ;;  %v2798_v30 = vshrl.u32 %v8881_v37, 4  ;;  %v2890_v45 = vld [vmem:[#allocation2 + $0x20] sm:$0xf]  ;;  %6651 = vmatpush3.bf16.msra.mxu1 %v7168_v46 }
 0x2db   : > { %v3179_v0 = vsel %vm10822_vm4, %v8896_v36, %v9029_v21  ;;  %vm9072_vm15 = vmand %vm9018_vm12, %vm10823_vm0  ;;  %v2207_v38 = vsel %vm8975_vm2, %v1706_v47, 0.0  ;;  %v2373_v42 = vadd.f32 %v1706_v47, %v10817_v7  ;;  %v1689_v36 = vmax.f32 %v1645_v17, 0.0  ;;  %6652 = vmatprep.subr.bf16.mxu1 %v10786_v19  ;;  %v1652_v47 = vpop.f32.mrf.mxu1 }
 0x2dc   : > { %6563 = vmatmul.mubr.bf16.gmra.mxu1 %v3179_v0  ;;  %v3181_v40 = vshrl.u32 %v5766_v58, 16  ;;  %vm10826_vm4 = vcmp.lt.s32.totalorder %v8709_v50, 17  ;;  %vm10827_vm0 = vcmp.ge.s32.totalorder %v8709_v50, 1  ;;  %vm2140_vm11 = vcmp.lt.s32.totalorder %v8277_v31, %v7865_v39 }
 0x2dd   : > { %vm9086_vm12 = vmand %vm10827_vm0, %vm10826_vm4  ;;  %v2295_v3 = vsel %vm8587_vm6, %v2293_v49, %v2294_v22  ;;  %v5997_v11 = vpack.c.bf16 %v2207_v38, %v2207_v38  ;;  %v3184_v6 = vshll.u32 %v5766_v58, 16  ;;  %6566 = vmatprep.mubr.msk.bf16.mxu1 %vm10787_vm13, %v10786_v19  ;;  %vm2051_vm2 = vcmp.ge.s32.totalorder %v8780_v57, 1  ;;  %2391 = vst [vmem:[%s8540_s9 + $0x40] sm:$0xff] %v2373_v42  ;;  %v10837_v49 = vld [vmem:[#allocation6_spill] sm:$0xff] }
 0x2de   : > { %vm2069_vm4 = vcmp.lt.s32.totalorder %v8780_v57, 17  ;;  %v9102_v50 = vsel %vm9058_vm10, %v8760_v9, %v8675_v2  ;;  %2353 = vst [vmem:[#allocation2 + $0x28] sm:$0xf] %v2295_v3  ;;  %v1707_v33 = vadd.f32 %v1689_v36, %v10830_v25  ;;  %v1650_v20 = vadd.f32 %v8601_v28, %v1649_v29  ;;  %vm9115_vm0 = vmand %vm9072_vm15, %vm2138_vm8  ;;  %6653 = vmatpush3.bf16.msra.mxu1 %v7173_v18 }
 0x2df   : > { %v5749_v4 = vcombine.low %v2889_v23, %v2890_v45  ;;  %v3183_v9 = vrot.slane %v3181_v40, 3  ;;  %v2296_v60 = vrot.slane %v2294_v22, 4  ;;  %v2297_v62 = vrot.slane %v5997_v11, 7  ;;  %vm9125_vm10 = vmand %vm9086_vm12, %vm2103_vm1  ;;  %v2891_v59 = vld [vmem:[#allocation2 + $0x24] sm:$0xf]  ;;  %6654 = vmatprep.subr.bf16.mxu1 %v10786_v19  ;;  %v6439_v40 = vpop.f32.mrf.mxu1 }
 0x2e0   : > { %v3186_v24 = vrot.slane %v3184_v6, 4  ;;  %v2208_v43 = vsel %vm9002_vm5, %v1707_v33, 0.0  ;;  %v2374_v55 = vadd.f32 %v1707_v33, %v10830_v25  ;;  %v1690_v23 = vmax.f32 %v1650_v20, 0.0  ;;  %vm9137_vm15 = vmand %vm2050_vm9, %vm2068_vm3  ;;  %v7177_v20 = vld [vmem:[%s10623_s5 + $0xd0] sm:$0xff]  }
 0x2e1   : > { %6519 = vmatmul.mubr.bf16.gmra.mxu0 %v5749_v4  ;;  %vm2819_vm8 = vcmp.lt.s32.totalorder %v9025_v15, 0  ;;  %v2298_v32 = vsel %vm8587_vm6, %v2296_v60, %v2297_v62  ;;  %v5998_v7 = vpack.c.bf16 %v2208_v43, %v2208_v43  ;;  %v9153_v58 = vadd.s32 18, %v9025_v15  ;;  %v1657_v53 = vpop.f32.mrf.mxu1  ;;  %v10850_v4 = vld [vmem:[#allocation7_spill] sm:$0xff] }
 0x2e2   : > { %v9146_v17 = vor.u32 %v3186_v24, %v3183_v9  ;;  %6522 = vmatprep.mubr.msk.bf16.mxu0 %vm10787_vm13, %v10786_v19  ;;  %2354 = vst [vmem:[#allocation2 + $0x2c] sm:$0xf] %v2298_v32  ;;  %2392 = vst [vmem:[%s8540_s9 + $0x48] sm:$0xff] %v2374_v55  ;;  %v1708_v22 = vadd.f32 %v1690_v23, %v10837_v49  ;;  %v1653_v61 = vadd.f32 %v8601_v28, %v1652_v47  ;;  %vm10842_vm1 = vsmask.f32 4352 }
 0x2e3   : > { %v5767_v0 = vcombine.low %v2890_v45, %v2891_v59  ;;  %vm10838_vm3 = vcmp.ne.s32.totalorder %v8919_v10, 0  ;;  %vm10839_vm5 = vcmp.lt.s32.totalorder %v8919_v10, 0  ;;  %v9171_v38 = vsub.s32 %v8746_v63, %v9062_v56  ;;  %6655 = vmatpush3.bf16.msra.mxu1 %v7174_v26  ;;  %v6442_v43 = vpop.f32.mrf.mxu1 }
 0x2e4   : > { %vm9165_vm9 = vmand %vm10839_vm5, %vm10838_vm3  ;;  %v2299_v42 = vrot.slane %v2297_v62, 4  ;;  %v2300_v36 = vrot.slane %v5998_v7, 7  ;;  %v3188_v14 = vsel %vm10842_vm1, %v9029_v21, %v9146_v17  ;;  %vm10843_vm12 = vcmp.ge.s32.totalorder %v8277_v31, %v7861_v48  ;;  %6656 = vmatprep.subr.bf16.mxu1 %v10786_v19 }
 0x2e5   : > { %vm9182_vm3 = vmand %vm9137_vm15, %vm10843_vm12  ;;  %vm2106_vm5 = vcmp.ge.s32.totalorder %v8325_v52, %v7861_v48  ;;  %v2799_v56 = vmul.u32 18, %v2798_v30  ;;  %v2209_v11 = vsel %vm9036_vm14, %v1708_v22, 0.0  ;;  %v2375_v21 = vadd.f32 %v1708_v22, %v10837_v49  ;;  %6567 = vmatmul.mubr.bf16.gmra.mxu1 %v3188_v14  ;;  %v2892_v18 = vld [vmem:[#allocation2 + $0x28] sm:$0xf]  ;;  %v1660_v47 = vpop.f32.mrf.mxu1 }
 0x2e6   : > { %v1691_v29 = vmax.f32 %v1653_v61, 0.0  ;;  %v3190_v45 = vshrl.u32 %v5767_v0, 16  ;;  %vm10846_vm15 = vcmp.ne.s32.totalorder %v8982_v54, 0  ;;  %vm10847_vm1 = vcmp.lt.s32.totalorder %v8982_v54, 0  ;;  %6570 = vmatprep.mubr.msk.bf16.mxu1 %vm10787_vm13, %v10786_v19 }
 0x2e7   : > { %vm9197_vm12 = vmand %vm10847_vm1, %vm10846_vm15  ;;  %v2301_v37 = vsel %vm8587_vm6, %v2299_v42, %v2300_v36  ;;  %v5999_v30 = vpack.c.bf16 %v2209_v11, %v2209_v11  ;;  %v3193_v25 = vshll.u32 %v5767_v0, 16  ;;  %vm2141_vm14 = vcmp.lt.s32.totalorder %v8287_v5, %v7865_v39  ;;  %2393 = vst [vmem:[%s8540_s9 + $0x50] sm:$0xff] %v2375_v21  ;;  %6657 = vmatpush3.bf16.msra.mxu1 %v7177_v20  ;;  %v6443_v40 = vpop.f32.mrf.mxu1 }
 0x2e8   : > { %v9211_v33 = vsel %vm9165_vm9, %v9009_v27, %v8919_v10  ;;  %2355 = vst [vmem:[#allocation2 + $0x30] sm:$0xf] %v2301_v37  ;;  %v1709_v9 = vadd.f32 %v1691_v29, %v10850_v4  ;;  %v1658_v60 = vadd.f32 %v8601_v28, %v1657_v53  ;;  %vm9224_vm15 = vmand %vm9125_vm10, %vm2139_vm7  ;;  %v5750_v10 = vcombine.low %v2891_v59, %v2892_v18 }
 0x2e9   : > { %v3192_v27 = vrot.slane %v3190_v45, 3  ;;  %vm2142_vm9 = vcmp.lt.s32.totalorder %v8325_v52, %v7865_v39  ;;  %v2302_v51 = vrot.slane %v2300_v36, 4  ;;  %v2303_v24 = vrot.slane %v5999_v30, 7  ;;  %vm9236_vm7 = vmand %vm9182_vm3, %vm2140_vm11  ;;  %v2893_v59 = vld [vmem:[#allocation2 + $0x2c] sm:$0xf]  ;;  %6658 = vmatprep.subr.bf16.mxu1 %v10786_v19  ;;  %v1665_v6 = vpop.f32.mrf.mxu1 }
 0x2ea   : > { %v3195_v55 = vrot.slane %v3193_v25, 4  ;;  %vm2814_vm10 = vcmp.ne.s32.totalorder %v9171_v38, 0  ;;  %v2210_v44 = vsel %vm9115_vm0, %v1709_v9, 0.0  ;;  %v2376_v23 = vadd.f32 %v1709_v9, %v10850_v4  ;;  %6523 = vmatmul.mubr.bf16.gmra.mxu0 %v5750_v10  ;;  %vm9249_vm11 = vmand %vm2051_vm2, %vm2069_vm4  ;;  %v10869_v25 = vld [vmem:[#allocation9_spill] sm:$0xff] }
 0x2eb   : > { %v1692_v46 = vmax.f32 %v1658_v60, 0.0  ;;  %v9259_v2 = vsel %vm9197_vm12, %v9045_v16, %v8982_v54  ;;  %v2304_v32 = vsel %vm8587_vm6, %v2302_v51, %v2303_v24  ;;  %v6000_v7 = vpack.c.bf16 %v2210_v44, %v2210_v44  ;;  %6526 = vmatprep.mubr.msk.bf16.mxu0 %vm10787_vm13, %v10786_v19  ;;  %v7179_v54 = vld [vmem:[%s10623_s5 + $0xc8] sm:$0xff]   ;;  %v6446_v10 = vpop.f32.mrf.mxu1 }
 0x2ec   : > { %v9263_v57 = vor.u32 %v3195_v55, %v3192_v27  ;;  %v9268_v26 = vadd.s32 18, %v9171_v38  ;;  %2356 = vst [vmem:[#allocation2 + $0x34] sm:$0xf] %v2304_v32  ;;  %2394 = vst [vmem:[%s8540_s9 + $0x58] sm:$0xff] %v2376_v23  ;;  %v10857_v16 = vld [vmem:[#allocation8_spill] sm:$0xff]  ;;  %v1661_v22 = vadd.f32 %v8601_v28, %v1660_v47  ;;  %v5768_v61 = vcombine.low %v2892_v18, %v2893_v59  ;;  %v7181_v18 = vld [vmem:[%s10623_s5 + $0xc0] sm:$0xff]  }
 0x2ed   : > { %v1710_v49 = vadd.f32 %v1692_v46, %v10857_v16  ;;  %vm10858_vm2 = vcmp.ne.s32.totalorder %v9025_v15, 0  ;;  %v9285_v13 = vsub.s32 %v8796_v8, %v2799_v56  ;;  %v2305_v42 = vrot.slane %v2303_v24, 4  ;;  %6659 = vmatpush3.bf16.msra.mxu1 %v7179_v54  ;;  %v1668_v23 = vpop.f32.mrf.mxu1  ;;  %v10876_v32 = vld [vmem:[#allocation10_spill] sm:$0xff] }
 0x2ee   : > { %vm9280_vm4 = vmand %vm2819_vm8, %vm10858_vm2  ;;  %v2306_v36 = vrot.slane %v6000_v7, 7  ;;  %vm10861_vm0 = vsmask.f32 4352  ;;  %vm10862_vm12 = vcmp.lt.s32.totalorder %v9102_v50, 17  ;;  %vm10863_vm3 = vcmp.ge.s32.totalorder %v9102_v50, 1  ;;  %6660 = vmatprep.subr.bf16.mxu1 %v10786_v19 }
 0x2ef   : > { %v3197_v14 = vsel %vm10861_vm0, %v9146_v17, %v9263_v57  ;;  %vm9295_vm8 = vmand %vm10863_vm3, %vm10862_vm12  ;;  %vm2107_vm2 = vcmp.ge.s32.totalorder %v8460_v35, %v7861_v48  ;;  %vm2054_vm1 = vcmp.ge.s32.totalorder %v9259_v2, 1  ;;  %v2211_v56 = vsel %vm9224_vm15, %v1710_v49, 0.0  ;;  %v2894_v37 = vld [vmem:[#allocation2 + $0x30] sm:$0xf] }
 0x2f0   : > { %v2377_v11 = vadd.f32 %v1710_v49, %v10857_v16  ;;  %v1693_v17 = vmax.f32 %v1661_v22, 0.0  ;;  %6571 = vmatmul.mubr.bf16.gmra.mxu1 %v3197_v14  ;;  %vm10866_vm0 = vcmp.ge.s32.totalorder %v8287_v5, %v7861_v48  ;;  %v3199_v21 = vshrl.u32 %v5768_v61, 16  ;;  %v6447_v49 = vpop.f32.mrf.mxu1 }
 0x2f1   : > { %vm9310_vm3 = vmand %vm9249_vm11, %vm10866_vm0  ;;  %v2307_v29 = vsel %vm8587_vm6, %v2305_v42, %v2306_v36  ;;  %v6001_v45 = vpack.c.bf16 %v2211_v56, %v2211_v56  ;;  %v3202_v30 = vshll.u32 %v5768_v61, 16  ;;  %6574 = vmatprep.mubr.msk.bf16.mxu1 %vm10787_vm13, %v10786_v19  ;;  %v9324_v53 = vsel %vm9280_vm4, %v9153_v58, %v9025_v15  ;;  %6661 = vmatpush3.bf16.msra.mxu1 %v7181_v18 }
 0x2f2   : > { %2357 = vst [vmem:[#allocation2 + $0x38] sm:$0xf] %v2307_v29  ;;  %2395 = vst [vmem:[%s8540_s9 + $0x60] sm:$0xff] %v2377_v11  ;;  %v1711_v20 = vadd.f32 %v1693_v17, %v10869_v25  ;;  %v1666_v4 = vadd.f32 %v8601_v28, %v1665_v6  ;;  %v5751_v9 = vcombine.low %v2893_v59, %v2894_v37  ;;  %v3201_v60 = vrot.slane %v3199_v21, 3  ;;  %v1673_v56 = vpop.f32.mrf.mxu1  ;;  %v10889_v21 = vld [vmem:[#allocation11_spill] sm:$0xff] }
 0x2f3   : > { %vm9337_vm11 = vmand %vm9295_vm8, %vm2106_vm5  ;;  %v2308_v58 = vrot.slane %v2306_v36, 4  ;;  %v2309_v62 = vrot.slane %v6001_v45, 7  ;;  %v3204_v27 = vrot.slane %v3202_v30, 4  ;;  %vm2072_vm12 = vcmp.lt.s32.totalorder %v9259_v2, 17  ;;  %v2895_v31 = vld [vmem:[#allocation2 + $0x34] sm:$0xf]  ;;  %6750 = vmatprep.subr.bf16.mxu1 %v10786_v19 }
 0x2f4   : > { %v2212_v51 = vsel %vm9236_vm7, %v1711_v20, 0.0  ;;  %v2378_v24 = vadd.f32 %v1711_v20, %v10869_v25  ;;  %v1694_v43 = vmax.f32 %v1666_v4, 0.0  ;;  %vm9353_vm5 = vmand %vm9310_vm3, %vm2141_vm14  ;;  %6527 = vmatmul.mubr.bf16.gmra.mxu0 %v5751_v9  ;;  %vm2815_vm0 = vcmp.ne.s32.totalorder %v9285_v13, 0  ;;  %v6450_v18 = vpop.f32.mrf.mxu1 }
 0x2f5   : > { %v2310_v1 = vsel %vm8587_vm6, %v2308_v58, %v2309_v62  ;;  %v6002_v44 = vpack.c.bf16 %v2212_v51, %v2212_v51  ;;  %vm9367_vm14 = vmand %vm9337_vm11, %vm2142_vm9  ;;  %v9371_v46 = vor.u32 %v3204_v27, %v3201_v60  ;;  %6530 = vmatprep.mubr.msk.bf16.mxu0 %vm10787_vm13, %v10786_v19  ;;  %v1669_v52 = vadd.f32 %v8601_v28, %v1668_v23 }
 0x2f6   : > { %2358 = vst [vmem:[#allocation2 + $0x3c] sm:$0xf] %v2310_v1  ;;  %2396 = vst [vmem:[%s8540_s9 + $0x68] sm:$0xff] %v2378_v24  ;;  %v1712_v7 = vadd.f32 %v1694_v43, %v10876_v32  ;;  %v5769_v47 = vcombine.low %v2894_v37, %v2895_v31  ;;  %vm10877_vm9 = vcmp.lt.s32.totalorder %v9171_v38, 0  ;;  %vm2818_vm11 = vcmp.lt.s32.totalorder %v9285_v13, 0  ;;  %v1676_v27 = vpop.f32.mrf.mxu1  ;;  %v10898_v24 = vld [vmem:[#allocation14_spill] sm:$0xff] }
 0x2f7   : > { %vm9383_vm3 = vmand %vm10877_vm9, %vm2814_vm10  ;;  %v2311_v54 = vrot.slane %v2309_v62, 4  ;;  %v2312_v16 = vrot.slane %v6002_v44, 7  ;;  %vm10880_vm7 = vsmask.f32 4352  ;;  %vm10881_vm8 = vcmp.lt.s32.totalorder %v9211_v33, 17 }
 0x2f8   : > { %v3206_v22 = vsel %vm10880_vm7, %v9263_v57, %v9371_v46  ;;  %vm10882_vm4 = vcmp.ge.s32.totalorder %v9211_v33, 1  ;;  %v2824_v0 = vadd.s32 18, %v9285_v13  ;;  %v2213_v42 = vsel %vm9353_vm5, %v1712_v7, 0.0  ;;  %vm9408_vm10 = vmand %vm2054_vm1, %vm2072_vm12  ;;  %v6451_v5 = vpop.f32.mrf.mxu1 }
 0x2f9   : > { %vm9396_vm15 = vmand %vm10882_vm4, %vm10881_vm8  ;;  %v2379_v36 = vadd.f32 %v1712_v7, %v10876_v32  ;;  %v1695_v40 = vmax.f32 %v1669_v52, 0.0  ;;  %6575 = vmatmul.mubr.bf16.gmra.mxu1 %v3206_v22  ;;  %v3208_v14 = vshrl.u32 %v5769_v47, 16  ;;  %vm2840_vm4 = vcmp.ge.s32.totalorder %v8658_v41, %v7861_v48  ;;  %v2896_v11 = vld [vmem:[#allocation2 + $0x38] sm:$0xf] }
 0x2fa   : > { %v2313_v57 = vsel %vm8587_vm6, %v2311_v54, %v2312_v16  ;;  %v6003_v3 = vpack.c.bf16 %v2213_v42, %v2213_v42  ;;  %v3211_v17 = vshll.u32 %v5769_v47, 16  ;;  %6578 = vmatprep.mubr.msk.bf16.mxu1 %vm10787_vm13, %v10786_v19  ;;  %v2826_v2 = vsel %vm9383_vm3, %v9268_v26, %v9171_v38  ;;  %vm9428_vm12 = vmand %vm2818_vm11, %vm2815_vm0  ;;  %v6488_v54 = vpop.f32.mrf.mxu1 }
 0x2fb   : > { %vm2838_vm1 = vcmp.ge.s32.totalorder %v8746_v63, %v7861_v48  ;;  %2359 = vst [vmem:[#allocation2 + $0x40] sm:$0xf] %v2313_v57  ;;  %2397 = vst [vmem:[%s8540_s9 + $0x70] sm:$0xff] %v2379_v36  ;;  %v1713_v29 = vadd.f32 %v1695_v40, %v10889_v21  ;;  %v1674_v45 = vadd.f32 %v8601_v28, %v1673_v56  ;;  %v3210_v6 = vrot.slane %v3208_v14, 3 }
 0x2fc   : > { %vm9440_vm5 = vmand %vm9396_vm15, %vm2107_vm2  ;;  %v5752_v26 = vcombine.low %v2895_v31, %v2896_v11  ;;  %v2314_v37 = vrot.slane %v2312_v16, 4  ;;  %v2315_v30 = vrot.slane %v6003_v3, 7  ;;  %v3213_v25 = vrot.slane %v3211_v17, 4  ;;  %v2758_v57 = vpop.f32.mrf.mxu1 }
 0x2fd   : > { %vm2834_vm8 = vcmp.lt.s32.totalorder %v9324_v53, 17  ;;  %vm2846_vm0 = vcmp.lt.s32.totalorder %v8658_v41, %v7865_v39  ;;  %v2214_v20 = vsel %vm9367_vm14, %v1713_v29, 0.0  ;;  %v2380_v4 = vadd.f32 %v1713_v29, %v10889_v21  ;;  %v9541_v21 = vld [vmem:[#allocation2 + $0xc] sm:$0xff]  }
 0x2fe   : > { %v1696_v9 = vmax.f32 %v1674_v45, 0.0  ;;  %6531 = vmatmul.mubr.bf16.gmra.mxu0 %v5752_v26  ;;  %vm10892_vm2 = vcmp.ge.s32.totalorder %v8629_v12, %v7861_v48  ;;  %v2827_v15 = vsel %vm9428_vm12, %v2824_v0, %v9285_v13  ;;  %v2316_v58 = vsel %vm8587_vm6, %v2314_v37, %v2315_v30  ;;  %v2897_v13 = vld [vmem:[#allocation2 + $0x3c] sm:$0xf]  ;;  %v6489_v38 = vpop.f32.mrf.mxu1 }
 0x2ff   : > { %vm9455_vm15 = vmand %vm9408_vm10, %vm10892_vm2  ;;  %v6004_v62 = vpack.c.bf16 %v2214_v20, %v2214_v20  ;;  %vm10895_vm14 = vcmp.lt.s32.totalorder %v8460_v35, %v7865_v39  ;;  %v9473_v51 = vor.u32 %v3213_v25, %v3210_v6  ;;  %vm2829_vm9 = vcmp.ge.s32.totalorder %v2826_v2, 1  ;;  %6534 = vmatprep.mubr.msk.bf16.mxu0 %vm10787_vm13, %v10786_v19  ;;  %2360 = vst [vmem:[#allocation2 + $0x44] sm:$0xf] %v2316_v58  ;;  %v10917_v20 = vld [vmem:[#allocation20_spill] sm:$0xff] }
 0x300   : > { %vm9469_vm7 = vmand %vm9440_vm5, %vm10895_vm14  ;;  %2398 = vst [vmem:[%s8540_s9 + $0x78] sm:$0xff] %v2380_v4  ;;  %v1714_v43 = vadd.f32 %v1696_v9, %v10898_v24  ;;  %v1677_v35 = vadd.f32 %v8601_v28, %v1676_v27  ;;  %vm2832_vm3 = vcmp.lt.s32.totalorder %v2826_v2, 17  ;;  %v5770_v55 = vcombine.low %v2896_v11, %v2897_v13  ;;  %v5718_v28 = vld [vmem:[%s10622_s4] ss:$0 sm:$0xff]  ;;  %v10919_v58 = vld [vmem:[#allocation16_spill] sm:$0xff]  ;;  %v2761_v41 = vpop.f32.mrf.mxu1 }
 0x301   : > { %v2317_v1 = vrot.slane %v2315_v30, 4  ;;  %v2318_v44 = vrot.slane %v6004_v62, 7  ;;  %vm10899_vm11 = vcmp.lt.s32.totalorder %v8629_v12, %v7865_v39  ;;  %vm10902_vm12 = vsmask.f32 4352  ;;  %vm9510_vm14 = vmand %vm2829_vm9, %vm2832_vm3  ;;  %v10920_v27 = vld [vmem:[#allocation12_spill] sm:$0xff] }
 0x302   : > { %vm9485_vm10 = vmand %vm9455_vm15, %vm10899_vm11  ;;  %v3215_v31 = vsel %vm10902_vm12, %v9371_v46, %v9473_v51  ;;  %vm2830_vm5 = vcmp.ge.s32.totalorder %v2827_v15, 1  ;;  %v2215_v12 = vsel %vm9469_vm7, %v1714_v43, 0.0  ;;  %v2381_v32 = vadd.f32 %v1714_v43, %v10898_v24  ;;  %v2898_v49 = vld [vmem:[#allocation2 + $0x40] sm:$0xf] }
 0x303   : > { %v1697_v7 = vmax.f32 %v1677_v35, 0.0  ;;  %6579 = vmatmul.mubr.bf16.gmra.mxu1 %v3215_v31  ;;  %vm10903_vm2 = vcmp.ge.s32.totalorder %v9324_v53, 1  ;;  %v3217_v46 = vshrl.u32 %v5770_v55, 16  ;;  %v2319_v47 = vsel %vm8587_vm6, %v2317_v1, %v2318_v44  ;;  %v10908_v53 = vld [vmem:[#allocation15_spill] sm:$0xff] }
 0x304   : > { %vm9502_vm15 = vmand %vm10903_vm2, %vm2834_vm8  ;;  %v6005_v59 = vpack.c.bf16 %v2215_v12, %v2215_v12  ;;  %v3220_v22 = vshll.u32 %v5770_v55, 16  ;;  %6582 = vmatprep.mubr.msk.bf16.mxu1 %vm10787_vm13, %v10786_v19  ;;  %vm2833_vm8 = vcmp.lt.s32.totalorder %v2827_v15, 17  ;;  %2361 = vst [vmem:[#allocation2 + $0x48] sm:$0xf] %v2319_v47  ;;  %v2767_v0 = vadd.f32 %v6488_v54, %v5718_v28  ;;  %v9593_v12 = vld [vmem:[#allocation2 + $0x10] sm:$0xf] }
 0x305   : > { %2399 = vst [vmem:[%s8540_s9 + $0x80] sm:$0xff] %v2381_v32  ;;  %v1715_v61 = vadd.f32 %v1697_v7, %v10908_v53  ;;  %v5753_v42 = vcombine.low %v2897_v13, %v2898_v49  ;;  %v3219_v36 = vrot.slane %v3217_v46, 3  ;;  %v2320_v40 = vrot.slane %v2318_v44, 4  ;;  %vm9523_vm7 = vmand %vm9502_vm15, %vm2840_vm4  ;;  %v10924_v47 = vld [vmem:[#allocation13_spill] sm:$0xff] }
 0x306   : > { %v2321_v14 = vrot.slane %v6005_v59, 7  ;;  %vm2844_vm9 = vcmp.lt.s32.totalorder %v8746_v63, %v7865_v39  ;;  %v3222_v3 = vrot.slane %v3220_v22, 4  ;;  %v2774_v17 = vmax.f32 %v2767_v0, 0.0  ;;  %vm9537_vm4 = vmand %vm9510_vm14, %vm2838_vm1  ;;  %v2899_v37 = vld [vmem:[#allocation2 + $0x44] sm:$0xf] }
 0x307   : > { %v2216_v56 = vsel %vm9485_vm10, %v1715_v61, 0.0  ;;  %v2382_v11 = vadd.f32 %v1715_v61, %v10908_v53  ;;  %v2759_v2 = vadd.f32 %v5718_v28, %v2758_v57  ;;  %6535 = vmatmul.mubr.bf16.gmra.mxu0 %v5753_v42  ;;  %vm9547_vm3 = vmand %vm2830_vm5, %vm2833_vm8  ;;  %vm2839_vm1 = vcmp.ge.s32.totalorder %v8796_v8, %v7861_v48  ;;  %v7254_v61 = vld [vmem:[#allocation2 + $0x4] sm:$0xff]  }
 0x308   : > { %v2322_v29 = vsel %vm8587_vm6, %v2320_v40, %v2321_v14  ;;  %v6006_v45 = vpack.c.bf16 %v2216_v56, %v2216_v56  ;;  %v3223_v6 = vor.u32 %v3222_v3, %v3219_v36  ;;  %6538 = vmatprep.mubr.msk.bf16.mxu0 %vm10787_vm13, %v10786_v19  ;;  %vm9561_vm11 = vmand %vm9523_vm7, %vm2846_vm0  ;;  %vm2845_vm10 = vcmp.lt.s32.totalorder %v8796_v8, %v7865_v39  ;;  %v3746_v39 = vld [vmem:[#allocation2 + $0xc] sm:$0xf]  ;;  %v7180_v40 = vld [vmem:[#allocation2 + $0x14] sm:$0xff]  }
 0x309   : > { %2362 = vst [vmem:[#allocation2 + $0x4c] sm:$0xf] %v2322_v29  ;;  %2400 = vst [vmem:[%s8540_s9 + $0x88] sm:$0xff] %v2382_v11  ;;  %v2772_v18 = vmax.f32 %v2759_v2, 0.0  ;;  %v5771_v25 = vcombine.low %v2898_v49, %v2899_v37  ;;  %v10918_v4 = vshll.u32 %v10917_v20, 16  ;;  %v2323_v60 = vrot.slane %v2321_v14, 4 }
 0x30a   : > { %v2324_v15 = vrot.slane %v6006_v45, 7  ;;  %v2777_v62 = vadd.f32 %v2774_v17, %v10919_v58  ;;  %vm2847_vm0 = vmand %vm9537_vm4, %vm2844_vm9  ;;  %v3224_v10 = vsel %vm10902_vm12, %v9473_v51, %v3223_v6  ;;  %v10921_v13 = vmax.f32 %v10920_v27, 0.0  ;;  %v9608_v17 = vld [vmem:[#allocation2 + $0x14] sm:$0xff]   ;;  %v9610_v2 = vld [vmem:[#allocation2 + $0x1c] sm:$0xff]  }
 0x30b   : > { %v3495_v9 = vrot.slane %v10918_v4, 1  ;;  %v2762_v43 = vadd.f32 %v5718_v28, %v2761_v41  ;;  %vm9584_vm5 = vmand %vm9547_vm3, %vm2839_vm1  ;;  %6583 = vmatmul.mubr.bf16.gmra.mxu1 %v3224_v10  ;;  %v3226_v63 = vshrl.u32 %v5771_v25, 16  ;;  %v3498_v55 = vshll.u32 %v9541_v21, 16  ;;  %v2900_v44 = vld [vmem:[#allocation2 + $0x48] sm:$0xf]  ;;  %v7178_v45 = vld [vmem:[%s10623_s5 + $0x138] sm:$0xff]  }
 0x30c   : > { %v2775_v24 = vadd.f32 %v2772_v18, %v10921_v13  ;;  %v2325_v51 = vsel %vm8587_vm6, %v2323_v60, %v2324_v15  ;;  %v2326_v1 = vrot.slane %v2324_v15, 4  ;;  %v3229_v23 = vshll.u32 %v5771_v25, 16  ;;  %6586 = vmatprep.mubr.msk.bf16.mxu1 %vm10787_vm13, %v10786_v19  ;;  %vm2848_vm2 = vmand %vm9584_vm5, %vm2845_vm10  ;;  %v7182_v60 = vld [vmem:[%s10623_s5 + $0x130] sm:$0xff]   ;;  %v4086_v27 = vld [vmem:[#allocation2 + $0xc] sm:$0xe] }
 0x30d   : > { %2363 = vst [vmem:[#allocation2 + $0x50] sm:$0xf] %v2325_v51  ;;  %v2773_v5 = vmax.f32 %v2762_v43, 0.0  ;;  %v5754_v31 = vcombine.low %v2899_v37, %v2900_v44  ;;  %v5772_v28 = vcombine.low %v2900_v44, %v2900_v44  ;;  %v2858_v32 = vsel %vm9561_vm11, %v2777_v62, 0.0  ;;  %vm10926_vm14 = vmmov %vm10902_vm12  ;;  %v9630_v62 = vld [vmem:[#allocation2 + $0x1c] sm:$0xff]  }
 0x30e   : > { %v2856_v48 = vsel %vm2847_vm0, %v2775_v24, 0.0  ;;  %2364 = vst [vmem:[#allocation2 + $0x54] sm:$0x1] %v2326_v1  ;;  %v3228_v52 = vrot.slane %v3226_v63, 3  ;;  %v3231_v46 = vrot.slane %v3229_v23, 4  ;;  %v10925_v59 = vmax.f32 %v10924_v47, 0.0  ;;  %vm10927_vm8 = vmmov %vm10902_vm12 }
 0x30f   : > { %v6007_v7 = vpack.c.bf16 %v2856_v48, %v2856_v48  ;;  %6539 = vmatmul.mubr.bf16.gmra.mxu0 %v5754_v31  ;;  %v3235_v16 = vshrl.u32 %v5772_v28, 16  ;;  %v3238_v49 = vshll.u32 %v5772_v28, 16  ;;  %vm3489_vm15 = vsmask.f32 7424  ;;  %v9637_v63 = vld [vmem:[#allocation2 + $0x24] sm:$0xff]   ;;  %v9662_v47 = vld [vmem:[#allocation2 + $0x34] sm:$0xff]  }
 0x310   : > { %v2776_v54 = vadd.f32 %v2773_v5, %v10925_v59  ;;  %v3232_v53 = vor.u32 %v3231_v46, %v3228_v52  ;;  %6610 = vmatprep.mubr.msk.bf16.mxu0 %vm10787_vm13, %v10786_v19  ;;  %v3491_v0 = vshrl.u32 %v7254_v61, 16  ;;  %v6009_v8 = vpack.c.bf16 %v2858_v32, %v2858_v32  ;;  %v9649_v48 = vld [vmem:[#allocation2 + $0x24] sm:$0xff]   ;;  %v9651_v5 = vld [vmem:[#allocation2 + $0x2c] sm:$0xff]   ;;  %v9664_v59 = vld [vmem:[#allocation2 + $0x3c] sm:$0xff]  }
 0x311   : > { %v2869_v22 = vrot.slane %v6007_v7, 7  ;;  %v3500_v36 = vrot.slane %v3498_v55, 1  ;;  %v5831_v14 = vcombine.low %v3746_v39, %v9593_v12  ;;  %v3237_v57 = vrot.slane %v3235_v16, 3  ;;  %v7190_v32 = vld [vmem:[%s10623_s5 + $0x120] sm:$0xff]  }
 0x312   : > { %v2857_v42 = vsel %vm2848_vm2, %v2776_v54, 0.0  ;;  %v3240_v3 = vrot.slane %v3238_v49, 4  ;;  %v3233_v56 = vsel %vm10926_vm14, %v3223_v6, %v3232_v53  ;;  %v3496_v11 = vor.u32 %v3495_v9, %v3491_v0  ;;  %v7199_v54 = vld [vmem:[%s10623_s5 + $0x178] sm:$0xff]  }
 0x313   : > { %2879 = vst [vmem:[#allocation2 + $0x54] sm:$0xe] %v2869_v22  ;;  %v6008_v33 = vpack.c.bf16 %v2857_v42, %v2857_v42  ;;  %6587 = vmatmul.mubr.bf16.gmra.mxu1 %v3233_v56  ;;  %v2870_v50 = vrot.slane %v2869_v22, 4  ;;  %v3506_v26 = vshll.u32 %v7180_v40, 16  ;;  %v3833_v37 = vshll.u32 %v5831_v14, 16  ;;  %v9679_v42 = vld [vmem:[#allocation2 + $0x44] sm:$0xff]  }
 0x314   : > { %6590 = vmatprep.mubr.msk.bf16.mxu1 %vm10787_vm13, %v10786_v19  ;;  %v3501_v38 = vsel %vm3489_vm15, %v3496_v11, %v3500_v36  ;;  %v2874_v6 = vrot.slane %v6009_v8, 7  ;;  %v3241_v25 = vor.u32 %v3240_v3, %v3237_v57  ;;  %v3838_v20 = vshll.u32 %v9608_v17, 16 }
 0x315   : > { %v2871_v29 = vrot.slane %v6008_v33, 7  ;;  %v3514_v4 = vshll.u32 %v9610_v2, 16  ;;  %v3508_v15 = vrot.slane %v3506_v26, 1  ;;  %v3835_v58 = vrot.slane %v3833_v37, 1 }
 0x316   : > { %v3242_v41 = vsel %vm10927_vm8, %v3232_v53, %v3241_v25  ;;  %v3502_v34 = vshrl.u32 %v9541_v21, 16  ;;  %v3842_v10 = vshrl.u32 %v9608_v17, 16  ;;  %v3831_v13 = vshrl.u32 %v5831_v14, 16  ;;  %v7186_v21 = vld [vmem:[%s10623_s5 + $0x128] sm:$0xff]  }
 0x317   : > { %v2872_v30 = vsel %vm8587_vm6, %v2870_v50, %v2871_v29  ;;  %v2873_v18 = vrot.slane %v2871_v29, 4  ;;  %6611 = vmatmul.mubr.bf16.vlgmr.msra.gmra.mxu0 %v3501_v38  ;;  %v3840_v24 = vrot.slane %v3838_v20, 1  ;;  %v3510_v43 = vshrl.u32 %v7180_v40, 16  ;;  %v7193_v50 = vld [vmem:[%s10623_s5 + $0x118] sm:$0xff]  }
 0x318   : > { %2880 = vst [vmem:[#allocation2 + $0x58] sm:$0xf] %v2872_v30  ;;  %6699 = vmatpush3.bf16.msra.mxu0 %v7178_v45  ;;  %6614 = vmatprep.mubr.msk.bf16.mxu0 %vm10787_vm13, %v10786_v19  ;;  %v9635_v35 = vrot.slane %v3514_v4, 1  ;;  %v3504_v55 = vor.u32 %v3502_v34, %v3500_v36  ;;  %v9645_v51 = vcombine.low %v4086_v27, %v9593_v12  ;;  %v3846_v23 = vshll.u32 %v9630_v62, 16  ;;  %v9692_v45 = vld [vmem:[#allocation2 + $0x4c] sm:$0xff]  }
 0x319   : > { %v2875_v9 = vsel %vm8587_vm6, %v2873_v18, %v2874_v6  ;;  %6700 = vmatprep.subr.bf16.mxu0 %v10786_v19  ;;  %v3836_v1 = vor.u32 %v3835_v58, %v3831_v13  ;;  %v3512_v44 = vor.u32 %v3510_v43, %v3508_v15  ;;  %v4336_v28 = vrot.slane %v3842_v10, 1  ;;  %v7202_v6 = vld [vmem:[%s10623_s5 + $0x170] sm:$0xff]  }
 0x31a   : > { %2881 = vst [vmem:[#allocation2 + $0x5c] sm:$0x3] %v2875_v9  ;;  %v3509_v31 = vsel %vm3489_vm15, %v3504_v55, %v3508_v15  ;;  %vm4327_vm6 = vsmask.f32 6400  ;;  %v3850_v52 = vshrl.u32 %v9630_v62, 16  ;;  %v3854_v46 = vshll.u32 %v9637_v63, 16 }
 0x31b   : > { %6591 = vmatmul.mubr.bf16.gmra.mxu1 %v3242_v41  ;;  %v3841_v12 = vsel %vm3489_vm15, %v3836_v1, %v3840_v24  ;;  %v3517_v7 = vsel %vm3489_vm15, %v3512_v44, %v9635_v35  ;;  %v3858_v16 = vshrl.u32 %v9637_v63, 16  ;;  %v4329_v49 = vshrl.u32 %v9645_v51, 16  ;;  %v7196_v27 = vld [vmem:[%s10623_s5 + $0x110] sm:$0xff]  }
 0x31c   : > { %6701 = vmatpush3.bf16.msra.mxu0 %v7182_v60  ;;  %6662 = vmatprep.mubr.msk.bf16.mxu1 %vm10787_vm13, %v10786_v19  ;;  %v4332_v22 = vshll.u32 %v9645_v51, 16  ;;  %v4337_v53 = vrot.slane %v3838_v20, 2  ;;  %v3844_v61 = vor.u32 %v3842_v10, %v3840_v24  ;;  %v9674_v0 = vrot.slane %v3846_v23, 1 }
 0x31d   : > { %6702 = vmatprep.subr.bf16.mxu0 %v10786_v19  ;;  %v3522_v39 = vshll.u32 %v9649_v48, 16  ;;  %v3866_v8 = vshrl.u32 %v9651_v5, 16  ;;  %v3862_v36 = vshll.u32 %v9651_v5, 16  ;;  %v4331_v40 = vrot.slane %v4329_v49, 1 }
 0x31e   : > { %v4334_v14 = vrot.slane %v4332_v22, 2  ;;  %v4338_v33 = vor.u32 %v4337_v53, %v4336_v28  ;;  %v3870_v57 = vshll.u32 %v9662_v47, 16  ;;  %v3874_v3 = vshrl.u32 %v9662_v47, 16  ;;  %v9741_v28 = vld [vmem:[#allocation2 + $0x2c] sm:$0xff]  }
 0x31f   : > { %6615 = vmatmul.mubr.bf16.gmra.mxu0 %v3509_v31  ;;  %v4340_v56 = vrot.slane %v3850_v52, 1  ;;  %v4341_v11 = vrot.slane %v3846_v23, 2  ;;  %v3878_v29 = vshll.u32 %v9664_v59, 16  ;;  %v4344_v26 = vrot.slane %v3858_v16, 1 }
 0x320   : > { %6618 = vmatprep.mubr.msk.bf16.mxu0 %vm10787_vm13, %v10786_v19  ;;  %6703 = vmatpush3.bf16.msra.mxu0 %v7186_v21  ;;  %v4335_v38 = vor.u32 %v4334_v14, %v4331_v40  ;;  %v4345_v37 = vrot.slane %v3854_v46, 2  ;;  %v3882_v30 = vshrl.u32 %v9664_v59, 16  ;;  %v3886_v18 = vshll.u32 %v9679_v42, 16  ;;  %v7204_v21 = vld [vmem:[%s10623_s5 + $0x168] sm:$0xff]  }
 0x321   : > { %6704 = vmatprep.subr.bf16.mxu0 %v10786_v19  ;;  %v4342_v25 = vor.u32 %v4341_v11, %v4340_v56  ;;  %v4348_v20 = vrot.slane %v3866_v8, 1  ;;  %v3890_v4 = vshrl.u32 %v9679_v42, 16  ;;  %v4349_v15 = vrot.slane %v3862_v36, 2  ;;  %v7232_v53 = vld [vmem:[#allocation2 + $0x54] ss:$0 sps:$4 sm:$0x33]  }
 0x322   : > { %v9709_v9 = vsel %vm4327_vm6, %v4335_v38, %v4338_v33  ;;  %v4346_v60 = vor.u32 %v4345_v37, %v4344_v26  ;;  %v3518_v58 = vshrl.u32 %v9610_v2, 16  ;;  %v4352_v34 = vrot.slane %v3874_v3, 1 }
 0x323   : > { %6663 = vmatmul.mubr.bf16.vlgmr.msra.gmra.mxu1 %v3841_v12  ;;  %v9715_v41 = vsel %vm4327_vm6, %v4338_v33, %v4342_v25  ;;  %v4353_v10 = vrot.slane %v3870_v57, 2  ;;  %v3894_v13 = vshll.u32 %v9692_v45, 16  ;;  %v3898_v2 = vshrl.u32 %v9692_v45, 16  ;;  %v7207_v33 = vld [vmem:[%s10623_s5 + $0x160] sm:$0xff]  }
 0x324   : > { %6666 = vmatprep.mubr.msk.bf16.mxu1 %vm10787_vm13, %v10786_v19  ;;  %6705 = vmatpush3.bf16.msra.mxu0 %v7190_v32  ;;  %v9729_v24 = vsel %vm4327_vm6, %v4342_v25, %v4346_v60  ;;  %v4350_v43 = vor.u32 %v4349_v15, %v4348_v20  ;;  %v3524_v55 = vrot.slane %v3522_v39, 1  ;;  %v4356_v44 = vrot.slane %v3882_v30, 1 }
 0x325   : > { %6706 = vmatprep.subr.bf16.mxu0 %v10786_v19  ;;  %6751 = vmatpush3.bf16.msra.mxu1 %v7199_v54  ;;  %v4354_v1 = vor.u32 %v4353_v10, %v4352_v34  ;;  %v4357_v23 = vrot.slane %v3878_v29, 2  ;;  %v3849_v31 = vsel %vm3489_vm15, %v3844_v61, %v9674_v0  ;;  %v4360_v12 = vrot.slane %v3890_v4, 1  ;;  %v7200_v61 = vld [vmem:[%s10623_s5 + $0x108] sm:$0xff]   ;;  %v7194_v10 = vld [vmem:[#allocation2 + $0x34] sm:$0xff]  }
 0x326   : > { %6752 = vmatprep.subr.bf16.mxu1 %v10786_v19  ;;  %v9745_v32 = vsel %vm4327_vm6, %v4346_v60, %v4350_v43  ;;  %v3520_v54 = vor.u32 %v3518_v58, %v9635_v35  ;;  %v4364_v40 = vrot.slane %v3898_v2, 1  ;;  %v4365_v35 = vrot.slane %v3894_v13, 2  ;;  %v7209_v60 = vld [vmem:[%s10623_s5 + $0x158] sm:$0xff]  }
 0x327   : > { %6619 = vmatmul.mubr.bf16.gmra.mxu0 %v3517_v7  ;;  %v4361_v7 = vrot.slane %v3886_v18, 2  ;;  %v9753_v49 = vsel %vm4327_vm6, %v4350_v43, %v4354_v1  ;;  %v4358_v22 = vor.u32 %v4357_v23, %v4356_v44  ;;  %v3856_v11 = vrot.slane %v3854_v46, 1  ;;  %v7205_v46 = vld [vmem:[%s10623_s5 + $0x100] sm:$0xff]  }
 0x328   : > { %6622 = vmatprep.mubr.msk.bf16.mxu0 %vm10787_vm13, %v10786_v19  ;;  %6707 = vmatpush3.bf16.msra.mxu0 %v7193_v50  ;;  %v3525_v14 = vsel %vm3489_vm15, %v3520_v54, %v3524_v55  ;;  %v3530_v50 = vshll.u32 %v9741_v28, 16  ;;  %v4366_v26 = vor.u32 %v4365_v35, %v4364_v40  ;;  %v4369_v37 = vshrl.u32 %v7232_v53, 16  ;;  %v7214_v54 = vld [vmem:[%s10623_s5 + $0x148] sm:$0xff]  }
 0x329   : > { %6708 = vmatprep.subr.bf16.mxu0 %v10786_v19  ;;  %6753 = vmatpush3.bf16.msra.mxu1 %v7202_v6  ;;  %v4362_v39 = vor.u32 %v4361_v7, %v4360_v12  ;;  %v9770_v56 = vsel %vm4327_vm6, %v4354_v1, %v4358_v22  ;;  %v4372_v6 = vshll.u32 %v7232_v53, 16  ;;  %v3852_v25 = vor.u32 %v3850_v52, %v9674_v0  ;;  %v9817_v7 = vld [vmem:[#allocation2 + $0x44] sm:$0xff]  }
 0x32a   : > { %6754 = vmatprep.subr.bf16.mxu1 %v10786_v19  ;;  %v4371_v15 = vrot.slane %v4369_v37, 1  ;;  %v3526_v58 = vshrl.u32 %v9649_v48, 16  ;;  %v3532_v34 = vrot.slane %v3530_v50, 1  ;;  %v7211_v48 = vld [vmem:[%s10623_s5 + $0x150] sm:$0xff]   ;;  %v3538_v23 = vshll.u32 %v7194_v10, 16  ;;  %v9831_v40 = vld [vmem:[#allocation2 + $0x24] sm:$0xff]  }
 0x32b   : > { %6667 = vmatmul.mubr.bf16.gmra.mxu1 %v3849_v31  ;;  %v9777_v38 = vsel %vm4327_vm6, %v4358_v22, %v4362_v39  ;;  %v9788_v20 = vsel %vm4327_vm6, %v4362_v39, %v4366_v26  ;;  %v4374_v52 = vrot.slane %v4372_v6, 2  ;;  %v3857_v0 = vsel %vm3489_vm15, %v3852_v25, %v3856_v11  ;;  %v9847_v37 = vld [vmem:[#allocation2 + $0x3c] sm:$0xff]  }
 0x32c   : > { %6670 = vmatprep.mubr.msk.bf16.mxu1 %vm10787_vm13, %v10786_v19  ;;  %6709 = vmatpush3.bf16.msra.mxu0 %v7196_v27  ;;  %v3528_v43 = vor.u32 %v3526_v58, %v3524_v55  ;;  %v3864_v55 = vrot.slane %v3862_v36, 1  ;;  %v3860_v31 = vor.u32 %v3858_v16, %v3856_v11  ;;  %v3534_v22 = vshrl.u32 %v9741_v28, 16  ;;  %v9841_v11 = vld [vmem:[#allocation2 + $0x2c] sm:$0xff]  }
 0x32d   : > { %6710 = vmatprep.subr.bf16.mxu0 %v10786_v19  ;;  %6755 = vmatpush3.bf16.msra.mxu1 %v7204_v21  ;;  %v4375_v27 = vor.u32 %v4374_v52, %v4371_v15  ;;  %v9799_v21 = vld [vmem:[#allocation2 + $0x3c] sm:$0xff]   ;;  %v3540_v53 = vrot.slane %v3538_v23, 1  ;;  %v3872_v16 = vrot.slane %v3870_v57, 1  ;;  %vm5151_vm7 = vsmask.f32 5376 }
 0x32e   : > { %6756 = vmatprep.subr.bf16.mxu1 %v10786_v19  ;;  %v3533_v44 = vsel %vm3489_vm15, %v3528_v43, %v3532_v34  ;;  %v3546_v12 = vshll.u32 %v9799_v21, 16  ;;  %v3865_v36 = vsel %vm3489_vm15, %v3860_v31, %v3864_v55  ;;  %v3536_v39 = vor.u32 %v3534_v22, %v3532_v34  ;;  %v7215_v57 = vld [vmem:[%s10623_s5 + $0x140] sm:$0xff]   ;;  %v9861_v34 = vld [vmem:[#allocation2 + $0x4c] sm:$0xff]  }
 0x32f   : > { %6623 = vmatmul.mubr.bf16.gmra.mxu0 %v3525_v14  ;;  %v9806_v1 = vsel %vm4327_vm6, %v4366_v26, %v4375_v27  ;;  %v3868_v35 = vor.u32 %v3866_v8, %v3864_v55  ;;  %v3542_v14 = vshrl.u32 %v7194_v10, 16  ;;  %v9845_v26 = vld [vmem:[#allocation2 + $0x34] sm:$0xff]   ;;  %v3876_v15 = vor.u32 %v3874_v3, %v3872_v16 }
 0x330   : > { %6626 = vmatprep.mubr.msk.bf16.mxu0 %vm10787_vm13, %v10786_v19  ;;  %6711 = vmatpush3.bf16.msra.mxu0 %v7200_v61  ;;  %v9827_v61 = vld [vmem:[#allocation2 + $0x1c] sm:$0xff]   ;;  %v9835_v28 = vrot.slane %v3546_v12, 1  ;;  %v3541_v50 = vsel %vm3489_vm15, %v3536_v39, %v3540_v53  ;;  %v3550_v52 = vshrl.u32 %v9799_v21, 16  ;;  %v10661_v58 = vshll.u32 %v9831_v40, 16 }
 0x331   : > { %6712 = vmatprep.subr.bf16.mxu0 %v10786_v19  ;;  %6757 = vmatpush3.bf16.msra.mxu1 %v7207_v33  ;;  %v3554_v33 = vshll.u32 %v9817_v7, 16  ;;  %v3873_v8 = vsel %vm3489_vm15, %v3868_v35, %v3872_v16  ;;  %v3544_v6 = vor.u32 %v3542_v14, %v3540_v53  ;;  %v10670_v25 = vshrl.u32 %v9827_v61, 16 }
 0x332   : > { %6758 = vmatprep.subr.bf16.mxu1 %v10786_v19  ;;  %v9867_v27 = vrot.slane %v3878_v29, 1  ;;  %v10662_v3 = vshrl.u32 %v9841_v11, 16  ;;  %v10666_v21 = vshll.u32 %v9841_v11, 16  ;;  %v10663_v55 = vshll.u32 %v9845_v26, 16 }
 0x333   : > { %6671 = vmatmul.mubr.bf16.gmra.mxu1 %v3857_v0  ;;  %v10668_v0 = vshrl.u32 %v9831_v40, 16  ;;  %v3549_v10 = vsel %vm3489_vm15, %v3544_v6, %v9835_v28  ;;  %v9869_v43 = vrot.slane %v3554_v33, 1  ;;  %v10665_v23 = vshrl.u32 %v9847_v37, 16 }
 0x334   : > { %6674 = vmatprep.mubr.msk.bf16.mxu1 %vm10787_vm13, %v10786_v19  ;;  %6713 = vmatpush3.bf16.msra.mxu0 %v7205_v46  ;;  %v10669_v46 = vshll.u32 %v9827_v61, 16  ;;  %v10667_v29 = vshll.u32 %v9847_v37, 16  ;;  %v5160_v12 = vrot.slane %v10670_v25, 2  ;;  %v4704_v22 = vshrl.u32 %v9861_v34, 16 }
 0x335   : > { %6759 = vmatpush3.bf16.msra.mxu1 %v7209_v60  ;;  %6802 = vmatprep.subr.bf16.mxu0 %v10786_v19  ;;  %v9852_v60 = vld [vmem:[#allocation2 + $0x44] sm:$0xff]   ;;  %v5164_v53 = vrot.slane %v10668_v0, 2  ;;  %v5165_v16 = vrot.slane %v10661_v58, 3  ;;  %v10671_v39 = vshll.u32 %v9861_v34, 16  ;;  %v5168_v33 = vrot.slane %v10662_v3, 2 }
 0x336   : > { %6760 = vmatprep.subr.bf16.mxu1 %v10786_v19  ;;  %v4695_v31 = vshrl.u32 %v9852_v60, 16  ;;  %v3881_v58 = vsel %vm3489_vm15, %v3876_v15, %v9867_v27  ;;  %v5177_v3 = vrot.slane %v10667_v29, 3  ;;  %v5184_v29 = vrot.slane %v4704_v22, 2 }
 0x337   : > { %6627 = vmatmul.mubr.bf16.gmra.mxu0 %v3533_v44  ;;  %v10664_v44 = vshrl.u32 %v9845_v26, 16  ;;  %v5185_v0 = vrot.slane %v10671_v39, 3  ;;  %v3552_v39 = vor.u32 %v3550_v52, %v9835_v28  ;;  %vm10928_vm9 = vcmask 1046528  }
 0x338   : > { %6630 = vmatprep.mubr.msk.bf16.mxu0 %vm10787_vm13, %v10786_v19  ;;  %v5180_v15 = vrot.slane %v4695_v31, 2  ;;  %vm10929_vm4 = vmmov %vm10928_vm9  ;;  %vm10943_vm2 = vcmask 1045504  }
 0x339   : > { %6761 = vmatpush3.bf16.msra.mxu1 %v7211_v48  ;;  %v9872_v48 = vld [vmem:[#allocation2 + $0x54] sm:$0xff]   ;;  %v5172_v6 = vrot.slane %v10664_v44, 2  ;;  %v7206_v44 = vld [vmem:[#allocation2 + $0x4c] ss:$0 sps:$4 sm:$0x11]   ;;  %vm10930_vm3 = vmmov %vm10929_vm4 }
 0x33a   : > { %6762 = vmatprep.subr.bf16.mxu1 %v10786_v19  ;;  %v4713_v35 = vshrl.u32 %v9872_v48, 16  ;;  %vm10931_vm1 = vmmov %vm10930_vm3 }
 0x33b   : > { %6675 = vmatmul.mubr.bf16.gmra.mxu1 %v3865_v36  ;;  %v4698_v36 = vshll.u32 %v9852_v60, 16  ;;  %vm10932_vm11 = vmmov %vm10931_vm1 }
 0x33c   : > { %6678 = vmatprep.mubr.msk.bf16.mxu1 %vm10787_vm13, %v10786_v19  ;;  %vm10933_vm10 = vmmov %vm10931_vm1 }
 0x33d   : > { %6763 = vmatpush3.bf16.msra.mxu1 %v7214_v54  ;;  %v5161_v54 = vrot.slane %v10669_v46, 3  ;;  %vm10934_vm0 = vmmov %vm10931_vm1 }
 0x33e   : > { %6764 = vmatprep.subr.bf16.mxu1 %v10786_v19  ;;  %vm10935_vm12 = vmmov %vm10934_vm0 }
 0x33f   : > { %6631 = vmatmul.mubr.bf16.gmra.mxu0 %v3541_v50  ;;  %v9895_v14 = vor.u32 %v5161_v54, %v5160_v12  ;;  %v5166_v50 = vor.u32 %v5165_v16, %v5164_v53  ;;  %v5173_v12 = vrot.slane %v10663_v55, 3  ;;  %v5176_v54 = vrot.slane %v10665_v23, 2  ;;  %v7251_v53 = vld [vmem:[#allocation2 + $0x5c] ss:$0 sps:$4 sm:$0x77]   ;;  %vm10936_vm5 = vmmov %vm10934_vm0 }
 0x340   : > { %6634 = vmatprep.mubr.msk.bf16.mxu0 %vm10787_vm13, %v10786_v19  ;;  %v5181_v55 = vrot.slane %v4698_v36, 3  ;;  %vm10949_vm14 = vmmov %vm10943_vm2 }
 0x341   : > { %6765 = vmatpush3.bf16.msra.mxu1 %v7215_v57  ;;  %v10672_v57 = vshll.u32 %v9872_v48, 16  ;;  %v9916_v16 = vsel %vm5151_vm7, %v9895_v14, %v5166_v50  ;;  %v5174_v23 = vor.u32 %v5173_v12, %v5172_v6  ;;  %v5186_v12 = vor.u32 %v5185_v0, %v5184_v29  ;;  %vm10950_vm8 = vmmov %vm10943_vm2 }
 0x342   : > { %6854 = vmatprep.subr.bf16.mxu1 %v10786_v19  ;;  %v5182_v25 = vor.u32 %v5181_v55, %v5180_v15  ;;  %v5196_v15 = vshll.u32 %v7251_v53, 16  ;;  %v3888_v0 = vrot.slane %v3886_v18, 1  ;;  %v3558_v29 = vshrl.u32 %v9817_v7, 16 }
 0x343   : > { %6679 = vmatmul.mubr.bf16.gmra.mxu1 %v3873_v8  ;;  %v5169_v8 = vrot.slane %v10666_v21, 3  ;;  %v5178_v21 = vor.u32 %v5177_v3, %v5176_v54  ;;  %v5193_v54 = vshrl.u32 %v7251_v53, 16 }
 0x344   : > { %6682 = vmatprep.mubr.msk.bf16.mxu1 %vm10787_vm13, %v10786_v19  ;;  %v5198_v52 = vrot.slane %v5196_v15, 3  ;;  %v3560_v53 = vor.u32 %v3558_v29, %v9869_v43  ;;  %v3892_v7 = vor.u32 %v3890_v4, %v3888_v0  ;;  %v4110_v15 = vrot.slane %v9630_v62, 1  ;;  %v7218_v62 = vld [vmem:[%s10623_s5 + $0x1a0] sm:$0xff]   ;;  %v7222_v29 = vld [vmem:[%s10623_s5 + $0x188] sm:$0xff]  }
 0x345   : > { %v9937_v3 = vsel %vm5151_vm7, %v5174_v23, %v5178_v21  ;;  %v9943_v55 = vsel %vm5151_vm7, %v5178_v21, %v5182_v25  ;;  %v3884_v21 = vor.u32 %v3882_v30, %v9867_v27  ;;  %v3896_v27 = vrot.slane %v3894_v13, 1  ;;  %v7212_v13 = vld [vmem:[%s10623_s5 + $0x1b8] sm:$0xff]  }
 0x347   : > { %6635 = vmatmul.mubr.bf16.gmra.mxu0 %v3549_v10  ;;  %v5170_v10 = vor.u32 %v5169_v8, %v5168_v33  ;;  %v5188_v33 = vrot.slane %v4713_v35, 2  ;;  %v5189_v8 = vrot.slane %v10672_v57, 3  ;;  %v3562_v57 = vshll.u32 %v7206_v44, 16 }
 0x348   : > { %6638 = vmatprep.mubr.msk.bf16.mxu0 %vm10787_vm13, %v10786_v19  ;;  %v3889_v44 = vsel %vm3489_vm15, %v3884_v21, %v3888_v0  ;;  %v4112_v0 = vrot.slane %v9637_v63, 1  ;;  %v7223_v21 = vld [vmem:[%s10623_s5 + $0x1f0] sm:$0xff]  }
 0x349   : > { %v9927_v46 = vsel %vm5151_vm7, %v5166_v50, %v5170_v10  ;;  %v9934_v6 = vsel %vm5151_vm7, %v5170_v10, %v5174_v23  ;;  %v5190_v50 = vor.u32 %v5189_v8, %v5188_v33  ;;  %v5195_v10 = vrot.slane %v5193_v54, 2  ;;  %v9971_v33 = vld [vmem:[#allocation2 + $0x54] ss:$0 sps:$4 sm:$0x11]  }
 0x34a   : > { %v3557_v23 = vsel %vm3489_vm15, %v3552_v39, %v9869_v43  ;;  %v3564_v39 = vrot.slane %v3562_v57, 1  ;;  %v3897_v57 = vsel %vm3489_vm15, %v3892_v7, %v3896_v27  ;;  %v4108_v43 = vrot.slane %v9608_v17, 1  ;;  %v7216_v17 = vld [vmem:[%s10623_s5 + $0x1b0] sm:$0xff]  }
 0x34b   : > { %6683 = vmatmul.mubr.bf16.gmra.mxu1 %v3881_v58  ;;  %v9946_v58 = vsel %vm5151_vm7, %v5182_v25, %v5186_v12  ;;  %v9953_v28 = vsel %vm5151_vm7, %v5186_v12, %v5190_v50  ;;  %v5199_v25 = vor.u32 %v5198_v52, %v5195_v10  ;;  %v3902_v8 = vshll.u32 %v9971_v33, 16  ;;  %v7219_v52 = vld [vmem:[%s10623_s5 + $0x198] sm:$0xff]   ;;  %v7220_v63 = vld [vmem:[%s10623_s5 + $0x190] sm:$0xff]  }
 0x34c   : > { %6686 = vmatprep.mubr.msk.bf16.mxu1 %vm10787_vm13, %v10786_v19  ;;  %v3565_v30 = vsel %vm3489_vm15, %v3560_v53, %v3564_v39  ;;  %v4107_v12 = vrot.slane %v9645_v51, 1  ;;  %v3900_v54 = vor.u32 %v3898_v2, %v3896_v27  ;;  %v7217_v2 = vld [vmem:[%s10623_s5 + $0x1a8] sm:$0xff]   ;;  %v4111_v10 = vsel %vm10929_vm4, %v4108_v43, %v4110_v15  ;;  %v7226_v39 = vld [vmem:[%s10623_s5 + $0x1e0] sm:$0xff]   ;;  %v7227_v53 = vld [vmem:[%s10623_s5 + $0x1d8] sm:$0xff]  }
 0x34d   : > { %v9963_v18 = vsel %vm5151_vm7, %v5190_v50, %v5199_v25  ;;  %v3904_v50 = vrot.slane %v3902_v8, 1  ;;  %v4113_v25 = vsel %vm10930_vm3, %v4110_v15, %v4112_v0  ;;  %v7230_v27 = vld [vmem:[%s10623_s5 + $0x1d0] sm:$0xff]   ;;  %v4122_v8 = vrot.slane %v9692_v45, 1  ;;  %vm10955_vm4 = vmmov %vm10943_vm2 }
 0x34e   : > { %v4109_v4 = vsel %vm10928_vm9, %v4107_v12, %v4108_v43  ;;  %v4558_v12 = vld [vmem:[#allocation2 + $0x18] sm:$0xf]  ;;  %v4124_v45 = vrot.slane %v9971_v33, 1  ;;  %vm10952_vm9 = vmmov %vm10943_vm2 }
 0x34f   : > { %6639 = vmatmul.mubr.bf16.gmra.mxu0 %v3557_v23  ;;  %v3905_v51 = vsel %vm3489_vm15, %v3900_v54, %v3904_v50  ;;  %v7221_v23 = vld [vmem:[%s10623_s5 + $0x1f8] sm:$0xff]   ;;  %vm10946_vm15 = vmmov %vm10943_vm2 }
 0x350   : > { %6642 = vmatprep.mubr.msk.bf16.mxu0 %vm10787_vm13, %v10786_v19  ;;  %vm10957_vm3 = vmmov %vm10943_vm2 }
 0x353   : > { %6687 = vmatmul.mubr.bf16.gmra.mxu1 %v3889_v44  ;;  %v4114_v44 = vrot.slane %v9651_v5, 1 }
 0x354   : > { %6690 = vmatprep.mubr.msk.bf16.mxu1 %vm10787_vm13, %v10786_v19 }
 0x355   : > { %v4115_v5 = vsel %vm10931_vm1, %v4112_v0, %v4114_v44  ;;  %vm10958_vm1 = vmmov %vm10943_vm2 }
 0x357   : > { %6643 = vmatmul.mubr.bf16.gmra.mxu0 %v3565_v30  ;;  %v4116_v30 = vrot.slane %v9662_v47, 1  ;;  %v7233_v47 = vld [vmem:[%s10623_s5 + $0x1c8] sm:$0xff]  }
 0x358   : > { %6714 = vmatprep.mubr.msk.bf16.mxu0 %vm10787_vm13, %v10786_v19 }
 0x359   : > { %v4117_v7 = vsel %vm10932_vm11, %v4114_v44, %v4116_v30 }
 0x35b   : > { %6691 = vmatmul.mubr.bf16.gmra.mxu1 %v3897_v57  ;;  %v7235_v57 = vld [vmem:[%s10623_s5 + $0x1c0] sm:$0xff]  }
 0x35c   : > { %6694 = vmatprep.mubr.msk.bf16.mxu1 %vm10787_vm13, %v10786_v19 }
 0x35f   : > { %6715 = vmatmul.mubr.bf16.vlgmr.msra.gmra.mxu0 %v4109_v4 }
 0x360   : > { %6803 = vmatpush3.bf16.msra.mxu0 %v7212_v13  ;;  %6718 = vmatprep.mubr.msk.bf16.mxu0 %vm10787_vm13, %v10786_v19  ;;  %v4557_v13 = vld [vmem:[#allocation2 + $0x14] sm:$0xe] }
 0x361   : > { %6804 = vmatprep.subr.bf16.mxu0 %v10786_v19  ;;  %v5915_v4 = vcombine.low %v4557_v13, %v4558_v12 }
 0x363   : > { %6695 = vmatmul.mubr.bf16.gmra.mxu1 %v3905_v51  ;;  %v4642_v51 = vshrl.u32 %v5915_v4, 16  ;;  %v4645_v15 = vshll.u32 %v5915_v4, 16 }
 0x364   : > { %6805 = vmatpush3.bf16.msra.mxu0 %v7216_v17  ;;  %6766 = vmatprep.mubr.msk.bf16.mxu1 %vm10787_vm13, %v10786_v19 }
 0x365   : > { %6806 = vmatprep.subr.bf16.mxu0 %v10786_v19 }
 0x367   : > { %6719 = vmatmul.mubr.bf16.gmra.mxu0 %v4111_v10 }
 0x368   : > { %6722 = vmatprep.mubr.msk.bf16.mxu0 %vm10787_vm13, %v10786_v19  ;;  %6807 = vmatpush3.bf16.msra.mxu0 %v7217_v2 }
 0x369   : > { %6808 = vmatprep.subr.bf16.mxu0 %v10786_v19 }
 0x36b   : > { %6767 = vmatmul.mubr.bf16.vlgmr.msra.gmra.mxu1 %v9709_v9  ;;  %v7224_v9 = vld [vmem:[%s10623_s5 + $0x1e8] sm:$0xff]  }
 0x36c   : > { %6770 = vmatprep.mubr.msk.bf16.mxu1 %vm10787_vm13, %v10786_v19  ;;  %6809 = vmatpush3.bf16.msra.mxu0 %v7218_v62  ;;  %v4125_v62 = vsel %vm10936_vm5, %v4122_v8, %v4124_v45  ;;  %v4910_v45 = vld [vmem:[#allocation2 + $0x14] sm:$0xc] }
 0x36d   : > { %6810 = vmatprep.subr.bf16.mxu0 %v10786_v19  ;;  %6855 = vmatpush3.bf16.msra.mxu1 %v7221_v23  ;;  %v10937_v23 = vshrl.u32 %v9827_v61, 16 }
 0x36e   : > { %6856 = vmatprep.subr.bf16.mxu1 %v10786_v19 }
 0x36f   : > { %6723 = vmatmul.mubr.bf16.gmra.mxu0 %v4113_v25  ;;  %v4652_v0 = vrot.slane %v10937_v23, 1  ;;  %v4644_v25 = vrot.slane %v4642_v51, 1  ;;  %v7239_v51 = vld [vmem:[%s10623_s5 + $0x228] sm:$0xff]   ;;  %v10941_v23 = vshrl.u32 %v9841_v11, 16 }
 0x370   : > { %6726 = vmatprep.mubr.msk.bf16.mxu0 %vm10787_vm13, %v10786_v19  ;;  %6811 = vmatpush3.bf16.msra.mxu0 %v7219_v52  ;;  %v10938_v52 = vshll.u32 %v9827_v61, 16 }
 0x371   : > { %6812 = vmatprep.subr.bf16.mxu0 %v10786_v19  ;;  %6857 = vmatpush3.bf16.msra.mxu1 %v7223_v21 }
 0x372   : > { %6858 = vmatprep.subr.bf16.mxu1 %v10786_v19  ;;  %v4655_v33 = vrot.slane %v10938_v52, 2  ;;  %v10942_v52 = vshll.u32 %v9841_v11, 16 }
 0x373   : > { %6771 = vmatmul.mubr.bf16.gmra.mxu1 %v9715_v41  ;;  %v7225_v41 = vld [vmem:[%s10623_s5 + $0x180] sm:$0xff]  }
 0x374   : > { %6774 = vmatprep.mubr.msk.bf16.mxu1 %vm10787_vm13, %v10786_v19  ;;  %6813 = vmatpush3.bf16.msra.mxu0 %v7220_v63  ;;  %v4647_v63 = vrot.slane %v4645_v15, 2  ;;  %v4656_v44 = vor.u32 %v4655_v33, %v4652_v0  ;;  %v4670_v0 = vrot.slane %v10941_v23, 1  ;;  %v4673_v33 = vrot.slane %v10942_v52, 2 }
 0x375   : > { %6814 = vmatprep.subr.bf16.mxu0 %v10786_v19  ;;  %6859 = vmatpush3.bf16.msra.mxu1 %v7224_v9  ;;  %v4936_v52 = vrot.slane %v9841_v11, 2 }
 0x376   : > { %6860 = vmatprep.subr.bf16.mxu1 %v10786_v19 }
 0x377   : > { %6727 = vmatmul.mubr.bf16.gmra.mxu0 %v4115_v5 }
 0x378   : > { %6730 = vmatprep.mubr.msk.bf16.mxu0 %vm10787_vm13, %v10786_v19  ;;  %6815 = vmatpush3.bf16.msra.mxu0 %v7222_v29 }
 0x379   : > { %6816 = vmatprep.subr.bf16.mxu0 %v10786_v19  ;;  %6861 = vmatpush3.bf16.msra.mxu1 %v7226_v39 }
 0x37a   : > { %6862 = vmatprep.subr.bf16.mxu1 %v10786_v19 }
 0x37b   : > { %6775 = vmatmul.mubr.bf16.gmra.mxu1 %v9729_v24  ;;  %v4118_v24 = vrot.slane %v9664_v59, 1  ;;  %v4120_v59 = vrot.slane %v9679_v42, 1 }
 0x37c   : > { %6778 = vmatprep.mubr.msk.bf16.mxu1 %vm10787_vm13, %v10786_v19  ;;  %6817 = vmatpush3.bf16.msra.mxu0 %v7225_v41  ;;  %v4648_v41 = vor.u32 %v4647_v63, %v4644_v25 }
 0x37d   : > { %6863 = vmatpush3.bf16.msra.mxu1 %v7227_v53  ;;  %6906 = vmatprep.subr.bf16.mxu0 %v10786_v19  ;;  %v4119_v43 = vsel %vm10933_vm10, %v4116_v30, %v4118_v24  ;;  %v4123_v42 = vsel %vm10935_vm12, %v4120_v59, %v4122_v8  ;;  %v7231_v53 = vld [vmem:[%s10623_s5 + $0x238] sm:$0xff]   ;;  %v7236_v8 = vld [vmem:[%s10623_s5 + $0x230] sm:$0xff]  }
 0x37e   : > { %6864 = vmatprep.subr.bf16.mxu1 %v10786_v19 }
 0x37f   : > { %6731 = vmatmul.mubr.bf16.gmra.mxu0 %v4117_v7  ;;  %v4657_v7 = vsel %vm4327_vm6, %v4648_v41, %v4656_v44 }
 0x380   : > { %6734 = vmatprep.mubr.msk.bf16.mxu0 %vm10787_vm13, %v10786_v19 }
 0x381   : > { %6865 = vmatpush3.bf16.msra.mxu1 %v7230_v27 }
 0x382   : > { %6866 = vmatprep.subr.bf16.mxu1 %v10786_v19 }
 0x383   : > { %6779 = vmatmul.mubr.bf16.gmra.mxu1 %v9745_v32  ;;  %v4121_v32 = vsel %vm10934_vm0, %v4118_v24, %v4120_v59 }
 0x384   : > { %6782 = vmatprep.mubr.msk.bf16.mxu1 %vm10787_vm13, %v10786_v19 }
 0x385   : > { %6867 = vmatpush3.bf16.msra.mxu1 %v7233_v47  ;;  %v10939_v47 = vshrl.u32 %v9831_v40, 16 }
 0x386   : > { %6868 = vmatprep.subr.bf16.mxu1 %v10786_v19 }
 0x387   : > { %6735 = vmatmul.mubr.bf16.gmra.mxu0 %v4119_v43  ;;  %v4661_v24 = vrot.slane %v10939_v47, 1 }
 0x388   : > { %6738 = vmatprep.mubr.msk.bf16.mxu0 %vm10787_vm13, %v10786_v19 }
 0x389   : > { %6869 = vmatpush3.bf16.msra.mxu1 %v7235_v57 }
 0x38b   : > { %6783 = vmatmul.mubr.bf16.gmra.mxu1 %v9753_v49  ;;  %v3078_v49 = vpop.f32.mrf.mxu0 }
 0x38c   : > { %6786 = vmatprep.mubr.msk.bf16.mxu1 %vm10787_vm13, %v10786_v19 }
 0x38d   : > { %v6512_v54 = vpop.f32.mrf.mxu0 }
 0x38f   : > { %6739 = vmatmul.mubr.bf16.gmra.mxu0 %v4121_v32 }
 0x390   : > { %6742 = vmatprep.mubr.msk.bf16.mxu0 %vm10787_vm13, %v10786_v19 }
 0x391   : > { %v10100_v50 = vpop.f32.mrf.mxu1 }
 0x393   : > { %6787 = vmatmul.mubr.bf16.gmra.mxu1 %v9770_v56  ;;  %v3081_v56 = vpop.f32.mrf.mxu0  ;;  %v6560_v17 = vpop.f32.mrf.mxu1 }
 0x394   : > { %6790 = vmatprep.mubr.msk.bf16.mxu1 %vm10787_vm13, %v10786_v19  ;;  %v10141_v17 = vcombine.low %v4910_v45, %v4558_v12 }
 0x395   : > { %v6513_v2 = vpop.f32.mrf.mxu0  ;;  %v10106_v10 = vpop.f32.mrf.mxu1 }
 0x396   : > { %v4931_v25 = vrot.slane %v10141_v17, 2 }
 0x397   : > { %6743 = vmatmul.mubr.bf16.gmra.mxu0 %v4123_v42  ;;  %v3086_v21 = vpop.f32.mrf.mxu0 }
 0x398   : > { %6746 = vmatprep.mubr.msk.bf16.mxu0 %vm10787_vm13, %v10786_v19 }
 0x399   : > { %v6516_v9 = vpop.f32.mrf.mxu0 }
 0x39b   : > { %6791 = vmatmul.mubr.bf16.gmra.mxu1 %v9777_v38  ;;  %v6561_v38 = vpop.f32.mrf.mxu1  ;;  %v3089_v39 = vpop.f32.mrf.mxu0 }
 0x39c   : > { %6794 = vmatprep.mubr.msk.bf16.mxu1 %vm10787_vm13, %v10786_v19 }
 0x39d   : > { %v3342_v29 = vpop.f32.mrf.mxu1  ;;  %v6517_v27 = vpop.f32.mrf.mxu0 }
 0x39e   : > { %v10116_v5 = vadd.f32 %v3342_v29, %v3078_v49  ;;  %v4674_v29 = vor.u32 %v4673_v33, %v4670_v0  ;;  %v10947_v33 = vshrl.u32 %v9847_v37, 16 }
 0x39f   : > { %6747 = vmatmul.mubr.bf16.gmra.mxu0 %v4125_v62  ;;  %v6564_v30 = vpop.f32.mrf.mxu1  ;;  %v4932_v62 = vrot.slane %v9827_v61, 2  ;;  %v7241_v61 = vld [vmem:[%s10623_s5 + $0x220] sm:$0xff]  }
 0x3a0   : > { %6818 = vmatprep.mubr.msk.bf16.mxu0 %vm10787_vm13, %v10786_v19  ;;  %v7243_v30 = vld [vmem:[%s10623_s5 + $0x218] sm:$0xff]  }
 0x3a1   : > { %v3345_v43 = vpop.f32.mrf.mxu1  ;;  %v3094_v59 = vpop.f32.mrf.mxu0 }
 0x3a2   : > { %v10128_v32 = vadd.f32 %v3345_v43, %v3081_v56  ;;  %v10945_v43 = vshll.u32 %v9845_v26, 16 }
 0x3a3   : > { %6795 = vmatmul.mubr.bf16.gmra.mxu1 %v9788_v20  ;;  %v10940_v20 = vshll.u32 %v9831_v40, 16  ;;  %v6565_v42 = vpop.f32.mrf.mxu1  ;;  %v6520_v49 = vpop.f32.mrf.mxu0 }
 0x3a4   : > { %6798 = vmatprep.mubr.msk.bf16.mxu1 %vm10787_vm13, %v10786_v19 }
 0x3a5   : > { %v4664_v57 = vrot.slane %v10940_v20, 2  ;;  %v3350_v4 = vpop.f32.mrf.mxu1  ;;  %v3097_v54 = vpop.f32.mrf.mxu0  ;;  %v10944_v20 = vshrl.u32 %v9845_v26, 16 }
 0x3a6   : > { %v10137_v56 = vadd.f32 %v3350_v4, %v3086_v21 }
 0x3a7   : > { %6819 = vmatmul.mubr.bf16.vlgmr.msra.gmra.mxu0 %v4657_v7  ;;  %v4665_v13 = vor.u32 %v4664_v57, %v4661_v24  ;;  %v6568_v15 = vpop.f32.mrf.mxu1  ;;  %v6521_v2 = vpop.f32.mrf.mxu0  ;;  %v4934_v24 = vrot.slane %v9831_v40, 2  ;;  %v4679_v57 = vrot.slane %v10944_v20, 1 }
 0x3a8   : > { %6907 = vmatpush3.bf16.msra.mxu0 %v7231_v53  ;;  %6822 = vmatprep.mubr.msk.bf16.mxu0 %vm10787_vm13, %v10786_v19 }
 0x3a9   : > { %6908 = vmatprep.subr.bf16.mxu0 %v10786_v19  ;;  %v3353_v12 = vpop.f32.mrf.mxu1  ;;  %v4675_v47 = vsel %vm4327_vm6, %v4665_v13, %v4674_v29  ;;  %v4935_v45 = vsel %vm10946_vm15, %v4932_v62, %v4934_v24 }
 0x3aa   : > { %v3102_v21 = vpop.f32.mrf.mxu0  ;;  %v10153_v38 = vadd.f32 %v3353_v12, %v3089_v39  ;;  %v4688_v12 = vrot.slane %v10947_v33, 1 }
 0x3ab   : > { %6799 = vmatmul.mubr.bf16.gmra.mxu1 %v9806_v1  ;;  %v4666_v1 = vsel %vm4327_vm6, %v4656_v44, %v4665_v13  ;;  %v6569_v63 = vpop.f32.mrf.mxu1  ;;  %v4933_v44 = vsel %vm10943_vm2, %v4931_v25, %v4932_v62  ;;  %v7245_v13 = vld [vmem:[%s10623_s5 + $0x210] sm:$0xff]  }
 0x3ac   : > { %6909 = vmatpush3.bf16.msra.mxu0 %v7236_v8  ;;  %6870 = vmatprep.mubr.msk.bf16.mxu1 %vm10787_vm13, %v10786_v19  ;;  %v6524_v9 = vpop.f32.mrf.mxu0 }
 0x3ad   : > { %6910 = vmatprep.subr.bf16.mxu0 %v10786_v19 }
 0x3ae   : > { %v3105_v39 = vpop.f32.mrf.mxu0 }
 0x3af   : > { %6823 = vmatmul.mubr.bf16.gmra.mxu0 %v4666_v1  ;;  %v7247_v1 = vld [vmem:[%s10623_s5 + $0x208] sm:$0xff]  }
 0x3b0   : > { %6826 = vmatprep.mubr.msk.bf16.mxu0 %vm10787_vm13, %v10786_v19  ;;  %6911 = vmatpush3.bf16.msra.mxu0 %v7239_v51  ;;  %v3358_v41 = vpop.f32.mrf.mxu1  ;;  %v6525_v7 = vpop.f32.mrf.mxu0 }
 0x3b1   : > { %6912 = vmatprep.subr.bf16.mxu0 %v10786_v19  ;;  %v10163_v53 = vadd.f32 %v3358_v41, %v3094_v59  ;;  %v4682_v59 = vrot.slane %v10945_v43, 2  ;;  %v4937_v41 = vsel %vm10949_vm14, %v4934_v24, %v4936_v52  ;;  %v4938_v43 = vrot.slane %v9845_v26, 2 }
 0x3b2   : > { %v6572_v27 = vpop.f32.mrf.mxu1  ;;  %v4700_v24 = vrot.slane %v4698_v36, 2 }
 0x3b3   : > { %6871 = vmatmul.mubr.bf16.vlgmr.msra.gmra.mxu1 %v4933_v44  ;;  %v4683_v51 = vor.u32 %v4682_v59, %v4679_v57  ;;  %v7249_v44 = vld [vmem:[%s10623_s5 + $0x200] sm:$0xff]   ;;  %v4697_v59 = vrot.slane %v4695_v31, 1 }
 0x3b4   : > { %6874 = vmatprep.mubr.msk.bf16.mxu1 %vm10787_vm13, %v10786_v19  ;;  %6913 = vmatpush3.bf16.msra.mxu0 %v7241_v61  ;;  %v3361_v8 = vpop.f32.mrf.mxu1  ;;  %v3110_v42 = vpop.f32.mrf.mxu0 }
 0x3b5   : > { %6914 = vmatprep.subr.bf16.mxu0 %v10786_v19  ;;  %v10177_v49 = vadd.f32 %v3361_v8, %v3097_v54  ;;  %v4684_v62 = vsel %vm4327_vm6, %v4674_v29, %v4683_v51 }
 0x3b6   : > { %v6573_v40 = vpop.f32.mrf.mxu1  ;;  %v6528_v4 = vpop.f32.mrf.mxu0 }
 0x3b7   : > { %6827 = vmatmul.mubr.bf16.gmra.mxu0 %v4675_v47 }
 0x3b8   : > { %6830 = vmatprep.mubr.msk.bf16.mxu0 %vm10787_vm13, %v10786_v19  ;;  %6915 = vmatpush3.bf16.msra.mxu0 %v7243_v30  ;;  %v3113_v2 = vpop.f32.mrf.mxu0 }
 0x3b9   : > { %6916 = vmatprep.subr.bf16.mxu0 %v10786_v19  ;;  %v3366_v15 = vpop.f32.mrf.mxu1 }
 0x3ba   : > { %v10186_v54 = vadd.f32 %v3366_v15, %v3102_v21  ;;  %v6529_v0 = vpop.f32.mrf.mxu0  ;;  %v10948_v21 = vshll.u32 %v9847_v37, 16 }
 0x3bb   : > { %6875 = vmatmul.mubr.bf16.gmra.mxu1 %v4935_v45  ;;  %v6576_v23 = vpop.f32.mrf.mxu1  ;;  %v4939_v45 = vsel %vm10950_vm8, %v4936_v52, %v4938_v43  ;;  %v4706_v0 = vrot.slane %v4704_v22, 1 }
 0x3bc   : > { %6878 = vmatprep.mubr.msk.bf16.mxu1 %vm10787_vm13, %v10786_v19  ;;  %6917 = vmatpush3.bf16.msra.mxu0 %v7245_v13  ;;  %v4691_v25 = vrot.slane %v10948_v21, 2  ;;  %v4940_v23 = vrot.slane %v9847_v37, 2 }
 0x3bd   : > { %6918 = vmatprep.subr.bf16.mxu0 %v10786_v19  ;;  %v3369_v61 = vpop.f32.mrf.mxu1 }
 0x3be   : > { %v3118_v63 = vpop.f32.mrf.mxu0  ;;  %v10200_v9 = vadd.f32 %v3369_v61, %v3105_v39  ;;  %v4692_v30 = vor.u32 %v4691_v25, %v4688_v12 }
 0x3bf   : > { %6831 = vmatmul.mubr.bf16.gmra.mxu0 %v4684_v62  ;;  %v6577_v11 = vpop.f32.mrf.mxu1  ;;  %v10951_v62 = vshll.u32 %v9861_v34, 16 }
 0x3c0   : > { %6834 = vmatprep.mubr.msk.bf16.mxu0 %vm10787_vm13, %v10786_v19  ;;  %6919 = vmatpush3.bf16.msra.mxu0 %v7247_v1  ;;  %v6532_v29 = vpop.f32.mrf.mxu0  ;;  %v4693_v57 = vsel %vm4327_vm6, %v4683_v51, %v4692_v30  ;;  %v4701_v51 = vor.u32 %v4700_v24, %v4697_v59  ;;  %v10251_v59 = vld [vmem:[#allocation2 + $0x5c] ss:$0 sps:$4 sm:$0x33]  }
 0x3c1   : > { %6920 = vmatprep.subr.bf16.mxu0 %v10786_v19  ;;  %v4709_v52 = vrot.slane %v10951_v62, 2 }
 0x3c2   : > { %v3121_v7 = vpop.f32.mrf.mxu0 }
 0x3c3   : > { %v3374_v27 = vpop.f32.mrf.mxu1  ;;  %6879 = vmatmul.mubr.bf16.gmra.mxu1 %v4937_v41 }
 0x3c4   : > { %v10209_v39 = vadd.f32 %v3374_v27, %v3110_v42  ;;  %6882 = vmatprep.mubr.msk.bf16.mxu1 %vm10787_vm13, %v10786_v19  ;;  %6921 = vmatpush3.bf16.msra.mxu0 %v7249_v44  ;;  %v6533_v20 = vpop.f32.mrf.mxu0  ;;  %v4710_v44 = vor.u32 %v4709_v52, %v4706_v0  ;;  %v10953_v27 = vld [vmem:[#allocation17_spill] sm:$0xff] }
 0x3c5   : > { %v6580_v47 = vpop.f32.mrf.mxu1  ;;  %v4715_v20 = vrot.slane %v4713_v35, 1 }
 0x3c6   : > { %v4711_v47 = vsel %vm4327_vm6, %v4701_v51, %v4710_v44 }
 0x3c7   : > { %v3377_v8 = vpop.f32.mrf.mxu1  ;;  %v3126_v13 = vpop.f32.mrf.mxu0  ;;  %6835 = vmatmul.mubr.bf16.gmra.mxu0 %v4693_v57  ;;  %v10954_v57 = vshll.u32 %v9872_v48, 16 }
 0x3c8   : > { %v10219_v42 = vadd.f32 %v3377_v8, %v3113_v2  ;;  %6838 = vmatprep.mubr.msk.bf16.mxu0 %vm10787_vm13, %v10786_v19  ;;  %v4702_v2 = vsel %vm4327_vm6, %v4692_v30, %v4701_v51  ;;  %v4942_v30 = vrot.slane %v9852_v60, 2 }
 0x3c9   : > { %v6581_v40 = vpop.f32.mrf.mxu1  ;;  %v6536_v4 = vpop.f32.mrf.mxu0 }
 0x3ca   : > { %v4943_v4 = vsel %vm10955_vm4, %v4940_v23, %v4942_v30 }
 0x3cb   : > { %v3382_v26 = vpop.f32.mrf.mxu1  ;;  %6883 = vmatmul.mubr.bf16.gmra.mxu1 %v4939_v45  ;;  %v3129_v15 = vpop.f32.mrf.mxu0  ;;  %v10956_v45 = vld [vmem:[#allocation18_spill] sm:$0xff] }
 0x3cc   : > { %v10224_v31 = vadd.f32 %v3382_v26, %v3118_v63  ;;  %6886 = vmatprep.mubr.msk.bf16.mxu1 %vm10787_vm13, %v10786_v19  ;;  %v4941_v63 = vsel %vm10952_vm9, %v4938_v43, %v4940_v23  ;;  %v4718_v43 = vrot.slane %v10954_v57, 2  ;;  %v3338_v35 = vadd.f32 %v10106_v10, %v10956_v45 }
 0x3cd   : > { %v6584_v36 = vpop.f32.mrf.mxu1  ;;  %v6537_v1 = vpop.f32.mrf.mxu0  ;;  %v4722_v26 = vshrl.u32 %v10251_v59, 16  ;;  %v4944_v10 = vrot.slane %v9861_v34, 2 }
 0x3ce   : > { %v4719_v51 = vor.u32 %v4718_v43, %v4715_v20  ;;  %v4725_v36 = vshll.u32 %v10251_v59, 16 }
 0x3cf   : > { %v3385_v33 = vpop.f32.mrf.mxu1  ;;  %v3134_v12 = vpop.f32.mrf.mxu0  ;;  %6839 = vmatmul.mubr.bf16.gmra.mxu0 %v4702_v2 }
 0x3d0   : > { %v10234_v21 = vadd.f32 %v3385_v33, %v3121_v7  ;;  %6842 = vmatprep.mubr.msk.bf16.mxu0 %vm10787_vm13, %v10786_v19  ;;  %v3335_v7 = vadd.f32 %v10100_v50, %v10953_v27  ;;  %v4720_v23 = vsel %vm4327_vm6, %v4710_v44, %v4719_v51  ;;  %v4724_v33 = vrot.slane %v4722_v26, 1 }
 0x3d1   : > { %v6585_v25 = vpop.f32.mrf.mxu1  ;;  %v6540_v61 = vpop.f32.mrf.mxu0  ;;  %v4945_v27 = vsel %vm10957_vm3, %v4942_v30, %v4944_v10  ;;  %v4946_v30 = vrot.slane %v9872_v48, 2 }
 0x3d2   : > { %v4727_v25 = vrot.slane %v4725_v36, 2 }
 0x3d3   : > { %v3390_v37 = vpop.f32.mrf.mxu1  ;;  %6887 = vmatmul.mubr.bf16.gmra.mxu1 %v4941_v63  ;;  %v3137_v11 = vpop.f32.mrf.mxu0 }
 0x3d4   : > { %v10239_v22 = vadd.f32 %v3390_v37, %v3126_v13  ;;  %6890 = vmatprep.mubr.msk.bf16.mxu1 %vm10787_vm13, %v10786_v19 }
 0x3d5   : > { %v6588_v29 = vpop.f32.mrf.mxu1  ;;  %v6541_v41 = vpop.f32.mrf.mxu0 }
 0x3d7   : > { %v3393_v24 = vpop.f32.mrf.mxu1  ;;  %v3657_v8 = vpop.f32.mrf.mxu0  ;;  %6843 = vmatmul.mubr.bf16.gmra.mxu0 %v4711_v47 }
 0x3d8   : > { %v10253_v13 = vadd.f32 %v3393_v24, %v3129_v15  ;;  %v3728_v40 = vadd.f32 %v3657_v8, %v3335_v7  ;;  %6846 = vmatprep.mubr.msk.bf16.mxu0 %vm10787_vm13, %v10786_v19  ;;  %v4728_v7 = vor.u32 %v4727_v25, %v4724_v33 }
 0x3d9   : > { %v6589_v60 = vpop.f32.mrf.mxu1  ;;  %v6612_v50 = vpop.f32.mrf.mxu0 }
 0x3da   : > { %v4729_v24 = vsel %vm4327_vm6, %v4719_v51, %v4728_v7  ;;  %vm10959_vm6 = vmmov %vm10958_vm1 }
 0x3db   : > { %v3398_v1 = vpop.f32.mrf.mxu1  ;;  %6891 = vmatmul.mubr.bf16.gmra.mxu1 %v4943_v4  ;;  %v3660_v15 = vpop.f32.mrf.mxu0 }
 0x3dc   : > { %v10262_v2 = vadd.f32 %v3398_v1, %v3134_v12  ;;  %v3729_v0 = vadd.f32 %v3660_v15, %v3338_v35  ;;  %6894 = vmatprep.mubr.msk.bf16.mxu1 %vm10787_vm13, %v10786_v19  ;;  %v4947_v35 = vsel %vm10958_vm1, %v4944_v10, %v4946_v30 }
 0x3dd   : > { %v6592_v62 = vpop.f32.mrf.mxu1  ;;  %v6613_v52 = vpop.f32.mrf.mxu0 }
 0x3de   : > { %v4948_v62 = vrot.slane %v10251_v59, 2 }
 0x3df   : > { %v3401_v61 = vpop.f32.mrf.mxu1  ;;  %v3665_v63 = vpop.f32.mrf.mxu0  ;;  %6847 = vmatmul.mubr.bf16.gmra.mxu0 %v4720_v23 }
 0x3e0   : > { %v10268_v37 = vadd.f32 %v3401_v61, %v3137_v11  ;;  %v3730_v12 = vadd.f32 %v3665_v63, %v10116_v5  ;;  %6850 = vmatprep.mubr.msk.bf16.mxu0 %vm10787_vm13, %v10786_v19  ;;  %v5153_v5 = vshrl.u32 %v10141_v17, 16  ;;  %v5156_v11 = vshll.u32 %v10141_v17, 16 }
 0x3e1   : > { %v6593_v29 = vpop.f32.mrf.mxu1  ;;  %v6616_v41 = vpop.f32.mrf.mxu0  ;;  %v4949_v61 = vsel %vm10959_vm6, %v4946_v30, %v4948_v62 }
 0x3e2   : > { %v5155_v50 = vrot.slane %v5153_v5, 2  ;;  %v5158_v4 = vrot.slane %v5156_v11, 3 }
 0x3e3   : > { %v3997_v44 = vpop.f32.mrf.mxu1  ;;  %6895 = vmatmul.mubr.bf16.gmra.mxu1 %v4945_v27  ;;  %v3668_v34 = vpop.f32.mrf.mxu0 }
 0x3e4   : > { %v10274_v47 = vadd.f32 %v3997_v44, %v3728_v40  ;;  %v3731_v20 = vadd.f32 %v3668_v34, %v10128_v32  ;;  %6898 = vmatprep.mubr.msk.bf16.mxu1 %vm10787_vm13, %v10786_v19  ;;  %v5159_v1 = vor.u32 %v5158_v4, %v5155_v50 }
 0x3e5   : > { %v6664_v57 = vpop.f32.mrf.mxu1  ;;  %v6617_v43 = vpop.f32.mrf.mxu0 }
 0x3e7   : > { %v4000_v8 = vpop.f32.mrf.mxu1  ;;  %v3673_v60 = vpop.f32.mrf.mxu0  ;;  %6851 = vmatmul.mubr.bf16.gmra.mxu0 %v4729_v24 }
 0x3e8   : > { %v10283_v40 = vadd.f32 %v4000_v8, %v3729_v0  ;;  %v3732_v32 = vadd.f32 %v3673_v60, %v10137_v56  ;;  %6922 = vmatprep.mubr.msk.bf16.mxu0 %vm10787_vm13, %v10786_v19  ;;  %v5163_v0 = vsel %vm5151_vm7, %v5159_v1, %v9895_v14 }
 0x3e9   : > { %v6665_v45 = vpop.f32.mrf.mxu1  ;;  %v6620_v17 = vpop.f32.mrf.mxu0 }
 0x3eb   : > { %v4005_v26 = vpop.f32.mrf.mxu1  ;;  %6899 = vmatmul.mubr.bf16.gmra.mxu1 %v4947_v35  ;;  %v3676_v51 = vpop.f32.mrf.mxu0 }
 0x3ec   : > { %v10289_v48 = vadd.f32 %v4005_v26, %v3730_v12  ;;  %v3733_v36 = vadd.f32 %v3676_v51, %v10153_v38  ;;  %6902 = vmatprep.mubr.msk.bf16.mxu1 %vm10787_vm13, %v10786_v19 }
 0x3ed   : > { %v6668_v56 = vpop.f32.mrf.mxu1  ;;  %v6621_v15 = vpop.f32.mrf.mxu0 }
 0x3ef   : > { %v4008_v52 = vpop.f32.mrf.mxu1  ;;  %v3681_v23 = vpop.f32.mrf.mxu0  ;;  %6923 = vmatmul.mubr.bf16.vlgmr.msra.gmra.mxu0 %v5163_v0 }
 0x3f0   : > { %v10297_v10 = vadd.f32 %v4008_v52, %v3731_v20  ;;  %v3734_v33 = vadd.f32 %v3681_v23, %v10163_v53  ;;  %6926 = vmatprep.mubr.msk.bf16.mxu0 %vm10787_vm13, %v10786_v19 }
 0x3f1   : > { %v6669_v38 = vpop.f32.mrf.mxu1  ;;  %v6624_v25 = vpop.f32.mrf.mxu0 }
 0x3f3   : > { %v4013_v63 = vpop.f32.mrf.mxu1  ;;  %6903 = vmatmul.mubr.bf16.gmra.mxu1 %v4949_v61  ;;  %v3684_v12 = vpop.f32.mrf.mxu0 }
 0x3f4   : > { %v10303_v14 = vadd.f32 %v4013_v63, %v3732_v32  ;;  %v3735_v59 = vadd.f32 %v3684_v12, %v10177_v49 }
 0x3f5   : > { %v6672_v29 = vpop.f32.mrf.mxu1  ;;  %v6625_v41 = vpop.f32.mrf.mxu0 }
 0x3f7   : > { %v4016_v27 = vpop.f32.mrf.mxu1  ;;  %v3689_v7 = vpop.f32.mrf.mxu0  ;;  %6927 = vmatmul.mubr.bf16.gmra.mxu0 %v9916_v16 }
 0x3f8   : > { %v10307_v53 = vadd.f32 %v4016_v27, %v3733_v36  ;;  %v3736_v44 = vadd.f32 %v3689_v7, %v10186_v54  ;;  %6930 = vmatprep.mubr.msk.bf16.mxu0 %vm10787_vm13, %v10786_v19 }
 0x3f9   : > { %v6673_v34 = vpop.f32.mrf.mxu1  ;;  %v6628_v20 = vpop.f32.mrf.mxu0 }
 0x3fb   : > { %v4021_v5 = vpop.f32.mrf.mxu1  ;;  %v3692_v11 = vpop.f32.mrf.mxu0 }
 0x3fc   : > { %v10312_v57 = vadd.f32 %v4021_v5, %v3734_v33  ;;  %v3737_v49 = vadd.f32 %v3692_v11, %v10200_v9 }
 0x3fd   : > { %v6676_v43 = vpop.f32.mrf.mxu1  ;;  %v6629_v24 = vpop.f32.mrf.mxu0 }
 0x3ff   : > { %v4024_v30 = vpop.f32.mrf.mxu1  ;;  %v3697_v8 = vpop.f32.mrf.mxu0  ;;  %6931 = vmatmul.mubr.bf16.gmra.mxu0 %v9927_v46 }
 0x400   : > { %v10316_v16 = vadd.f32 %v4024_v30, %v3735_v59  ;;  %v3738_v54 = vadd.f32 %v3697_v8, %v10209_v39  ;;  %6934 = vmatprep.mubr.msk.bf16.mxu0 %vm10787_vm13, %v10786_v19 }
 0x401   : > { %v6677_v60 = vpop.f32.mrf.mxu1  ;;  %v6632_v32 = vpop.f32.mrf.mxu0 }
 0x403   : > { %v4029_v50 = vpop.f32.mrf.mxu1  ;;  %v3700_v4 = vpop.f32.mrf.mxu0 }
 0x404   : > { %v10321_v45 = vadd.f32 %v4029_v50, %v3736_v44  ;;  %v3739_v9 = vadd.f32 %v3700_v4, %v10219_v42 }
 0x405   : > { %v6680_v17 = vpop.f32.mrf.mxu1  ;;  %v6633_v35 = vpop.f32.mrf.mxu0 }
 0x407   : > { %v4032_v26 = vpop.f32.mrf.mxu1  ;;  %v3705_v51 = vpop.f32.mrf.mxu0  ;;  %6935 = vmatmul.mubr.bf16.gmra.mxu0 %v9934_v6 }
 0x408   : > { %v10325_v46 = vadd.f32 %v4032_v26, %v3737_v49  ;;  %v3740_v39 = vadd.f32 %v3705_v51, %v10224_v31  ;;  %6938 = vmatprep.mubr.msk.bf16.mxu0 %vm10787_vm13, %v10786_v19 }
 0x409   : > { %v6681_v36 = vpop.f32.mrf.mxu1  ;;  %v6636_v1 = vpop.f32.mrf.mxu0 }
 0x40b   : > { %v4037_v56 = vpop.f32.mrf.mxu1  ;;  %v3708_v15 = vpop.f32.mrf.mxu0 }
 0x40c   : > { %v10330_v0 = vadd.f32 %v4037_v56, %v3738_v54  ;;  %v3741_v42 = vadd.f32 %v3708_v15, %v10234_v21 }
 0x40d   : > { %v6684_v62 = vpop.f32.mrf.mxu1  ;;  %v6637_v52 = vpop.f32.mrf.mxu0 }
 0x40f   : > { %v4040_v23 = vpop.f32.mrf.mxu1  ;;  %v3713_v33 = vpop.f32.mrf.mxu0  ;;  %6939 = vmatmul.mubr.bf16.gmra.mxu0 %v9937_v3 }
 0x410   : > { %v10334_v6 = vadd.f32 %v4040_v23, %v3739_v9  ;;  %v3742_v31 = vadd.f32 %v3713_v33, %v10239_v22  ;;  %6942 = vmatprep.mubr.msk.bf16.mxu0 %vm10787_vm13, %v10786_v19 }
 0x411   : > { %v6685_v38 = vpop.f32.mrf.mxu1  ;;  %v6640_v25 = vpop.f32.mrf.mxu0 }
 0x413   : > { %v4045_v61 = vpop.f32.mrf.mxu1  ;;  %v3716_v63 = vpop.f32.mrf.mxu0 }
 0x414   : > { %v10339_v12 = vadd.f32 %v4045_v61, %v3740_v39  ;;  %v3743_v21 = vadd.f32 %v3716_v63, %v10253_v13 }
 0x415   : > { %v6688_v59 = vpop.f32.mrf.mxu1  ;;  %v6641_v29 = vpop.f32.mrf.mxu0 }
 0x417   : > { %v4048_v41 = vpop.f32.mrf.mxu1  ;;  %v3721_v27 = vpop.f32.mrf.mxu0  ;;  %6943 = vmatmul.mubr.bf16.gmra.mxu0 %v9943_v55 }
 0x418   : > { %v10343_v3 = vadd.f32 %v4048_v41, %v3741_v42  ;;  %v3744_v22 = vadd.f32 %v3721_v27, %v10262_v2  ;;  %6946 = vmatprep.mubr.msk.bf16.mxu0 %vm10787_vm13, %v10786_v19 }
 0x419   : > { %v6689_v7 = vpop.f32.mrf.mxu1  ;;  %v6644_v44 = vpop.f32.mrf.mxu0 }
 0x41b   : > { %v4053_v34 = vpop.f32.mrf.mxu1  ;;  %v3724_v20 = vpop.f32.mrf.mxu0 }
 0x41c   : > { %v10348_v5 = vadd.f32 %v4053_v34, %v3742_v31  ;;  %v3745_v13 = vadd.f32 %v3724_v20, %v10268_v37 }
 0x41d   : > { %v6692_v11 = vpop.f32.mrf.mxu1  ;;  %v6645_v49 = vpop.f32.mrf.mxu0 }
 0x41f   : > { %v4056_v43 = vpop.f32.mrf.mxu1  ;;  %v4217_v24 = vpop.f32.mrf.mxu0  ;;  %6947 = vmatmul.mubr.bf16.gmra.mxu0 %v9946_v58 }
 0x420   : > { %v10352_v55 = vadd.f32 %v4056_v43, %v3743_v21  ;;  %v4288_v2 = vadd.f32 %v4217_v24, %v10274_v47  ;;  %6950 = vmatprep.mubr.msk.bf16.mxu0 %vm10787_vm13, %v10786_v19 }
 0x421   : > { %v6693_v30 = vpop.f32.mrf.mxu1  ;;  %v6716_v8 = vpop.f32.mrf.mxu0 }
 0x423   : > { %v4061_v54 = vpop.f32.mrf.mxu1  ;;  %v4220_v60 = vpop.f32.mrf.mxu0 }
 0x424   : > { %v10357_v32 = vadd.f32 %v4061_v54, %v3744_v22  ;;  %v4289_v37 = vadd.f32 %v4220_v60, %v10283_v40 }
 0x425   : > { %v6696_v50 = vpop.f32.mrf.mxu1  ;;  %v6717_v4 = vpop.f32.mrf.mxu0 }
 0x427   : > { %v4064_v9 = vpop.f32.mrf.mxu1  ;;  %v4225_v17 = vpop.f32.mrf.mxu0  ;;  %6951 = vmatmul.mubr.bf16.gmra.mxu0 %v9953_v28 }
 0x428   : > { %v10361_v58 = vadd.f32 %v4064_v9, %v3745_v13  ;;  %v4290_v47 = vadd.f32 %v4225_v17, %v10289_v48  ;;  %6954 = vmatprep.mubr.msk.bf16.mxu0 %vm10787_vm13, %v10786_v19 }
 0x429   : > { %v6697_v35 = vpop.f32.mrf.mxu1  ;;  %v6720_v26 = vpop.f32.mrf.mxu0 }
 0x42b   : > { %v4468_v51 = vpop.f32.mrf.mxu1  ;;  %v4228_v39 = vpop.f32.mrf.mxu0 }
 0x42c   : > { %v10366_v36 = vadd.f32 %v4468_v51, %v4288_v2  ;;  %v4291_v40 = vadd.f32 %v4228_v39, %v10297_v10 }
 0x42d   : > { %v6768_v1 = vpop.f32.mrf.mxu1  ;;  %v6721_v56 = vpop.f32.mrf.mxu0 }
 0x42f   : > { %v4471_v15 = vpop.f32.mrf.mxu1  ;;  %v4233_v42 = vpop.f32.mrf.mxu0  ;;  %6955 = vmatmul.mubr.bf16.gmra.mxu0 %v9963_v18 }
 0x430   : > { %v10370_v28 = vadd.f32 %v4471_v15, %v4289_v37  ;;  %v4292_v48 = vadd.f32 %v4233_v42, %v10303_v14 }
 0x431   : > { %v6769_v62 = vpop.f32.mrf.mxu1  ;;  %v6724_v19 = vpop.f32.mrf.mxu0 }
 0x433   : > { %v4476_v52 = vpop.f32.mrf.mxu1  ;;  %v4236_v23 = vpop.f32.mrf.mxu0 }
 0x434   : > { %v10373_v33 = vadd.f32 %v4476_v52, %v4290_v47  ;;  %v4293_v31 = vadd.f32 %v4236_v23, %v10307_v53 }
 0x435   : > { %v6772_v38 = vpop.f32.mrf.mxu1  ;;  %v6725_v10 = vpop.f32.mrf.mxu0 }
 0x437   : > { %v4479_v25 = vpop.f32.mrf.mxu1  ;;  %v4241_v61 = vpop.f32.mrf.mxu0 }
 0x438   : > { %v10376_v63 = vadd.f32 %v4479_v25, %v4291_v40  ;;  %v4294_v18 = vadd.f32 %v4241_v61, %v10312_v57 }
 0x439   : > { %v6773_v21 = vpop.f32.mrf.mxu1  ;;  %v6728_v59 = vpop.f32.mrf.mxu0 }
 0x43b   : > { %v4484_v29 = vpop.f32.mrf.mxu1  ;;  %v4244_v14 = vpop.f32.mrf.mxu0 }
 0x43c   : > { %v10379_v41 = vadd.f32 %v4484_v29, %v4292_v48  ;;  %v4295_v27 = vadd.f32 %v4244_v14, %v10316_v16 }
 0x43d   : > { %v6776_v22 = vpop.f32.mrf.mxu1  ;;  %v6729_v7 = vpop.f32.mrf.mxu0 }
 0x43f   : > { %v4487_v44 = vpop.f32.mrf.mxu1  ;;  %v4249_v53 = vpop.f32.mrf.mxu0 }
 0x440   : > { %v10382_v34 = vadd.f32 %v4487_v44, %v4293_v31  ;;  %v4296_v20 = vadd.f32 %v4249_v53, %v10321_v45 }
 0x441   : > { %v6777_v13 = vpop.f32.mrf.mxu1  ;;  %v6732_v11 = vpop.f32.mrf.mxu0 }
 0x443   : > { %v4492_v49 = vpop.f32.mrf.mxu1  ;;  %v4252_v57 = vpop.f32.mrf.mxu0 }
 0x444   : > { %v10385_v43 = vadd.f32 %v4492_v49, %v4294_v18  ;;  %v4297_v24 = vadd.f32 %v4252_v57, %v10325_v46 }
 0x445   : > { %v6780_v2 = vpop.f32.mrf.mxu1  ;;  %v6733_v30 = vpop.f32.mrf.mxu0 }
 0x447   : > { %v4495_v8 = vpop.f32.mrf.mxu1  ;;  %v4257_v16 = vpop.f32.mrf.mxu0 }
 0x448   : > { %v10388_v54 = vadd.f32 %v4495_v8, %v4295_v27  ;;  %v4298_v60 = vadd.f32 %v4257_v16, %v10330_v0 }
 0x449   : > { %v6781_v37 = vpop.f32.mrf.mxu1  ;;  %v6736_v50 = vpop.f32.mrf.mxu0 }
 0x44b   : > { %v4500_v4 = vpop.f32.mrf.mxu1  ;;  %v4260_v45 = vpop.f32.mrf.mxu0 }
 0x44c   : > { %v10391_v9 = vadd.f32 %v4500_v4, %v4296_v20  ;;  %v4299_v17 = vadd.f32 %v4260_v45, %v10334_v6 }
 0x44d   : > { %v6784_v47 = vpop.f32.mrf.mxu1  ;;  %v6737_v35 = vpop.f32.mrf.mxu0 }
 0x44f   : > { %v4503_v26 = vpop.f32.mrf.mxu1  ;;  %v4265_v46 = vpop.f32.mrf.mxu0 }
 0x450   : > { %v10394_v51 = vadd.f32 %v4503_v26, %v4297_v24  ;;  %v4300_v39 = vadd.f32 %v4265_v46, %v10339_v12 }
 0x451   : > { %v6785_v40 = vpop.f32.mrf.mxu1  ;;  %v6740_v1 = vpop.f32.mrf.mxu0 }
 0x453   : > { %v4508_v56 = vpop.f32.mrf.mxu1  ;;  %v4268_v0 = vpop.f32.mrf.mxu0 }
 0x454   : > { %v10397_v15 = vadd.f32 %v4508_v56, %v4298_v60  ;;  %v4301_v42 = vadd.f32 %v4268_v0, %v10343_v3 }
 0x455   : > { %v6788_v48 = vpop.f32.mrf.mxu1  ;;  %v6741_v62 = vpop.f32.mrf.mxu0 }
 0x457   : > { %v4511_v19 = vpop.f32.mrf.mxu1  ;;  %v4273_v6 = vpop.f32.mrf.mxu0 }
 0x458   : > { %v10400_v52 = vadd.f32 %v4511_v19, %v4299_v17  ;;  %v4302_v23 = vadd.f32 %v4273_v6, %v10348_v5 }
 0x459   : > { %v6789_v31 = vpop.f32.mrf.mxu1  ;;  %v6744_v38 = vpop.f32.mrf.mxu0 }
 0x45b   : > { %v4516_v10 = vpop.f32.mrf.mxu1  ;;  %v4276_v12 = vpop.f32.mrf.mxu0 }
 0x45c   : > { %v10403_v25 = vadd.f32 %v4516_v10, %v4300_v39  ;;  %v4303_v61 = vadd.f32 %v4276_v12, %v10352_v55 }
 0x45d   : > { %v6792_v18 = vpop.f32.mrf.mxu1  ;;  %v6745_v21 = vpop.f32.mrf.mxu0 }
 0x45f   : > { %v4519_v59 = vpop.f32.mrf.mxu1  ;;  %v4281_v3 = vpop.f32.mrf.mxu0 }
 0x460   : > { %v10406_v29 = vadd.f32 %v4519_v59, %v4301_v42  ;;  %v4304_v14 = vadd.f32 %v4281_v3, %v10357_v32 }
 0x461   : > { %v6793_v27 = vpop.f32.mrf.mxu1  ;;  %v6748_v22 = vpop.f32.mrf.mxu0 }
 0x463   : > { %v4524_v7 = vpop.f32.mrf.mxu1  ;;  %v4284_v5 = vpop.f32.mrf.mxu0 }
 0x464   : > { %v10409_v44 = vadd.f32 %v4524_v7, %v4302_v23  ;;  %v4305_v53 = vadd.f32 %v4284_v5, %v10361_v58 }
 0x465   : > { %v6796_v20 = vpop.f32.mrf.mxu1  ;;  %v6749_v13 = vpop.f32.mrf.mxu0 }
 0x467   : > { %v4527_v11 = vpop.f32.mrf.mxu1  ;;  %v4821_v55 = vpop.f32.mrf.mxu0 }
 0x468   : > { %v10412_v49 = vadd.f32 %v4527_v11, %v4303_v61  ;;  %v10415_v57 = vadd.f32 %v4821_v55, %v10366_v36 }
 0x469   : > { %v6797_v24 = vpop.f32.mrf.mxu1  ;;  %v6820_v2 = vpop.f32.mrf.mxu0 }
 0x46b   : > { %v4532_v32 = vpop.f32.mrf.mxu1  ;;  %v4824_v30 = vpop.f32.mrf.mxu0 }
 0x46c   : > { %v10417_v8 = vadd.f32 %v4532_v32, %v4304_v14  ;;  %v10420_v16 = vadd.f32 %v4824_v30, %v10370_v28 }
 0x46d   : > { %v6800_v60 = vpop.f32.mrf.mxu1  ;;  %v6821_v58 = vpop.f32.mrf.mxu0 }
 0x46f   : > { %v4535_v37 = vpop.f32.mrf.mxu1  ;;  %v4829_v50 = vpop.f32.mrf.mxu0 }
 0x470   : > { %v10422_v4 = vadd.f32 %v4535_v37, %v4305_v53  ;;  %v10425_v45 = vadd.f32 %v4829_v50, %v10373_v33 }
 0x471   : > { %v6801_v36 = vpop.f32.mrf.mxu1  ;;  %v6824_v17 = vpop.f32.mrf.mxu0 }
 0x473   : > { %v10427_v47 = vpop.f32.mrf.mxu1  ;;  %v4832_v35 = vpop.f32.mrf.mxu0 }
 0x474   : > { %v10430_v26 = vadd.f32 %v4832_v35, %v10376_v63 }
 0x475   : > { %v6872_v46 = vpop.f32.mrf.mxu1  ;;  %v6825_v28 = vpop.f32.mrf.mxu0 }
 0x477   : > { %v10432_v39 = vpop.f32.mrf.mxu1  ;;  %v4837_v40 = vpop.f32.mrf.mxu0 }
 0x478   : > { %v10435_v1 = vadd.f32 %v4837_v40, %v10379_v41 }
 0x479   : > { %v6873_v56 = vpop.f32.mrf.mxu1  ;;  %v6828_v0 = vpop.f32.mrf.mxu0 }
 0x47b   : > { %v10437_v33 = vpop.f32.mrf.mxu1  ;;  %v4840_v42 = vpop.f32.mrf.mxu0 }
 0x47c   : > { %v10440_v48 = vadd.f32 %v4840_v42, %v10382_v34 }
 0x47d   : > { %v6876_v62 = vpop.f32.mrf.mxu1  ;;  %v6829_v19 = vpop.f32.mrf.mxu0 }
 0x47f   : > { %v10442_v63 = vpop.f32.mrf.mxu1  ;;  %v4845_v6 = vpop.f32.mrf.mxu0 }
 0x480   : > { %v10445_v23 = vadd.f32 %v4845_v6, %v10385_v43 }
 0x481   : > { %v6877_v31 = vpop.f32.mrf.mxu1  ;;  %v6832_v38 = vpop.f32.mrf.mxu0 }
 0x483   : > { %v10447_v41 = vpop.f32.mrf.mxu1  ;;  %v4848_v10 = vpop.f32.mrf.mxu0 }
 0x484   : > { %v10450_v12 = vadd.f32 %v4848_v10, %v10388_v54 }
 0x485   : > { %v6880_v61 = vpop.f32.mrf.mxu1  ;;  %v6833_v18 = vpop.f32.mrf.mxu0 }
 0x487   : > { %v10452_v34 = vpop.f32.mrf.mxu1  ;;  %v4853_v21 = vpop.f32.mrf.mxu0 }
 0x488   : > { %v10455_v59 = vadd.f32 %v4853_v21, %v10391_v9 }
 0x489   : > { %v6881_v3 = vpop.f32.mrf.mxu1  ;;  %v6836_v14 = vpop.f32.mrf.mxu0 }
 0x48a   : > { %v5112_v3 = vadd.f32 %v10427_v47, %v10415_v57 }
 0x48b   : > { %v10457_v43 = vpop.f32.mrf.mxu1  ;;  %v4856_v27 = vpop.f32.mrf.mxu0 }
 0x48c   : > { %v10460_v22 = vadd.f32 %v4856_v27, %v10394_v51 }
 0x48d   : > { %v6884_v7 = vpop.f32.mrf.mxu1  ;;  %v6837_v5 = vpop.f32.mrf.mxu0 }
 0x48f   : > { %v10462_v54 = vpop.f32.mrf.mxu1  ;;  %v4861_v53 = vpop.f32.mrf.mxu0 }
 0x490   : > { %v10465_v20 = vadd.f32 %v4861_v53, %v10397_v15 }
 0x491   : > { %v6885_v13 = vpop.f32.mrf.mxu1  ;;  %v6840_v11 = vpop.f32.mrf.mxu0 }
 0x493   : > { %v10467_v9 = vpop.f32.mrf.mxu1  ;;  %v4864_v55 = vpop.f32.mrf.mxu0 }
 0x494   : > { %v10470_v24 = vadd.f32 %v4864_v55, %v10400_v52 }
 0x495   : > { %v6888_v2 = vpop.f32.mrf.mxu1  ;;  %v6841_v32 = vpop.f32.mrf.mxu0 }
 0x496   : > { %v5424_v2 = vld [vmem:[%s8540_s9] sm:$0xff] }
 0x497   : > { %v10472_v51 = vpop.f32.mrf.mxu1  ;;  %v4869_v30 = vpop.f32.mrf.mxu0 }
 0x498   : > { %v10475_v60 = vadd.f32 %v4869_v30, %v10403_v25 }
 0x499   : > { %v6889_v58 = vpop.f32.mrf.mxu1  ;;  %v6844_v37 = vpop.f32.mrf.mxu0 }
 0x49a   : > { %v5114_v58 = vadd.f32 %v10437_v33, %v10425_v45 }
 0x49b   : > { %v10477_v15 = vpop.f32.mrf.mxu1  ;;  %v4872_v50 = vpop.f32.mrf.mxu0 }
 0x49c   : > { %v10480_v36 = vadd.f32 %v4872_v50, %v10406_v29 }
 0x49d   : > { %v6892_v17 = vpop.f32.mrf.mxu1  ;;  %v6845_v35 = vpop.f32.mrf.mxu0 }
 0x49f   : > { %v10482_v52 = vpop.f32.mrf.mxu1  ;;  %v4877_v46 = vpop.f32.mrf.mxu0 }
 0x4a0   : > { %v10485_v28 = vadd.f32 %v4877_v46, %v10409_v44  ;;  %v5425_v46 = vld [vmem:[%s8540_s9 + $0x8] sm:$0xff] }
 0x4a1   : > { %v6893_v40 = vpop.f32.mrf.mxu1  ;;  %v6848_v56 = vpop.f32.mrf.mxu0 }
 0x4a3   : > { %v10487_v25 = vpop.f32.mrf.mxu1  ;;  %v4880_v0 = vpop.f32.mrf.mxu0 }
 0x4a4   : > { %v10490_v42 = vadd.f32 %v4880_v0, %v10412_v49  ;;  %v5115_v0 = vadd.f32 %v10442_v63, %v10430_v26 }
 0x4a5   : > { %v6896_v62 = vpop.f32.mrf.mxu1  ;;  %v6849_v19 = vpop.f32.mrf.mxu0 }
 0x4a7   : > { %v10492_v29 = vpop.f32.mrf.mxu1  ;;  %v4885_v6 = vpop.f32.mrf.mxu0 }
 0x4a8   : > { %v10495_v31 = vadd.f32 %v4885_v6, %v10417_v8  ;;  %v10509_v8 = vld [vmem:[%s10624_s6] ss:$0 sm:$0xff] }
 0x4a9   : > { %v6897_v38 = vpop.f32.mrf.mxu1  ;;  %v6852_v10 = vpop.f32.mrf.mxu0 }
 0x4aa   : > { %v5426_v38 = vld [vmem:[%s8540_s9 + $0x10] sm:$0xff] }
 0x4ab   : > { %v10497_v44 = vpop.f32.mrf.mxu1  ;;  %v4888_v61 = vpop.f32.mrf.mxu0 }
 0x4ac   : > { %v10500_v18 = vadd.f32 %v4888_v61, %v10422_v4  ;;  %v5113_v4 = vadd.f32 %v10432_v39, %v10420_v16  ;;  %v5116_v61 = vadd.f32 %v10447_v41, %v10435_v1 }
 0x4ad   : > { %v6900_v21 = vpop.f32.mrf.mxu1  ;;  %v6853_v49 = vpop.f32.mrf.mxu0 }
 0x4af   : > { %v10504_v14 = vpop.f32.mrf.mxu1  ;;  %v5292_v27 = vpop.f32.mrf.mxu0 }
 0x4b0   : > { %v5363_v7 = vadd.f32 %v5292_v27, %v5112_v3  ;;  %v5427_v27 = vld [vmem:[%s8540_s9 + $0x18] sm:$0xff] }
 0x4b1   : > { %v6901_v5 = vpop.f32.mrf.mxu1  ;;  %v6924_v53 = vpop.f32.mrf.mxu0 }
 0x4b2   : > { %v5388_v13 = vadd.f32 %v10509_v8, %v5363_v7  ;;  %v5117_v5 = vadd.f32 %v10452_v34, %v10440_v48 }
 0x4b3   : > { %v10514_v11 = vpop.f32.mrf.mxu1  ;;  %v5295_v57 = vpop.f32.mrf.mxu0 }
 0x4b4   : > { %v5406_v47 = vmax.f32 %v5388_v13, 0.0  ;;  %v5364_v55 = vadd.f32 %v5295_v57, %v5113_v4  ;;  %v5428_v57 = vld [vmem:[%s8540_s9 + $0x20] sm:$0xff] }
 0x4b5   : > { %v6904_v32 = vpop.f32.mrf.mxu1  ;;  %v6925_v30 = vpop.f32.mrf.mxu0 }
 0x4b6   : > { %v5442_v37 = vadd.f32 %v5424_v2, %v5406_v47  ;;  %v5389_v50 = vadd.f32 %v10509_v8, %v5364_v55  ;;  %v5118_v55 = vadd.f32 %v10457_v43, %v10445_v23 }
 0x4b7   : > { %v10520_v16 = vpop.f32.mrf.mxu1  ;;  %v5300_v39 = vpop.f32.mrf.mxu0 }
 0x4b8   : > { %5460 = vst [vmem:[%s8540_s9] sm:$0xff] %v5442_v37  ;;  %v5407_v17 = vmax.f32 %v5389_v50, 0.0  ;;  %v5365_v35 = vadd.f32 %v5300_v39, %v5114_v58  ;;  %v5429_v58 = vld [vmem:[%s8540_s9 + $0x28] sm:$0xff]  ;;  %v5119_v50 = vadd.f32 %v10462_v54, %v10450_v12 }
 0x4b9   : > { %v6905_v40 = vpop.f32.mrf.mxu1  ;;  %v6928_v56 = vpop.f32.mrf.mxu0 }
 0x4ba   : > { %v5443_v62 = vadd.f32 %v5425_v46, %v5407_v17  ;;  %v5390_v45 = vadd.f32 %v10509_v8, %v5365_v35  ;;  %v5430_v46 = vld [vmem:[%s8540_s9 + $0x30] sm:$0xff]  ;;  %v5120_v56 = vadd.f32 %v10467_v9, %v10455_v59 }
 0x4bb   : > { %v5303_v33 = vpop.f32.mrf.mxu0 }
 0x4bc   : > { %5461 = vst [vmem:[%s8540_s9 + $0x8] sm:$0xff] %v5443_v62  ;;  %v5408_v19 = vmax.f32 %v5390_v45, 0.0  ;;  %v5366_v6 = vadd.f32 %v5303_v33, %v5115_v0  ;;  %v5431_v33 = vld [vmem:[%s8540_s9 + $0x38] sm:$0xff] }
 0x4bd   : > { %v6929_v10 = vpop.f32.mrf.mxu0 }
 0x4be   : > { %v5444_v21 = vadd.f32 %v5426_v38, %v5408_v19  ;;  %v5391_v49 = vadd.f32 %v10509_v8, %v5366_v6  ;;  %v5121_v6 = vadd.f32 %v10472_v51, %v10460_v22 }
 0x4bf   : > { %v5308_v3 = vpop.f32.mrf.mxu0 }
 0x4c0   : > { %5462 = vst [vmem:[%s8540_s9 + $0x10] sm:$0xff] %v5444_v21  ;;  %v5409_v26 = vmax.f32 %v5391_v49, 0.0  ;;  %v5367_v63 = vadd.f32 %v5308_v3, %v5116_v61  ;;  %v5432_v21 = vld [vmem:[%s8540_s9 + $0x40] sm:$0xff]  ;;  %v5122_v3 = vadd.f32 %v10477_v15, %v10465_v20 }
 0x4c1   : > { %v6932_v7 = vpop.f32.mrf.mxu0 }
 0x4c2   : > { %v5445_v53 = vadd.f32 %v5427_v27, %v5409_v26  ;;  %v5392_v4 = vadd.f32 %v10509_v8, %v5367_v63  ;;  %v5433_v7 = vld [vmem:[%s8540_s9 + $0x48] sm:$0xff] }
 0x4c3   : > { %v5311_v13 = vpop.f32.mrf.mxu0 }
 0x4c4   : > { %5463 = vst [vmem:[%s8540_s9 + $0x18] sm:$0xff] %v5445_v53  ;;  %v5410_v1 = vmax.f32 %v5392_v4, 0.0  ;;  %v5368_v41 = vadd.f32 %v5311_v13, %v5117_v5  ;;  %v5123_v53 = vadd.f32 %v10482_v52, %v10470_v24 }
 0x4c5   : > { %v6933_v47 = vpop.f32.mrf.mxu0 }
 0x4c6   : > { %v5446_v2 = vadd.f32 %v5428_v57, %v5410_v1  ;;  %v5393_v32 = vadd.f32 %v10509_v8, %v5368_v41  ;;  %v5434_v41 = vld [vmem:[%s8540_s9 + $0x50] sm:$0xff]  ;;  %v5124_v47 = vadd.f32 %v10487_v25, %v10475_v60 }
 0x4c7   : > { %v5316_v30 = vpop.f32.mrf.mxu0 }
 0x4c8   : > { %5464 = vst [vmem:[%s8540_s9 + $0x20] sm:$0xff] %v5446_v2  ;;  %v5411_v48 = vmax.f32 %v5393_v32, 0.0  ;;  %v5369_v34 = vadd.f32 %v5316_v30, %v5118_v55  ;;  %v5435_v30 = vld [vmem:[%s8540_s9 + $0x58] sm:$0xff] }
 0x4c9   : > { %v6936_v37 = vpop.f32.mrf.mxu0 }
 0x4ca   : > { %v5447_v39 = vadd.f32 %v5429_v58, %v5411_v48  ;;  %v5394_v17 = vadd.f32 %v10509_v8, %v5369_v34  ;;  %v5125_v34 = vadd.f32 %v10492_v29, %v10480_v36 }
 0x4cb   : > { %v5319_v35 = vpop.f32.mrf.mxu0 }
 0x4cc   : > { %5465 = vst [vmem:[%s8540_s9 + $0x28] sm:$0xff] %v5447_v39  ;;  %v5412_v23 = vmax.f32 %v5394_v17, 0.0  ;;  %v5370_v43 = vadd.f32 %v5319_v35, %v5119_v50  ;;  %v5436_v39 = vld [vmem:[%s8540_s9 + $0x60] sm:$0xff]  ;;  %v5126_v35 = vadd.f32 %v10497_v44, %v10485_v28 }
 0x4cd   : > { %v6937_v40 = vpop.f32.mrf.mxu0 }
 0x4ce   : > { %v5448_v0 = vadd.f32 %v5430_v46, %v5412_v23  ;;  %v5395_v62 = vadd.f32 %v10509_v8, %v5370_v43  ;;  %v5437_v40 = vld [vmem:[%s8540_s9 + $0x68] sm:$0xff] }
 0x4cf   : > { %v5324_v45 = vpop.f32.mrf.mxu0 }
 0x4d0   : > { %5466 = vst [vmem:[%s8540_s9 + $0x30] sm:$0xff] %v5448_v0  ;;  %v5413_v12 = vmax.f32 %v5395_v62, 0.0  ;;  %v5371_v54 = vadd.f32 %v5324_v45, %v5120_v56  ;;  %v5127_v0 = vadd.f32 %v10504_v14, %v10490_v42 }
 0x4d1   : > { %v6940_v19 = vpop.f32.mrf.mxu0 }
 0x4d2   : > { %v5449_v38 = vadd.f32 %v5431_v33, %v5413_v12  ;;  %v5396_v10 = vadd.f32 %v10509_v8, %v5371_v54  ;;  %v5438_v54 = vld [vmem:[%s8540_s9 + $0x70] sm:$0xff]  ;;  %v5128_v19 = vadd.f32 %v10514_v11, %v10495_v31 }
 0x4d3   : > { %v5327_v61 = vpop.f32.mrf.mxu0 }
 0x4d4   : > { %5467 = vst [vmem:[%s8540_s9 + $0x38] sm:$0xff] %v5449_v38  ;;  %v5414_v59 = vmax.f32 %v5396_v10, 0.0  ;;  %v5372_v9 = vadd.f32 %v5327_v61, %v5121_v6  ;;  %v5439_v61 = vld [vmem:[%s8540_s9 + $0x78] sm:$0xff] }
 0x4d5   : > { %v6941_v49 = vpop.f32.mrf.mxu0 }
 0x4d6   : > { %v5450_v26 = vadd.f32 %v5432_v21, %v5414_v59  ;;  %v5397_v63 = vadd.f32 %v10509_v8, %v5372_v9  ;;  %v5129_v9 = vadd.f32 %v10520_v16, %v10500_v18 }
 0x4d7   : > { %v5332_v27 = vpop.f32.mrf.mxu0 }
 0x4d8   : > { %5468 = vst [vmem:[%s8540_s9 + $0x40] sm:$0xff] %v5450_v26  ;;  %v5415_v22 = vmax.f32 %v5397_v63, 0.0  ;;  %v5373_v51 = vadd.f32 %v5332_v27, %v5122_v3  ;;  %v5440_v26 = vld [vmem:[%s8540_s9 + $0x80] sm:$0xff] }
 0x4d9   : > { %v6944_v5 = vpop.f32.mrf.mxu0 }
 0x4da   : > { %v5451_v4 = vadd.f32 %v5433_v7, %v5415_v22  ;;  %v5398_v13 = vadd.f32 %v10509_v8, %v5373_v51  ;;  %v5441_v7 = vld [vmem:[%s8540_s9 + $0x88] sm:$0xff] }
 0x4db   : > { %v5335_v1 = vpop.f32.mrf.mxu0 }
 0x4dc   : > { %5469 = vst [vmem:[%s8540_s9 + $0x48] sm:$0xff] %v5451_v4  ;;  %v5416_v20 = vmax.f32 %v5398_v13, 0.0  ;;  %v5374_v15 = vadd.f32 %v5335_v1, %v5123_v53 }
 0x4dd   : > { %v6945_v57 = vpop.f32.mrf.mxu0 }
 0x4de   : > { %v5452_v55 = vadd.f32 %v5434_v41, %v5416_v20  ;;  %v5399_v2 = vadd.f32 %v10509_v8, %v5374_v15 }
 0x4df   : > { %v5340_v32 = vpop.f32.mrf.mxu0 }
 0x4e0   : > { %5470 = vst [vmem:[%s8540_s9 + $0x50] sm:$0xff] %v5452_v55  ;;  %v5417_v24 = vmax.f32 %v5399_v2, 0.0  ;;  %v5375_v52 = vadd.f32 %v5340_v32, %v5124_v47 }
 0x4e1   : > { %v6948_v48 = vpop.f32.mrf.mxu0 }
 0x4e2   : > { %v5453_v58 = vadd.f32 %v5435_v30, %v5417_v24  ;;  %v5400_v37 = vadd.f32 %v10509_v8, %v5375_v52 }
 0x4e3   : > { %v5343_v50 = vpop.f32.mrf.mxu0 }
 0x4e4   : > { %5471 = vst [vmem:[%s8540_s9 + $0x58] sm:$0xff] %v5453_v58  ;;  %v5418_v60 = vmax.f32 %v5400_v37, 0.0  ;;  %v5376_v25 = vadd.f32 %v5343_v50, %v5125_v34 }
 0x4e5   : > { %v6949_v17 = vpop.f32.mrf.mxu0 }
 0x4e6   : > { %v5454_v23 = vadd.f32 %v5436_v39, %v5418_v60  ;;  %v5401_v43 = vadd.f32 %v10509_v8, %v5376_v25 }
 0x4e7   : > { %v5348_v46 = vpop.f32.mrf.mxu0 }
 0x4e8   : > { %5472 = vst [vmem:[%s8540_s9 + $0x60] sm:$0xff] %v5454_v23  ;;  %v5419_v36 = vmax.f32 %v5401_v43, 0.0  ;;  %v5377_v29 = vadd.f32 %v5348_v46, %v5126_v35 }
 0x4e9   : > { %v6952_v56 = vpop.f32.mrf.mxu0 }
 0x4ea   : > { %v5455_v62 = vadd.f32 %v5437_v40, %v5419_v36  ;;  %v5402_v45 = vadd.f32 %v10509_v8, %v5377_v29 }
 0x4eb   : > { %v5351_v12 = vpop.f32.mrf.mxu0 }
 0x4ec   : > { %5473 = vst [vmem:[%s8540_s9 + $0x68] sm:$0xff] %v5455_v62  ;;  %v5420_v28 = vmax.f32 %v5402_v45, 0.0  ;;  %v5378_v44 = vadd.f32 %v5351_v12, %v5127_v0 }
 0x4ed   : > { %v6953_v33 = vpop.f32.mrf.mxu0 }
 0x4ee   : > { %v5456_v6 = vadd.f32 %v5438_v54, %v5420_v28  ;;  %v5403_v38 = vadd.f32 %v10509_v8, %v5378_v44 }
 0x4ef   : > { %v5356_v10 = vpop.f32.mrf.mxu0 }
 0x4f0   : > { %5474 = vst [vmem:[%s8540_s9 + $0x70] sm:$0xff] %v5456_v6  ;;  %v5421_v42 = vmax.f32 %v5403_v38, 0.0  ;;  %v5379_v14 = vadd.f32 %v5356_v10, %v5128_v19 }
 0x4f1   : > { %v6956_v59 = vpop.f32.mrf.mxu0 }
 0x4f2   : > { %v5457_v21 = vadd.f32 %v5439_v61, %v5421_v42  ;;  %v5404_v49 = vadd.f32 %v10509_v8, %v5379_v14 }
 0x4f3   : > { %v5359_v31 = vpop.f32.mrf.mxu0 }
 0x4f4   : > { %5475 = vst [vmem:[%s8540_s9 + $0x78] sm:$0xff] %v5457_v21  ;;  %v5422_v11 = vmax.f32 %v5404_v49, 0.0  ;;  %v5380_v3 = vadd.f32 %v5359_v31, %v5129_v9 }
 0x4f5   : > { %v6957_v63 = vpop.f32.mrf.mxu0 }
 0x4f6   : > { %v5458_v27 = vadd.f32 %v5440_v26, %v5422_v11  ;;  %v5405_v22 = vadd.f32 %v10509_v8, %v5380_v3 }
 0x4f8   : > { %5476 = vst [vmem:[%s8540_s9 + $0x80] sm:$0xff] %v5458_v27  ;;  %v5423_v51 = vmax.f32 %v5405_v22, 0.0 }
 0x4fa   : > { %v5459_v5 = vadd.f32 %v5441_v7, %v5423_v51 }
 0x4fc   : > { %5477 = vst [vmem:[%s8540_s9 + $0x88] sm:$0xff] %v5459_v5 }
 0x4fd PF: > { %s17_s28 = sadd.s32 1, %s7293_s28   ;;  %s10960_s24 = smov %s7285_s26 }
 0x4fe   : > { %p14_p7 = scmp.ge.s32.totalorder %s17_s28, 6   ;;  %s10961_s25 = smov %s7289_s27 }
 0x4ff   : > { %s10962_s26 = smov %s10965_s29  ;;  %s10963_s27 = smov %s10969_s30 }
 0x500   :  { %16 = sbr.rel (!%p14_p7) target bundleno = 3 (0x3), region = 88 }

</bundles_post_ra>
